<compile_context>
chip_gen: v7x
topology: tpu7x:2x2x1
jax: 0.10.0
libtpu: 0.0.40
codegen_flags: <defaults>
</compile_context>

<pallas_src>
import numpy as np
import jax
import jax.numpy as jnp
from jax.experimental import pallas as pl
from jax.experimental.pallas import tpu as pltpu

# ----------------------------- config (small, consistent with the module) -------------
B_SZ = 2
IN_FEATURES = 3        # C
OUT_FEATURES = 3
SEG_LEN = 16           # T
POSE_NUM = 4           # V
EMB = 32               # embedding_channels
PATCH_LEN = 8
PATCH_STRIDE = 4
PATCH_PADDING = 0
E_LAYERS = 4
FUSION_ENC_LAYERS = 3  # "fusion_layer" in the module
NUM_LATENTS = 16
TASK = "rec"

PATCH_NUM = int(np.floor((SEG_LEN + PATCH_PADDING - PATCH_LEN) / PATCH_STRIDE) + 1)  # 3
L_NODES = POSE_NUM * PATCH_NUM                                                        # 12
BL = B_SZ * L_NODES                                                                   # 24
BV = B_SZ * POSE_NUM                                                                  # 8
N_FREQ = PATCH_LEN // 2 + 1                                                           # 5
K_TIME = IN_FEATURES * PATCH_LEN                                                      # 24
K_FRE = IN_FEATURES * N_FREQ                                                          # 15
N_FUSION = E_LAYERS - FUSION_ENC_LAYERS                                               # 1
L_CAT = 3 * L_NODES                                                                   # 36


# ----------------------------- the single fused Pallas kernel --------------------------
def _fused_forward_kernel(
    feat_ref,                     # (BL, K_TIME)   raw time-domain patch features
    dre_ref, dim_ref,             # (K_TIME, K_FRE) block-diag DFT (re / -im)
    wt_ref, bt_ref,               # time embedding  (K_TIME, EMB), (1, EMB)
    wf_ref, bf_ref,               # fre  embedding  (K_FRE, EMB),  (1, EMB)
    ww_ref, bw_ref,               # wave embedding  (Haar folded)  (K_TIME, EMB), (1, EMB)
    a6_ref,                       # (72, 72) block-diag adjacency (6 x A)
    encw_ref, encb_ref,           # (3, 3, 3*EMB, EMB), (3, 3, 1, EMB)
    fusl_ref,                     # (N_FUSION, NUM_LATENTS, EMB)
    fussc_ref,                    # (N_FUSION, 36, 1) per-row scale (scale_t/f/w)
    fusw_ref, fusb_ref,           # (N_FUSION, 3, 3*EMB, EMB), (N_FUSION, 3, 1, EMB)
    perm_ref,                     # (BL, BL) decode row-permutation
    hw_ref, hb_ref,               # head (3*EMB, OUT*T), (1, OUT*T)
    o_ref,                        # (B*V, OUT*T)
):
    f32 = jnp.float32
    feat = feat_ref[...]                                            # (24, 24)

    # ---------------- embeddings (time / fre / wave), all in VMEM ----------------
    time = jnp.dot(feat, wt_ref[...], preferred_element_type=f32) + bt_ref[...]
    re = jnp.dot(feat, dre_ref[...], preferred_element_type=f32)    # (24, 15)
    im = jnp.dot(feat, dim_ref[...], preferred_element_type=f32)
    mag = jnp.sqrt(re * re + im * im)                               # rFFT magnitude
    fre = jnp.dot(mag, wf_ref[...], preferred_element_type=f32) + bf_ref[...]
    wave = jnp.dot(feat, ww_ref[...], preferred_element_type=f32) + bw_ref[...]

    # stacked activation, domain-major: rows = d*24 + b*12 + (v*P + p)
    x = jnp.concatenate([time, fre, wave], axis=0)                  # (72, 32)
    a6 = a6_ref[...]                                                # (72, 72)

    def cheb(x_in, w_t, b_t, w_f, b_f, w_w, b_w):
        # K=3 Chebyshev conv for all 6 (domain, batch) graphs at once.
        t1 = jnp.dot(a6, x_in, preferred_element_type=f32)
        t2 = 2.0 * jnp.dot(a6, t1, preferred_element_type=f32) - x_in
        tc = jnp.concatenate([x_in, t1, t2], axis=-1)               # (72, 96)
        yt = jnp.dot(tc[0:BL], w_t, preferred_element_type=f32) + b_t
        yf = jnp.dot(tc[BL:2 * BL], w_f, preferred_element_type=f32) + b_f
        yw = jnp.dot(tc[2 * BL:3 * BL], w_w, preferred_element_type=f32) + b_w
        return jnp.concatenate([yt, yf, yw], axis=0)                # (72, 32)

    # ---------------- per-domain encoders (3 layers each, no residual) ----------------
    for i in range(FUSION_ENC_LAYERS):
        x = cheb(x,
                 encw_ref[i, 0], encb_ref[i, 0],
                 encw_ref[i, 1], encb_ref[i, 1],
                 encw_ref[i, 2], encb_ref[i, 2])

    # ---------------- fusion layers ----------------
    inv_sqrt_c = float(EMB) ** -0.5
    for j in range(N_FUSION):
        lat = fusl_ref[j]                                           # (16, 32)
        scale_col = fussc_ref[j]                                    # (36, 1)
        ys = []
        for b in range(B_SZ):
            # per-batch concat of [time_b ; fre_b ; wave_b]  -> (36, 32)
            cb = jnp.concatenate(
                [x[b * L_NODES:(b + 1) * L_NODES],
                 x[BL + b * L_NODES:BL + (b + 1) * L_NODES],
                 x[2 * BL + b * L_NODES:2 * BL + (b + 1) * L_NODES]], axis=0)
            # attention 1: latents attend over concat
            s1 = jnp.dot(lat, cb.T, preferred_element_type=f32) * inv_sqrt_c   # (16,36)
            s1 = s1 - jnp.max(s1, axis=-1, keepdims=True)
            e1 = jnp.exp(s1)
            p1 = e1 * pl.reciprocal(jnp.sum(e1, axis=-1, keepdims=True), approx=True)
            fl = jnp.dot(p1, cb, preferred_element_type=f32)                   # (16,32)
            # attention 2: all three domain queries share K/V = fusion latents
            s2 = jnp.dot(cb, fl.T, preferred_element_type=f32) * inv_sqrt_c    # (36,16)
            s2 = s2 - jnp.max(s2, axis=-1, keepdims=True)
            e2 = jnp.exp(s2)
            p2 = e2 * pl.reciprocal(jnp.sum(e2, axis=-1, keepdims=True), approx=True)
            yb = jnp.dot(p2, fl, preferred_element_type=f32)                   # (36,32)
            ys.append(scale_col * yb)                                          # scaled
        # scatter the scaled attention updates back into domain-major order
        delta = jnp.concatenate(
            [ys[b][d * L_NODES:(d + 1) * L_NODES]
             for d in range(3) for b in range(B_SZ)], axis=0)                  # (72,32)
        x = x + delta
        # residual Chebyshev forward layers
        x = x + cheb(x,
                     fusw_ref[j, 0], fusb_ref[j, 0],
                     fusw_ref[j, 1], fusb_ref[j, 1],
                     fusw_ref[j, 2], fusb_ref[j, 2])

    # ---------------- combine & decode ('rec' head) ----------------
    res = (x[0:BL] + x[BL:2 * BL] + x[2 * BL:3 * BL]) * 0.5                    # (24,32)
    # reorder rows (b,v,p) -> (p, b*V+v) via a constant permutation matmul,
    # then lay the patch axis out along lanes: head_in[g, p*EMB + c].
    resp = jnp.dot(perm_ref[...], res, preferred_element_type=f32)             # (24,32)
    head_in = jnp.concatenate(
        [resp[0:BV], resp[BV:2 * BV], resp[2 * BV:3 * BV]], axis=-1)           # (8, 96)
    o_ref[...] = (jnp.dot(head_in, hw_ref[...], preferred_element_type=f32)
                  + hb_ref[...])                                               # (8, 48)


# ----------------------------- constants (host-side numpy) ------------------------------
def build_adj(V, P):
    # deterministic spatio-temporal graph: joint chain + temporal chain + self loops,
    # symmetric normalization.
    L = V * P
    A = np.zeros((L, L), np.float32)

    def idx(v, p):
        return v * P + p

    for v in range(V):
        for p in range(P):
            i = idx(v, p)
            A[i, i] = 1.0
            if p + 1 < P:
                j = idx(v, p + 1)
                A[i, j] = 1.0
                A[j, i] = 1.0
            if v + 1 < V:
                j = idx(v + 1, p)
                A[i, j] = 1.0
                A[j, i] = 1.0
    d = A.sum(1)
    dinv = 1.0 / np.sqrt(d)
    return (A * dinv[:, None] * dinv[None, :]).astype(np.float32)


def build_dft_mats():
    # per-channel real-DFT matrices so |rfft(patch)| is two tiny matmuls + sqrt
    Dre = np.zeros((K_TIME, K_FRE), np.float32)
    Dim = np.zeros((K_TIME, K_FRE), np.float32)
    for c in range(IN_FEATURES):
        for t in range(PATCH_LEN):
            for f in range(N_FREQ):
                ang = 2.0 * np.pi * f * t / PATCH_LEN
                Dre[c * PATCH_LEN + t, c * N_FREQ + f] = np.cos(ang)
                Dim[c * PATCH_LEN + t, c * N_FREQ + f] = -np.sin(ang)
    return Dre, Dim


def build_haar():
    # Haar split as a linear map, so it can be folded into the wave embedding weight.
    H = np.zeros((K_TIME, K_TIME), np.float32)
    inv = 1.0 / np.sqrt(2.0)
    half = PATCH_LEN // 2
    for c in range(IN_FEATURES):
        for j in range(half):
            H[c * PATCH_LEN + 2 * j, c * PATCH_LEN + j] = inv          # approx
            H[c * PATCH_LEN + 2 * j + 1, c * PATCH_LEN + j] = inv
            H[c * PATCH_LEN + 2 * j, c * PATCH_LEN + half + j] = inv   # detail
            H[c * PATCH_LEN + 2 * j + 1, c * PATCH_LEN + half + j] = -inv
    return H


def build_perm():
    # rows (b*12 + v*3 + p)  ->  rows (p*8 + (b*4 + v))
    P = np.zeros((BL, BL), np.float32)
    for g in range(BV):
        for p in range(PATCH_NUM):
            P[p * BV + g, g * PATCH_NUM + p] = 1.0
    return P


# ----------------------------- parameters ----------------------------------------------
def init_params(key):
    ks = iter(jax.random.split(key, 64))

    def nrm(shape, std=0.02):
        return (jax.random.normal(next(ks), shape, jnp.float32) * std).astype(jnp.float32)

    def cheb_p():
        return {
            "w0": nrm((EMB, EMB)),
            "w1": nrm((EMB, EMB)),
            "w2": nrm((EMB, EMB)),
            "b": jnp.zeros((1, EMB), jnp.float32),
        }

    params = {
        "emb_time": {"w": nrm((K_TIME, EMB)), "b": jnp.zeros((1, EMB), jnp.float32)},
        "emb_fre": {"w": nrm((K_FRE, EMB)), "b": jnp.zeros((1, EMB), jnp.float32)},
        "emb_wave": {"w": nrm((K_TIME, EMB)), "b": jnp.zeros((1, EMB), jnp.float32)},
        "enc_time": [cheb_p() for _ in range(FUSION_ENC_LAYERS)],
        "enc_fre": [cheb_p() for _ in range(FUSION_ENC_LAYERS)],
        "enc_wave": [cheb_p() for _ in range(FUSION_ENC_LAYERS)],
        "fusion": [
            {
                "latents": nrm((1, NUM_LATENTS, EMB)),
                "scale_t": jnp.zeros((1,), jnp.float32),   # zero-init, as in the module
                "scale_f": jnp.zeros((1,), jnp.float32),
                "scale_w": jnp.zeros((1,), jnp.float32),
                "time_fwd": cheb_p(),
                "fre_fwd": cheb_p(),
                "wave_fwd": cheb_p(),
            }
            for _ in range(N_FUSION)
        ],
        "head_w": nrm((EMB * PATCH_NUM, OUT_FEATURES * SEG_LEN)),
        "head_b": jnp.zeros((1, OUT_FEATURES * SEG_LEN), jnp.float32),
    }
    return params


def pack_inputs(params):
    """One-time packing of all weights / constants into the kernel operand tuple."""
    Dre, Dim = build_dft_mats()
    H = build_haar()
    A = build_adj(POSE_NUM, PATCH_NUM)
    A6 = np.kron(np.eye(3 * B_SZ, dtype=np.float32), A).astype(np.float32)
    PERM = build_perm()

    def stack_cheb(p):
        return jnp.concatenate([p["w0"], p["w1"], p["w2"]], axis=0), p["b"]  # (96,32),(1,32)

    enc_w, enc_b = [], []
    for i in range(FUSION_ENC_LAYERS):
        ws, bs = [], []
        for dom in ("enc_time", "enc_fre", "enc_wave"):
            w, b = stack_cheb(params[dom][i])
            ws.append(w)
            bs.append(b)
        enc_w.append(jnp.stack(ws))
        enc_b.append(jnp.stack(bs))
    enc_w = jnp.stack(enc_w)            # (3, 3, 96, 32)
    enc_b = jnp.stack(enc_b)            # (3, 3, 1, 32)

    fus_lat, fus_scale, fus_w, fus_b = [], [], [], []
    for fl in params["fusion"]:
        fus_lat.append(fl["latents"][0])                                     # (16, 32)
        sc = jnp.concatenate([
            jnp.broadcast_to(fl["scale_t"], (L_NODES,)),
            jnp.broadcast_to(fl["scale_f"], (L_NODES,)),
            jnp.broadcast_to(fl["scale_w"], (L_NODES,)),
        ])[:, None]                                                          # (36, 1)
        fus_scale.append(sc)
        ws, bs = [], []
        for dom in ("time_fwd", "fre_fwd", "wave_fwd"):
            w, b = stack_cheb(fl[dom])
            ws.append(w)
            bs.append(b)
        fus_w.append(jnp.stack(ws))
        fus_b.append(jnp.stack(bs))
    fus_lat = jnp.stack(fus_lat)        # (N_FUSION, 16, 32)
    fus_scale = jnp.stack(fus_scale)    # (N_FUSION, 36, 1)
    fus_w = jnp.stack(fus_w)            # (N_FUSION, 3, 96, 32)
    fus_b = jnp.stack(fus_b)            # (N_FUSION, 3, 1, 32)

    w_wave_eff = jnp.asarray(H, jnp.float32) @ params["emb_wave"]["w"]       # Haar folded

    return (
        jnp.asarray(Dre), jnp.asarray(Dim),
        params["emb_time"]["w"], params["emb_time"]["b"],
        params["emb_fre"]["w"], params["emb_fre"]["b"],
        w_wave_eff, params["emb_wave"]["b"],
        jnp.asarray(A6),
        enc_w, enc_b,
        fus_lat, fus_scale, fus_w, fus_b,
        jnp.asarray(PERM),
        params["head_w"], params["head_b"],
    )


# ----------------------------- forward --------------------------------------------------
def patchify_flat(x):
    # x: (B, C, T, V) -> (B*V*P, C*patch_len), rows ordered (b, v, p)
    xt = jnp.transpose(x, (0, 3, 1, 2))                                     # (B, V, C, T)
    patches = jnp.stack(
        [xt[..., p * PATCH_STRIDE:p * PATCH_STRIDE + PATCH_LEN]
         for p in range(PATCH_NUM)], axis=2)                                # (B,V,P,C,pl)
    return patches.reshape(BL, K_TIME).astype(jnp.float32)


@jax.jit
def model_forward(x, packed):
    feat = patchify_flat(x)
    n_in = 1 + len(packed)
    vmem = pl.BlockSpec(memory_space=pltpu.MemorySpace.VMEM)
    y8 = pl.pallas_call(
        _fused_forward_kernel,
        out_shape=jax.ShapeDtypeStruct((BV, OUT_FEATURES * SEG_LEN), jnp.float32),
        in_specs=[vmem] * n_in,
        out_specs=vmem,
    )(feat, *packed)
    # decode reshape exactly as Model.forward ('rec'):
    # (B, V, out*T) -> (B, V, T, out) -> (B, out, T, V)
    y = y8.reshape(B_SZ, POSE_NUM, SEG_LEN, OUT_FEATURES).transpose(0, 3, 2, 1)
    return y


# ----------------------------- main -----------------------------------------------------
if __name__ == "__main__":
    key = jax.random.PRNGKey(0)
    k_x, k_p = jax.random.split(key)
    x = jax.random.normal(k_x, (B_SZ, IN_FEATURES, SEG_LEN, POSE_NUM), jnp.float32)
    params = init_params(k_p)
    packed = pack_inputs(params)

    y = model_forward(x, packed)
    y = jax.block_until_ready(y)
    assert y.shape == (B_SZ, OUT_FEATURES, SEG_LEN, POSE_NUM), y.shape
    assert bool(jnp.all(jnp.isfinite(y)))
    print("KERNEL_OK")
</pallas_src>

<mosaic_0001>
module attributes {stable_mosaic.version = 11 : i64} {
  func.func @_fused_forward_kernel(%arg0: memref<24x24xf32, #tpu.memory_space<vmem>>, %arg1: memref<24x15xf32, #tpu.memory_space<vmem>>, %arg2: memref<24x15xf32, #tpu.memory_space<vmem>>, %arg3: memref<24x32xf32, #tpu.memory_space<vmem>>, %arg4: memref<1x32xf32, #tpu.memory_space<vmem>>, %arg5: memref<15x32xf32, #tpu.memory_space<vmem>>, %arg6: memref<1x32xf32, #tpu.memory_space<vmem>>, %arg7: memref<24x32xf32, #tpu.memory_space<vmem>>, %arg8: memref<1x32xf32, #tpu.memory_space<vmem>>, %arg9: memref<72x72xf32, #tpu.memory_space<vmem>>, %arg10: memref<3x3x96x32xf32, #tpu.memory_space<vmem>>, %arg11: memref<3x3x1x32xf32, #tpu.memory_space<vmem>>, %arg12: memref<1x16x32xf32, #tpu.memory_space<vmem>>, %arg13: memref<1x36x1xf32, #tpu.memory_space<vmem>>, %arg14: memref<1x3x96x32xf32, #tpu.memory_space<vmem>>, %arg15: memref<1x3x1x32xf32, #tpu.memory_space<vmem>>, %arg16: memref<24x24xf32, #tpu.memory_space<vmem>>, %arg17: memref<96x48xf32, #tpu.memory_space<vmem>>, %arg18: memref<1x48xf32, #tpu.memory_space<vmem>>, %arg19: memref<8x48xf32, #tpu.memory_space<vmem>>) attributes {dimension_semantics = [], scalar_prefetch = 0 : i64, scratch_operands = 0 : i64, tpu.core_type = #tpu.core_type<tc>} {
    %c0 = arith.constant 0 : index
    %c0_0 = arith.constant 0 : index
    %0 = vector.load %arg0[%c0, %c0_0] : memref<24x24xf32, #tpu.memory_space<vmem>>, vector<24x24xf32>
    %c0_1 = arith.constant 0 : index
    %c0_2 = arith.constant 0 : index
    %1 = vector.load %arg3[%c0_1, %c0_2] : memref<24x32xf32, #tpu.memory_space<vmem>>, vector<24x32xf32>
    %cst = arith.constant dense<0.000000e+00> : vector<24x32xf32>
    %2 = tpu.matmul %0, %1, %cst {dimension_numbers = #tpu.dot_dimension_numbers<[1], [0], [0], [1], [0, 0, 1, 1], [], []>} : vector<24x24xf32>, vector<24x32xf32>, vector<24x32xf32> -> vector<24x32xf32>
    %c0_3 = arith.constant 0 : index
    %c0_4 = arith.constant 0 : index
    %3 = vector.load %arg4[%c0_3, %c0_4] : memref<1x32xf32, #tpu.memory_space<vmem>>, vector<1x32xf32>
    %4 = vector.broadcast %3 : vector<1x32xf32> to vector<24x32xf32>
    %5 = arith.addf %2, %4 : vector<24x32xf32>
    %c0_5 = arith.constant 0 : index
    %c0_6 = arith.constant 0 : index
    %6 = vector.load %arg1[%c0_5, %c0_6] : memref<24x15xf32, #tpu.memory_space<vmem>>, vector<24x15xf32>
    %cst_7 = arith.constant dense<0.000000e+00> : vector<24x15xf32>
    %7 = tpu.matmul %0, %6, %cst_7 {dimension_numbers = #tpu.dot_dimension_numbers<[1], [0], [0], [1], [0, 0, 1, 1], [], []>} : vector<24x24xf32>, vector<24x15xf32>, vector<24x15xf32> -> vector<24x15xf32>
    %c0_8 = arith.constant 0 : index
    %c0_9 = arith.constant 0 : index
    %8 = vector.load %arg2[%c0_8, %c0_9] : memref<24x15xf32, #tpu.memory_space<vmem>>, vector<24x15xf32>
    %cst_10 = arith.constant dense<0.000000e+00> : vector<24x15xf32>
    %9 = tpu.matmul %0, %8, %cst_10 {dimension_numbers = #tpu.dot_dimension_numbers<[1], [0], [0], [1], [0, 0, 1, 1], [], []>} : vector<24x24xf32>, vector<24x15xf32>, vector<24x15xf32> -> vector<24x15xf32>
    %10 = arith.mulf %7, %7 : vector<24x15xf32>
    %11 = arith.mulf %9, %9 : vector<24x15xf32>
    %12 = arith.addf %10, %11 : vector<24x15xf32>
    %13 = math.sqrt %12 : vector<24x15xf32>
    %c0_11 = arith.constant 0 : index
    %c0_12 = arith.constant 0 : index
    %14 = vector.load %arg5[%c0_11, %c0_12] : memref<15x32xf32, #tpu.memory_space<vmem>>, vector<15x32xf32>
    %cst_13 = arith.constant dense<0.000000e+00> : vector<24x32xf32>
    %15 = tpu.matmul %13, %14, %cst_13 {dimension_numbers = #tpu.dot_dimension_numbers<[1], [0], [0], [1], [0, 0, 1, 1], [], []>} : vector<24x15xf32>, vector<15x32xf32>, vector<24x32xf32> -> vector<24x32xf32>
    %c0_14 = arith.constant 0 : index
    %c0_15 = arith.constant 0 : index
    %16 = vector.load %arg6[%c0_14, %c0_15] : memref<1x32xf32, #tpu.memory_space<vmem>>, vector<1x32xf32>
    %17 = vector.broadcast %16 : vector<1x32xf32> to vector<24x32xf32>
    %18 = arith.addf %15, %17 : vector<24x32xf32>
    %c0_16 = arith.constant 0 : index
    %c0_17 = arith.constant 0 : index
    %19 = vector.load %arg7[%c0_16, %c0_17] : memref<24x32xf32, #tpu.memory_space<vmem>>, vector<24x32xf32>
    %cst_18 = arith.constant dense<0.000000e+00> : vector<24x32xf32>
    %20 = tpu.matmul %0, %19, %cst_18 {dimension_numbers = #tpu.dot_dimension_numbers<[1], [0], [0], [1], [0, 0, 1, 1], [], []>} : vector<24x24xf32>, vector<24x32xf32>, vector<24x32xf32> -> vector<24x32xf32>
    %c0_19 = arith.constant 0 : index
    %c0_20 = arith.constant 0 : index
    %21 = vector.load %arg8[%c0_19, %c0_20] : memref<1x32xf32, #tpu.memory_space<vmem>>, vector<1x32xf32>
    %22 = vector.broadcast %21 : vector<1x32xf32> to vector<24x32xf32>
    %23 = arith.addf %20, %22 : vector<24x32xf32>
    %24 = tpu.concatenate %5, %18, %23 in 0 : vector<24x32xf32>, vector<24x32xf32>, vector<24x32xf32> -> vector<72x32xf32>
    %c0_21 = arith.constant 0 : index
    %c0_22 = arith.constant 0 : index
    %25 = vector.load %arg9[%c0_21, %c0_22] : memref<72x72xf32, #tpu.memory_space<vmem>>, vector<72x72xf32>
    %c0_23 = arith.constant 0 : index
    %c0_24 = arith.constant 0 : index
    %c0_25 = arith.constant 0 : index
    %c0_26 = arith.constant 0 : index
    %26 = vector.load %arg10[%c0_23, %c0_24, %c0_25, %c0_26] : memref<3x3x96x32xf32, #tpu.memory_space<vmem>>, vector<1x1x96x32xf32>
    %27 = vector.shape_cast %26 : vector<1x1x96x32xf32> to vector<96x32xf32>
    %c0_27 = arith.constant 0 : index
    %c0_28 = arith.constant 0 : index
    %c0_29 = arith.constant 0 : index
    %c0_30 = arith.constant 0 : index
    %28 = vector.load %arg11[%c0_27, %c0_28, %c0_29, %c0_30] : memref<3x3x1x32xf32, #tpu.memory_space<vmem>>, vector<1x1x1x32xf32>
    %29 = vector.shape_cast %28 : vector<1x1x1x32xf32> to vector<1x32xf32>
    %c0_31 = arith.constant 0 : index
    %c1 = arith.constant 1 : index
    %c0_32 = arith.constant 0 : index
    %c0_33 = arith.constant 0 : index
    %30 = vector.load %arg10[%c0_31, %c1, %c0_32, %c0_33] : memref<3x3x96x32xf32, #tpu.memory_space<vmem>>, vector<1x1x96x32xf32>
    %31 = vector.shape_cast %30 : vector<1x1x96x32xf32> to vector<96x32xf32>
    %c0_34 = arith.constant 0 : index
    %c1_35 = arith.constant 1 : index
    %c0_36 = arith.constant 0 : index
    %c0_37 = arith.constant 0 : index
    %32 = vector.load %arg11[%c0_34, %c1_35, %c0_36, %c0_37] : memref<3x3x1x32xf32, #tpu.memory_space<vmem>>, vector<1x1x1x32xf32>
    %33 = vector.shape_cast %32 : vector<1x1x1x32xf32> to vector<1x32xf32>
    %c0_38 = arith.constant 0 : index
    %c2 = arith.constant 2 : index
    %c0_39 = arith.constant 0 : index
    %c0_40 = arith.constant 0 : index
    %34 = vector.load %arg10[%c0_38, %c2, %c0_39, %c0_40] : memref<3x3x96x32xf32, #tpu.memory_space<vmem>>, vector<1x1x96x32xf32>
    %35 = vector.shape_cast %34 : vector<1x1x96x32xf32> to vector<96x32xf32>
    %c0_41 = arith.constant 0 : index
    %c2_42 = arith.constant 2 : index
    %c0_43 = arith.constant 0 : index
    %c0_44 = arith.constant 0 : index
    %36 = vector.load %arg11[%c0_41, %c2_42, %c0_43, %c0_44] : memref<3x3x1x32xf32, #tpu.memory_space<vmem>>, vector<1x1x1x32xf32>
    %37 = vector.shape_cast %36 : vector<1x1x1x32xf32> to vector<1x32xf32>
    %cst_45 = arith.constant dense<0.000000e+00> : vector<72x32xf32>
    %38 = tpu.matmul %25, %24, %cst_45 {dimension_numbers = #tpu.dot_dimension_numbers<[1], [0], [0], [1], [0, 0, 1, 1], [], []>} : vector<72x72xf32>, vector<72x32xf32>, vector<72x32xf32> -> vector<72x32xf32>
    %cst_46 = arith.constant dense<0.000000e+00> : vector<72x32xf32>
    %39 = tpu.matmul %25, %38, %cst_46 {dimension_numbers = #tpu.dot_dimension_numbers<[1], [0], [0], [1], [0, 0, 1, 1], [], []>} : vector<72x72xf32>, vector<72x32xf32>, vector<72x32xf32> -> vector<72x32xf32>
    %cst_47 = arith.constant 2.000000e+00 : f32
    %40 = vector.broadcast %cst_47 : f32 to vector<72x32xf32>
    %41 = arith.mulf %40, %39 : vector<72x32xf32>
    %42 = arith.subf %41, %24 : vector<72x32xf32>
    %43 = tpu.concatenate %24, %38, %42 in 1 : vector<72x32xf32>, vector<72x32xf32>, vector<72x32xf32> -> vector<72x96xf32>
    %44 = vector.extract_strided_slice %43 {offsets = [0, 0], sizes = [24, 96], strides = [1, 1]} : vector<72x96xf32> to vector<24x96xf32>
    %cst_48 = arith.constant dense<0.000000e+00> : vector<24x32xf32>
    %45 = tpu.matmul %44, %27, %cst_48 {dimension_numbers = #tpu.dot_dimension_numbers<[1], [0], [0], [1], [0, 0, 1, 1], [], []>} : vector<24x96xf32>, vector<96x32xf32>, vector<24x32xf32> -> vector<24x32xf32>
    %46 = vector.broadcast %29 : vector<1x32xf32> to vector<24x32xf32>
    %47 = arith.addf %45, %46 : vector<24x32xf32>
    %48 = vector.extract_strided_slice %43 {offsets = [24, 0], sizes = [24, 96], strides = [1, 1]} : vector<72x96xf32> to vector<24x96xf32>
    %cst_49 = arith.constant dense<0.000000e+00> : vector<24x32xf32>
    %49 = tpu.matmul %48, %31, %cst_49 {dimension_numbers = #tpu.dot_dimension_numbers<[1], [0], [0], [1], [0, 0, 1, 1], [], []>} : vector<24x96xf32>, vector<96x32xf32>, vector<24x32xf32> -> vector<24x32xf32>
    %50 = vector.broadcast %33 : vector<1x32xf32> to vector<24x32xf32>
    %51 = arith.addf %49, %50 : vector<24x32xf32>
    %52 = vector.extract_strided_slice %43 {offsets = [48, 0], sizes = [24, 96], strides = [1, 1]} : vector<72x96xf32> to vector<24x96xf32>
    %cst_50 = arith.constant dense<0.000000e+00> : vector<24x32xf32>
    %53 = tpu.matmul %52, %35, %cst_50 {dimension_numbers = #tpu.dot_dimension_numbers<[1], [0], [0], [1], [0, 0, 1, 1], [], []>} : vector<24x96xf32>, vector<96x32xf32>, vector<24x32xf32> -> vector<24x32xf32>
    %54 = vector.broadcast %37 : vector<1x32xf32> to vector<24x32xf32>
    %55 = arith.addf %53, %54 : vector<24x32xf32>
    %56 = tpu.concatenate %47, %51, %55 in 0 : vector<24x32xf32>, vector<24x32xf32>, vector<24x32xf32> -> vector<72x32xf32>
    %c1_51 = arith.constant 1 : index
    %c0_52 = arith.constant 0 : index
    %c0_53 = arith.constant 0 : index
    %c0_54 = arith.constant 0 : index
    %57 = vector.load %arg10[%c1_51, %c0_52, %c0_53, %c0_54] : memref<3x3x96x32xf32, #tpu.memory_space<vmem>>, vector<1x1x96x32xf32>
    %58 = vector.shape_cast %57 : vector<1x1x96x32xf32> to vector<96x32xf32>
    %c1_55 = arith.constant 1 : index
    %c0_56 = arith.constant 0 : index
    %c0_57 = arith.constant 0 : index
    %c0_58 = arith.constant 0 : index
    %59 = vector.load %arg11[%c1_55, %c0_56, %c0_57, %c0_58] : memref<3x3x1x32xf32, #tpu.memory_space<vmem>>, vector<1x1x1x32xf32>
    %60 = vector.shape_cast %59 : vector<1x1x1x32xf32> to vector<1x32xf32>
    %c1_59 = arith.constant 1 : index
    %c1_60 = arith.constant 1 : index
    %c0_61 = arith.constant 0 : index
    %c0_62 = arith.constant 0 : index
    %61 = vector.load %arg10[%c1_59, %c1_60, %c0_61, %c0_62] : memref<3x3x96x32xf32, #tpu.memory_space<vmem>>, vector<1x1x96x32xf32>
    %62 = vector.shape_cast %61 : vector<1x1x96x32xf32> to vector<96x32xf32>
    %c1_63 = arith.constant 1 : index
    %c1_64 = arith.constant 1 : index
    %c0_65 = arith.constant 0 : index
    %c0_66 = arith.constant 0 : index
    %63 = vector.load %arg11[%c1_63, %c1_64, %c0_65, %c0_66] : memref<3x3x1x32xf32, #tpu.memory_space<vmem>>, vector<1x1x1x32xf32>
    %64 = vector.shape_cast %63 : vector<1x1x1x32xf32> to vector<1x32xf32>
    %c1_67 = arith.constant 1 : index
    %c2_68 = arith.constant 2 : index
    %c0_69 = arith.constant 0 : index
    %c0_70 = arith.constant 0 : index
    %65 = vector.load %arg10[%c1_67, %c2_68, %c0_69, %c0_70] : memref<3x3x96x32xf32, #tpu.memory_space<vmem>>, vector<1x1x96x32xf32>
    %66 = vector.shape_cast %65 : vector<1x1x96x32xf32> to vector<96x32xf32>
    %c1_71 = arith.constant 1 : index
    %c2_72 = arith.constant 2 : index
    %c0_73 = arith.constant 0 : index
    %c0_74 = arith.constant 0 : index
    %67 = vector.load %arg11[%c1_71, %c2_72, %c0_73, %c0_74] : memref<3x3x1x32xf32, #tpu.memory_space<vmem>>, vector<1x1x1x32xf32>
    %68 = vector.shape_cast %67 : vector<1x1x1x32xf32> to vector<1x32xf32>
    %cst_75 = arith.constant dense<0.000000e+00> : vector<72x32xf32>
    %69 = tpu.matmul %25, %56, %cst_75 {dimension_numbers = #tpu.dot_dimension_numbers<[1], [0], [0], [1], [0, 0, 1, 1], [], []>} : vector<72x72xf32>, vector<72x32xf32>, vector<72x32xf32> -> vector<72x32xf32>
    %cst_76 = arith.constant dense<0.000000e+00> : vector<72x32xf32>
    %70 = tpu.matmul %25, %69, %cst_76 {dimension_numbers = #tpu.dot_dimension_numbers<[1], [0], [0], [1], [0, 0, 1, 1], [], []>} : vector<72x72xf32>, vector<72x32xf32>, vector<72x32xf32> -> vector<72x32xf32>
    %cst_77 = arith.constant 2.000000e+00 : f32
    %71 = vector.broadcast %cst_77 : f32 to vector<72x32xf32>
    %72 = arith.mulf %71, %70 : vector<72x32xf32>
    %73 = arith.subf %72, %56 : vector<72x32xf32>
    %74 = tpu.concatenate %56, %69, %73 in 1 : vector<72x32xf32>, vector<72x32xf32>, vector<72x32xf32> -> vector<72x96xf32>
    %75 = vector.extract_strided_slice %74 {offsets = [0, 0], sizes = [24, 96], strides = [1, 1]} : vector<72x96xf32> to vector<24x96xf32>
    %cst_78 = arith.constant dense<0.000000e+00> : vector<24x32xf32>
    %76 = tpu.matmul %75, %58, %cst_78 {dimension_numbers = #tpu.dot_dimension_numbers<[1], [0], [0], [1], [0, 0, 1, 1], [], []>} : vector<24x96xf32>, vector<96x32xf32>, vector<24x32xf32> -> vector<24x32xf32>
    %77 = vector.broadcast %60 : vector<1x32xf32> to vector<24x32xf32>
    %78 = arith.addf %76, %77 : vector<24x32xf32>
    %79 = vector.extract_strided_slice %74 {offsets = [24, 0], sizes = [24, 96], strides = [1, 1]} : vector<72x96xf32> to vector<24x96xf32>
    %cst_79 = arith.constant dense<0.000000e+00> : vector<24x32xf32>
    %80 = tpu.matmul %79, %62, %cst_79 {dimension_numbers = #tpu.dot_dimension_numbers<[1], [0], [0], [1], [0, 0, 1, 1], [], []>} : vector<24x96xf32>, vector<96x32xf32>, vector<24x32xf32> -> vector<24x32xf32>
    %81 = vector.broadcast %64 : vector<1x32xf32> to vector<24x32xf32>
    %82 = arith.addf %80, %81 : vector<24x32xf32>
    %83 = vector.extract_strided_slice %74 {offsets = [48, 0], sizes = [24, 96], strides = [1, 1]} : vector<72x96xf32> to vector<24x96xf32>
    %cst_80 = arith.constant dense<0.000000e+00> : vector<24x32xf32>
    %84 = tpu.matmul %83, %66, %cst_80 {dimension_numbers = #tpu.dot_dimension_numbers<[1], [0], [0], [1], [0, 0, 1, 1], [], []>} : vector<24x96xf32>, vector<96x32xf32>, vector<24x32xf32> -> vector<24x32xf32>
    %85 = vector.broadcast %68 : vector<1x32xf32> to vector<24x32xf32>
    %86 = arith.addf %84, %85 : vector<24x32xf32>
    %87 = tpu.concatenate %78, %82, %86 in 0 : vector<24x32xf32>, vector<24x32xf32>, vector<24x32xf32> -> vector<72x32xf32>
    %c2_81 = arith.constant 2 : index
    %c0_82 = arith.constant 0 : index
    %c0_83 = arith.constant 0 : index
    %c0_84 = arith.constant 0 : index
    %88 = vector.load %arg10[%c2_81, %c0_82, %c0_83, %c0_84] : memref<3x3x96x32xf32, #tpu.memory_space<vmem>>, vector<1x1x96x32xf32>
    %89 = vector.shape_cast %88 : vector<1x1x96x32xf32> to vector<96x32xf32>
    %c2_85 = arith.constant 2 : index
    %c0_86 = arith.constant 0 : index
    %c0_87 = arith.constant 0 : index
    %c0_88 = arith.constant 0 : index
    %90 = vector.load %arg11[%c2_85, %c0_86, %c0_87, %c0_88] : memref<3x3x1x32xf32, #tpu.memory_space<vmem>>, vector<1x1x1x32xf32>
    %91 = vector.shape_cast %90 : vector<1x1x1x32xf32> to vector<1x32xf32>
    %c2_89 = arith.constant 2 : index
    %c1_90 = arith.constant 1 : index
    %c0_91 = arith.constant 0 : index
    %c0_92 = arith.constant 0 : index
    %92 = vector.load %arg10[%c2_89, %c1_90, %c0_91, %c0_92] : memref<3x3x96x32xf32, #tpu.memory_space<vmem>>, vector<1x1x96x32xf32>
    %93 = vector.shape_cast %92 : vector<1x1x96x32xf32> to vector<96x32xf32>
    %c2_93 = arith.constant 2 : index
    %c1_94 = arith.constant 1 : index
    %c0_95 = arith.constant 0 : index
    %c0_96 = arith.constant 0 : index
    %94 = vector.load %arg11[%c2_93, %c1_94, %c0_95, %c0_96] : memref<3x3x1x32xf32, #tpu.memory_space<vmem>>, vector<1x1x1x32xf32>
    %95 = vector.shape_cast %94 : vector<1x1x1x32xf32> to vector<1x32xf32>
    %c2_97 = arith.constant 2 : index
    %c2_98 = arith.constant 2 : index
    %c0_99 = arith.constant 0 : index
    %c0_100 = arith.constant 0 : index
    %96 = vector.load %arg10[%c2_97, %c2_98, %c0_99, %c0_100] : memref<3x3x96x32xf32, #tpu.memory_space<vmem>>, vector<1x1x96x32xf32>
    %97 = vector.shape_cast %96 : vector<1x1x96x32xf32> to vector<96x32xf32>
    %c2_101 = arith.constant 2 : index
    %c2_102 = arith.constant 2 : index
    %c0_103 = arith.constant 0 : index
    %c0_104 = arith.constant 0 : index
    %98 = vector.load %arg11[%c2_101, %c2_102, %c0_103, %c0_104] : memref<3x3x1x32xf32, #tpu.memory_space<vmem>>, vector<1x1x1x32xf32>
    %99 = vector.shape_cast %98 : vector<1x1x1x32xf32> to vector<1x32xf32>
    %cst_105 = arith.constant dense<0.000000e+00> : vector<72x32xf32>
    %100 = tpu.matmul %25, %87, %cst_105 {dimension_numbers = #tpu.dot_dimension_numbers<[1], [0], [0], [1], [0, 0, 1, 1], [], []>} : vector<72x72xf32>, vector<72x32xf32>, vector<72x32xf32> -> vector<72x32xf32>
    %cst_106 = arith.constant dense<0.000000e+00> : vector<72x32xf32>
    %101 = tpu.matmul %25, %100, %cst_106 {dimension_numbers = #tpu.dot_dimension_numbers<[1], [0], [0], [1], [0, 0, 1, 1], [], []>} : vector<72x72xf32>, vector<72x32xf32>, vector<72x32xf32> -> vector<72x32xf32>
    %cst_107 = arith.constant 2.000000e+00 : f32
    %102 = vector.broadcast %cst_107 : f32 to vector<72x32xf32>
    %103 = arith.mulf %102, %101 : vector<72x32xf32>
    %104 = arith.subf %103, %87 : vector<72x32xf32>
    %105 = tpu.concatenate %87, %100, %104 in 1 : vector<72x32xf32>, vector<72x32xf32>, vector<72x32xf32> -> vector<72x96xf32>
    %106 = vector.extract_strided_slice %105 {offsets = [0, 0], sizes = [24, 96], strides = [1, 1]} : vector<72x96xf32> to vector<24x96xf32>
    %cst_108 = arith.constant dense<0.000000e+00> : vector<24x32xf32>
    %107 = tpu.matmul %106, %89, %cst_108 {dimension_numbers = #tpu.dot_dimension_numbers<[1], [0], [0], [1], [0, 0, 1, 1], [], []>} : vector<24x96xf32>, vector<96x32xf32>, vector<24x32xf32> -> vector<24x32xf32>
    %108 = vector.broadcast %91 : vector<1x32xf32> to vector<24x32xf32>
    %109 = arith.addf %107, %108 : vector<24x32xf32>
    %110 = vector.extract_strided_slice %105 {offsets = [24, 0], sizes = [24, 96], strides = [1, 1]} : vector<72x96xf32> to vector<24x96xf32>
    %cst_109 = arith.constant dense<0.000000e+00> : vector<24x32xf32>
    %111 = tpu.matmul %110, %93, %cst_109 {dimension_numbers = #tpu.dot_dimension_numbers<[1], [0], [0], [1], [0, 0, 1, 1], [], []>} : vector<24x96xf32>, vector<96x32xf32>, vector<24x32xf32> -> vector<24x32xf32>
    %112 = vector.broadcast %95 : vector<1x32xf32> to vector<24x32xf32>
    %113 = arith.addf %111, %112 : vector<24x32xf32>
    %114 = vector.extract_strided_slice %105 {offsets = [48, 0], sizes = [24, 96], strides = [1, 1]} : vector<72x96xf32> to vector<24x96xf32>
    %cst_110 = arith.constant dense<0.000000e+00> : vector<24x32xf32>
    %115 = tpu.matmul %114, %97, %cst_110 {dimension_numbers = #tpu.dot_dimension_numbers<[1], [0], [0], [1], [0, 0, 1, 1], [], []>} : vector<24x96xf32>, vector<96x32xf32>, vector<24x32xf32> -> vector<24x32xf32>
    %116 = vector.broadcast %99 : vector<1x32xf32> to vector<24x32xf32>
    %117 = arith.addf %115, %116 : vector<24x32xf32>
    %118 = tpu.concatenate %109, %113, %117 in 0 : vector<24x32xf32>, vector<24x32xf32>, vector<24x32xf32> -> vector<72x32xf32>
    %c0_111 = arith.constant 0 : index
    %c0_112 = arith.constant 0 : index
    %c0_113 = arith.constant 0 : index
    %119 = vector.load %arg12[%c0_111, %c0_112, %c0_113] : memref<1x16x32xf32, #tpu.memory_space<vmem>>, vector<1x16x32xf32>
    %120 = vector.shape_cast %119 : vector<1x16x32xf32> to vector<16x32xf32>
    %c0_114 = arith.constant 0 : index
    %c0_115 = arith.constant 0 : index
    %c0_116 = arith.constant 0 : index
    %121 = vector.load %arg13[%c0_114, %c0_115, %c0_116] : memref<1x36x1xf32, #tpu.memory_space<vmem>>, vector<1x36x1xf32>
    %122 = vector.shape_cast %121 : vector<1x36x1xf32> to vector<36x1xf32>
    %123 = vector.extract_strided_slice %118 {offsets = [0, 0], sizes = [12, 32], strides = [1, 1]} : vector<72x32xf32> to vector<12x32xf32>
    %124 = vector.extract_strided_slice %118 {offsets = [24, 0], sizes = [12, 32], strides = [1, 1]} : vector<72x32xf32> to vector<12x32xf32>
    %125 = vector.extract_strided_slice %118 {offsets = [48, 0], sizes = [12, 32], strides = [1, 1]} : vector<72x32xf32> to vector<12x32xf32>
    %126 = tpu.concatenate %123, %124, %125 in 0 : vector<12x32xf32>, vector<12x32xf32>, vector<12x32xf32> -> vector<36x32xf32>
    %127 = tpu.transpose %126, [1, 0] : vector<36x32xf32> -> vector<32x36xf32>
    %cst_117 = arith.constant dense<0.000000e+00> : vector<16x36xf32>
    %128 = tpu.matmul %120, %127, %cst_117 {dimension_numbers = #tpu.dot_dimension_numbers<[1], [0], [0], [1], [0, 0, 1, 1], [], []>} : vector<16x32xf32>, vector<32x36xf32>, vector<16x36xf32> -> vector<16x36xf32>
    %cst_118 = arith.constant 0.176776692 : f32
    %129 = vector.broadcast %cst_118 : f32 to vector<16x36xf32>
    %130 = arith.mulf %128, %129 : vector<16x36xf32>
    %cst_119 = arith.constant dense<0xFF800000> : vector<16xf32>
    %131 = vector.multi_reduction <maximumf>, %130, %cst_119 [1] : vector<16x36xf32> to vector<16xf32>
    %132 = vector.shape_cast %131 : vector<16xf32> to vector<16x1xf32>
    %133 = vector.broadcast %132 : vector<16x1xf32> to vector<16x36xf32>
    %134 = arith.subf %130, %133 : vector<16x36xf32>
    %135 = math.exp %134 : vector<16x36xf32>
    %cst_120 = arith.constant dense<0.000000e+00> : vector<16xf32>
    %136 = vector.multi_reduction <add>, %135, %cst_120 [1] : vector<16x36xf32> to vector<16xf32>
    %137 = vector.shape_cast %136 : vector<16xf32> to vector<16x1xf32>
    %138 = tpu.reciprocal %137 {approx = true} : vector<16x1xf32> -> vector<16x1xf32>
    %139 = vector.broadcast %138 : vector<16x1xf32> to vector<16x36xf32>
    %140 = arith.mulf %135, %139 : vector<16x36xf32>
    %cst_121 = arith.constant dense<0.000000e+00> : vector<16x32xf32>
    %141 = tpu.matmul %140, %126, %cst_121 {dimension_numbers = #tpu.dot_dimension_numbers<[1], [0], [0], [1], [0, 0, 1, 1], [], []>} : vector<16x36xf32>, vector<36x32xf32>, vector<16x32xf32> -> vector<16x32xf32>
    %142 = tpu.transpose %141, [1, 0] : vector<16x32xf32> -> vector<32x16xf32>
    %cst_122 = arith.constant dense<0.000000e+00> : vector<36x16xf32>
    %143 = tpu.matmul %126, %142, %cst_122 {dimension_numbers = #tpu.dot_dimension_numbers<[1], [0], [0], [1], [0, 0, 1, 1], [], []>} : vector<36x32xf32>, vector<32x16xf32>, vector<36x16xf32> -> vector<36x16xf32>
    %cst_123 = arith.constant 0.176776692 : f32
    %144 = vector.broadcast %cst_123 : f32 to vector<36x16xf32>
    %145 = arith.mulf %143, %144 : vector<36x16xf32>
    %cst_124 = arith.constant dense<0xFF800000> : vector<36xf32>
    %146 = vector.multi_reduction <maximumf>, %145, %cst_124 [1] : vector<36x16xf32> to vector<36xf32>
    %147 = vector.shape_cast %146 : vector<36xf32> to vector<36x1xf32>
    %148 = vector.broadcast %147 : vector<36x1xf32> to vector<36x16xf32>
    %149 = arith.subf %145, %148 : vector<36x16xf32>
    %150 = math.exp %149 : vector<36x16xf32>
    %cst_125 = arith.constant dense<0.000000e+00> : vector<36xf32>
    %151 = vector.multi_reduction <add>, %150, %cst_125 [1] : vector<36x16xf32> to vector<36xf32>
    %152 = vector.shape_cast %151 : vector<36xf32> to vector<36x1xf32>
    %153 = tpu.reciprocal %152 {approx = true} : vector<36x1xf32> -> vector<36x1xf32>
    %154 = vector.broadcast %153 : vector<36x1xf32> to vector<36x16xf32>
    %155 = arith.mulf %150, %154 : vector<36x16xf32>
    %cst_126 = arith.constant dense<0.000000e+00> : vector<36x32xf32>
    %156 = tpu.matmul %155, %141, %cst_126 {dimension_numbers = #tpu.dot_dimension_numbers<[1], [0], [0], [1], [0, 0, 1, 1], [], []>} : vector<36x16xf32>, vector<16x32xf32>, vector<36x32xf32> -> vector<36x32xf32>
    %157 = vector.broadcast %122 : vector<36x1xf32> to vector<36x32xf32>
    %158 = arith.mulf %157, %156 : vector<36x32xf32>
    %159 = vector.extract_strided_slice %118 {offsets = [12, 0], sizes = [12, 32], strides = [1, 1]} : vector<72x32xf32> to vector<12x32xf32>
    %160 = vector.extract_strided_slice %118 {offsets = [36, 0], sizes = [12, 32], strides = [1, 1]} : vector<72x32xf32> to vector<12x32xf32>
    %161 = vector.extract_strided_slice %118 {offsets = [60, 0], sizes = [12, 32], strides = [1, 1]} : vector<72x32xf32> to vector<12x32xf32>
    %162 = tpu.concatenate %159, %160, %161 in 0 : vector<12x32xf32>, vector<12x32xf32>, vector<12x32xf32> -> vector<36x32xf32>
    %163 = tpu.transpose %162, [1, 0] : vector<36x32xf32> -> vector<32x36xf32>
    %cst_127 = arith.constant dense<0.000000e+00> : vector<16x36xf32>
    %164 = tpu.matmul %120, %163, %cst_127 {dimension_numbers = #tpu.dot_dimension_numbers<[1], [0], [0], [1], [0, 0, 1, 1], [], []>} : vector<16x32xf32>, vector<32x36xf32>, vector<16x36xf32> -> vector<16x36xf32>
    %cst_128 = arith.constant 0.176776692 : f32
    %165 = vector.broadcast %cst_128 : f32 to vector<16x36xf32>
    %166 = arith.mulf %164, %165 : vector<16x36xf32>
    %cst_129 = arith.constant dense<0xFF800000> : vector<16xf32>
    %167 = vector.multi_reduction <maximumf>, %166, %cst_129 [1] : vector<16x36xf32> to vector<16xf32>
    %168 = vector.shape_cast %167 : vector<16xf32> to vector<16x1xf32>
    %169 = vector.broadcast %168 : vector<16x1xf32> to vector<16x36xf32>
    %170 = arith.subf %166, %169 : vector<16x36xf32>
    %171 = math.exp %170 : vector<16x36xf32>
    %cst_130 = arith.constant dense<0.000000e+00> : vector<16xf32>
    %172 = vector.multi_reduction <add>, %171, %cst_130 [1] : vector<16x36xf32> to vector<16xf32>
    %173 = vector.shape_cast %172 : vector<16xf32> to vector<16x1xf32>
    %174 = tpu.reciprocal %173 {approx = true} : vector<16x1xf32> -> vector<16x1xf32>
    %175 = vector.broadcast %174 : vector<16x1xf32> to vector<16x36xf32>
    %176 = arith.mulf %171, %175 : vector<16x36xf32>
    %cst_131 = arith.constant dense<0.000000e+00> : vector<16x32xf32>
    %177 = tpu.matmul %176, %162, %cst_131 {dimension_numbers = #tpu.dot_dimension_numbers<[1], [0], [0], [1], [0, 0, 1, 1], [], []>} : vector<16x36xf32>, vector<36x32xf32>, vector<16x32xf32> -> vector<16x32xf32>
    %178 = tpu.transpose %177, [1, 0] : vector<16x32xf32> -> vector<32x16xf32>
    %cst_132 = arith.constant dense<0.000000e+00> : vector<36x16xf32>
    %179 = tpu.matmul %162, %178, %cst_132 {dimension_numbers = #tpu.dot_dimension_numbers<[1], [0], [0], [1], [0, 0, 1, 1], [], []>} : vector<36x32xf32>, vector<32x16xf32>, vector<36x16xf32> -> vector<36x16xf32>
    %cst_133 = arith.constant 0.176776692 : f32
    %180 = vector.broadcast %cst_133 : f32 to vector<36x16xf32>
    %181 = arith.mulf %179, %180 : vector<36x16xf32>
    %cst_134 = arith.constant dense<0xFF800000> : vector<36xf32>
    %182 = vector.multi_reduction <maximumf>, %181, %cst_134 [1] : vector<36x16xf32> to vector<36xf32>
    %183 = vector.shape_cast %182 : vector<36xf32> to vector<36x1xf32>
    %184 = vector.broadcast %183 : vector<36x1xf32> to vector<36x16xf32>
    %185 = arith.subf %181, %184 : vector<36x16xf32>
    %186 = math.exp %185 : vector<36x16xf32>
    %cst_135 = arith.constant dense<0.000000e+00> : vector<36xf32>
    %187 = vector.multi_reduction <add>, %186, %cst_135 [1] : vector<36x16xf32> to vector<36xf32>
    %188 = vector.shape_cast %187 : vector<36xf32> to vector<36x1xf32>
    %189 = tpu.reciprocal %188 {approx = true} : vector<36x1xf32> -> vector<36x1xf32>
    %190 = vector.broadcast %189 : vector<36x1xf32> to vector<36x16xf32>
    %191 = arith.mulf %186, %190 : vector<36x16xf32>
    %cst_136 = arith.constant dense<0.000000e+00> : vector<36x32xf32>
    %192 = tpu.matmul %191, %177, %cst_136 {dimension_numbers = #tpu.dot_dimension_numbers<[1], [0], [0], [1], [0, 0, 1, 1], [], []>} : vector<36x16xf32>, vector<16x32xf32>, vector<36x32xf32> -> vector<36x32xf32>
    %193 = vector.broadcast %122 : vector<36x1xf32> to vector<36x32xf32>
    %194 = arith.mulf %193, %192 : vector<36x32xf32>
    %195 = vector.extract_strided_slice %158 {offsets = [0, 0], sizes = [12, 32], strides = [1, 1]} : vector<36x32xf32> to vector<12x32xf32>
    %196 = vector.extract_strided_slice %194 {offsets = [0, 0], sizes = [12, 32], strides = [1, 1]} : vector<36x32xf32> to vector<12x32xf32>
    %197 = vector.extract_strided_slice %158 {offsets = [12, 0], sizes = [12, 32], strides = [1, 1]} : vector<36x32xf32> to vector<12x32xf32>
    %198 = vector.extract_strided_slice %194 {offsets = [12, 0], sizes = [12, 32], strides = [1, 1]} : vector<36x32xf32> to vector<12x32xf32>
    %199 = vector.extract_strided_slice %158 {offsets = [24, 0], sizes = [12, 32], strides = [1, 1]} : vector<36x32xf32> to vector<12x32xf32>
    %200 = vector.extract_strided_slice %194 {offsets = [24, 0], sizes = [12, 32], strides = [1, 1]} : vector<36x32xf32> to vector<12x32xf32>
    %201 = tpu.concatenate %195, %196, %197, %198, %199, %200 in 0 : vector<12x32xf32>, vector<12x32xf32>, vector<12x32xf32>, vector<12x32xf32>, vector<12x32xf32>, vector<12x32xf32> -> vector<72x32xf32>
    %202 = arith.addf %118, %201 : vector<72x32xf32>
    %c0_137 = arith.constant 0 : index
    %c0_138 = arith.constant 0 : index
    %c0_139 = arith.constant 0 : index
    %c0_140 = arith.constant 0 : index
    %203 = vector.load %arg14[%c0_137, %c0_138, %c0_139, %c0_140] : memref<1x3x96x32xf32, #tpu.memory_space<vmem>>, vector<1x1x96x32xf32>
    %204 = vector.shape_cast %203 : vector<1x1x96x32xf32> to vector<96x32xf32>
    %c0_141 = arith.constant 0 : index
    %c0_142 = arith.constant 0 : index
    %c0_143 = arith.constant 0 : index
    %c0_144 = arith.constant 0 : index
    %205 = vector.load %arg15[%c0_141, %c0_142, %c0_143, %c0_144] : memref<1x3x1x32xf32, #tpu.memory_space<vmem>>, vector<1x1x1x32xf32>
    %206 = vector.shape_cast %205 : vector<1x1x1x32xf32> to vector<1x32xf32>
    %c0_145 = arith.constant 0 : index
    %c1_146 = arith.constant 1 : index
    %c0_147 = arith.constant 0 : index
    %c0_148 = arith.constant 0 : index
    %207 = vector.load %arg14[%c0_145, %c1_146, %c0_147, %c0_148] : memref<1x3x96x32xf32, #tpu.memory_space<vmem>>, vector<1x1x96x32xf32>
    %208 = vector.shape_cast %207 : vector<1x1x96x32xf32> to vector<96x32xf32>
    %c0_149 = arith.constant 0 : index
    %c1_150 = arith.constant 1 : index
    %c0_151 = arith.constant 0 : index
    %c0_152 = arith.constant 0 : index
    %209 = vector.load %arg15[%c0_149, %c1_150, %c0_151, %c0_152] : memref<1x3x1x32xf32, #tpu.memory_space<vmem>>, vector<1x1x1x32xf32>
    %210 = vector.shape_cast %209 : vector<1x1x1x32xf32> to vector<1x32xf32>
    %c0_153 = arith.constant 0 : index
    %c2_154 = arith.constant 2 : index
    %c0_155 = arith.constant 0 : index
    %c0_156 = arith.constant 0 : index
    %211 = vector.load %arg14[%c0_153, %c2_154, %c0_155, %c0_156] : memref<1x3x96x32xf32, #tpu.memory_space<vmem>>, vector<1x1x96x32xf32>
    %212 = vector.shape_cast %211 : vector<1x1x96x32xf32> to vector<96x32xf32>
    %c0_157 = arith.constant 0 : index
    %c2_158 = arith.constant 2 : index
    %c0_159 = arith.constant 0 : index
    %c0_160 = arith.constant 0 : index
    %213 = vector.load %arg15[%c0_157, %c2_158, %c0_159, %c0_160] : memref<1x3x1x32xf32, #tpu.memory_space<vmem>>, vector<1x1x1x32xf32>
    %214 = vector.shape_cast %213 : vector<1x1x1x32xf32> to vector<1x32xf32>
    %cst_161 = arith.constant dense<0.000000e+00> : vector<72x32xf32>
    %215 = tpu.matmul %25, %202, %cst_161 {dimension_numbers = #tpu.dot_dimension_numbers<[1], [0], [0], [1], [0, 0, 1, 1], [], []>} : vector<72x72xf32>, vector<72x32xf32>, vector<72x32xf32> -> vector<72x32xf32>
    %cst_162 = arith.constant dense<0.000000e+00> : vector<72x32xf32>
    %216 = tpu.matmul %25, %215, %cst_162 {dimension_numbers = #tpu.dot_dimension_numbers<[1], [0], [0], [1], [0, 0, 1, 1], [], []>} : vector<72x72xf32>, vector<72x32xf32>, vector<72x32xf32> -> vector<72x32xf32>
    %cst_163 = arith.constant 2.000000e+00 : f32
    %217 = vector.broadcast %cst_163 : f32 to vector<72x32xf32>
    %218 = arith.mulf %217, %216 : vector<72x32xf32>
    %219 = arith.subf %218, %202 : vector<72x32xf32>
    %220 = tpu.concatenate %202, %215, %219 in 1 : vector<72x32xf32>, vector<72x32xf32>, vector<72x32xf32> -> vector<72x96xf32>
    %221 = vector.extract_strided_slice %220 {offsets = [0, 0], sizes = [24, 96], strides = [1, 1]} : vector<72x96xf32> to vector<24x96xf32>
    %cst_164 = arith.constant dense<0.000000e+00> : vector<24x32xf32>
    %222 = tpu.matmul %221, %204, %cst_164 {dimension_numbers = #tpu.dot_dimension_numbers<[1], [0], [0], [1], [0, 0, 1, 1], [], []>} : vector<24x96xf32>, vector<96x32xf32>, vector<24x32xf32> -> vector<24x32xf32>
    %223 = vector.broadcast %206 : vector<1x32xf32> to vector<24x32xf32>
    %224 = arith.addf %222, %223 : vector<24x32xf32>
    %225 = vector.extract_strided_slice %220 {offsets = [24, 0], sizes = [24, 96], strides = [1, 1]} : vector<72x96xf32> to vector<24x96xf32>
    %cst_165 = arith.constant dense<0.000000e+00> : vector<24x32xf32>
    %226 = tpu.matmul %225, %208, %cst_165 {dimension_numbers = #tpu.dot_dimension_numbers<[1], [0], [0], [1], [0, 0, 1, 1], [], []>} : vector<24x96xf32>, vector<96x32xf32>, vector<24x32xf32> -> vector<24x32xf32>
    %227 = vector.broadcast %210 : vector<1x32xf32> to vector<24x32xf32>
    %228 = arith.addf %226, %227 : vector<24x32xf32>
    %229 = vector.extract_strided_slice %220 {offsets = [48, 0], sizes = [24, 96], strides = [1, 1]} : vector<72x96xf32> to vector<24x96xf32>
    %cst_166 = arith.constant dense<0.000000e+00> : vector<24x32xf32>
    %230 = tpu.matmul %229, %212, %cst_166 {dimension_numbers = #tpu.dot_dimension_numbers<[1], [0], [0], [1], [0, 0, 1, 1], [], []>} : vector<24x96xf32>, vector<96x32xf32>, vector<24x32xf32> -> vector<24x32xf32>
    %231 = vector.broadcast %214 : vector<1x32xf32> to vector<24x32xf32>
    %232 = arith.addf %230, %231 : vector<24x32xf32>
    %233 = tpu.concatenate %224, %228, %232 in 0 : vector<24x32xf32>, vector<24x32xf32>, vector<24x32xf32> -> vector<72x32xf32>
    %234 = arith.addf %202, %233 : vector<72x32xf32>
    %235 = vector.extract_strided_slice %234 {offsets = [0, 0], sizes = [24, 32], strides = [1, 1]} : vector<72x32xf32> to vector<24x32xf32>
    %236 = vector.extract_strided_slice %234 {offsets = [24, 0], sizes = [24, 32], strides = [1, 1]} : vector<72x32xf32> to vector<24x32xf32>
    %237 = arith.addf %235, %236 : vector<24x32xf32>
    %238 = vector.extract_strided_slice %234 {offsets = [48, 0], sizes = [24, 32], strides = [1, 1]} : vector<72x32xf32> to vector<24x32xf32>
    %239 = arith.addf %237, %238 : vector<24x32xf32>
    %cst_167 = arith.constant 5.000000e-01 : f32
    %240 = vector.broadcast %cst_167 : f32 to vector<24x32xf32>
    %241 = arith.mulf %239, %240 : vector<24x32xf32>
    %c0_168 = arith.constant 0 : index
    %c0_169 = arith.constant 0 : index
    %242 = vector.load %arg16[%c0_168, %c0_169] : memref<24x24xf32, #tpu.memory_space<vmem>>, vector<24x24xf32>
    %cst_170 = arith.constant dense<0.000000e+00> : vector<24x32xf32>
    %243 = tpu.matmul %242, %241, %cst_170 {dimension_numbers = #tpu.dot_dimension_numbers<[1], [0], [0], [1], [0, 0, 1, 1], [], []>} : vector<24x24xf32>, vector<24x32xf32>, vector<24x32xf32> -> vector<24x32xf32>
    %244 = vector.extract_strided_slice %243 {offsets = [0, 0], sizes = [8, 32], strides = [1, 1]} : vector<24x32xf32> to vector<8x32xf32>
    %245 = vector.extract_strided_slice %243 {offsets = [8, 0], sizes = [8, 32], strides = [1, 1]} : vector<24x32xf32> to vector<8x32xf32>
    %246 = vector.extract_strided_slice %243 {offsets = [16, 0], sizes = [8, 32], strides = [1, 1]} : vector<24x32xf32> to vector<8x32xf32>
    %247 = tpu.concatenate %244, %245, %246 in 1 : vector<8x32xf32>, vector<8x32xf32>, vector<8x32xf32> -> vector<8x96xf32>
    %c0_171 = arith.constant 0 : index
    %c0_172 = arith.constant 0 : index
    %248 = vector.load %arg17[%c0_171, %c0_172] : memref<96x48xf32, #tpu.memory_space<vmem>>, vector<96x48xf32>
    %cst_173 = arith.constant dense<0.000000e+00> : vector<8x48xf32>
    %249 = tpu.matmul %247, %248, %cst_173 {dimension_numbers = #tpu.dot_dimension_numbers<[1], [0], [0], [1], [0, 0, 1, 1], [], []>} : vector<8x96xf32>, vector<96x48xf32>, vector<8x48xf32> -> vector<8x48xf32>
    %c0_174 = arith.constant 0 : index
    %c0_175 = arith.constant 0 : index
    %250 = vector.load %arg18[%c0_174, %c0_175] : memref<1x48xf32, #tpu.memory_space<vmem>>, vector<1x48xf32>
    %251 = vector.broadcast %250 : vector<1x48xf32> to vector<8x48xf32>
    %252 = arith.addf %249, %251 : vector<8x48xf32>
    %c0_176 = arith.constant 0 : index
    %c0_177 = arith.constant 0 : index
    %253 = vector.load %arg19[%c0_176, %c0_177] : memref<8x48xf32, #tpu.memory_space<vmem>>, vector<8x48xf32>
    tpu.vector_store %arg19[%c0_176, %c0_177], %252 {strides = array<i32>} : memref<8x48xf32, #tpu.memory_space<vmem>>, vector<8x48xf32>,
    return
  }
}

</mosaic_0001>

<bundles_post_ra>
// kernel: model_forward.1
= control target key start
LH: loop header
LB: loop body
LE: loop exit
PB: predicated region body
PF: predicated region fallthrough
CT: control target
= control target key end

     0   :  { %v6726_v0 = vmov 0.0|0.0   ;;  %vm6727_vm0 = vmmov 0   ;;  %v6728_v6 = vmov 0.0   ;;  %vm75_vm1 = vcmask 195584   ;;  %s8767_s3 = inlined_call_operand.vmem [shape: f32[24,32], index: 3, kind: input, shape index: {}]   ;;  %s8768_s1 = inlined_call_operand.vmem [shape: f32[24,15], index: 1, kind: input, shape index: {}]   ;;  %s8769_s2 = inlined_call_operand.vmem [shape: f32[24,15], index: 2, kind: input, shape index: {}]   ;;  %s8770_s0 = inlined_call_operand.vmem [shape: f32[24,24], index: 0, kind: input, shape index: {}]   ;;  %s8771_s5 = inlined_call_operand.vmem [shape: f32[15,32], index: 5, kind: input, shape index: {}]   ;;  %s8772_s7 = inlined_call_operand.vmem [shape: f32[24,32], index: 7, kind: input, shape index: {}]   ;;  %s8773_s4 = inlined_call_operand.vmem [shape: f32[1,32], index: 4, kind: input, shape index: {}]   ;;  %s8774_s6 = inlined_call_operand.vmem [shape: f32[1,32], index: 6, kind: input, shape index: {}]   ;;  %s8775_s8 = inlined_call_operand.vmem [shape: f32[1,32], index: 8, kind: input, shape index: {}]   ;;  %s8776_s9 = inlined_call_operand.vmem [shape: f32[72,72], index: 9, kind: input, shape index: {}]   ;;  %s8777_s10 = inlined_call_operand.vmem [shape: f32[3,3,96,32], index: 10, kind: input, shape index: {}]   ;;  %s8778_s11 = inlined_call_operand.vmem [shape: f32[3,3,1,32], index: 11, kind: input, shape index: {}]   ;;  %s8779_s12 = inlined_call_operand.vmem [shape: f32[1,16,32], index: 12, kind: input, shape index: {}]   ;;  %s8780_s13 = inlined_call_operand.vmem [shape: f32[1,36,1], index: 13, kind: input, shape index: {}]   ;;  %s8781_s14 = inlined_call_operand.vmem [shape: f32[1,3,96,32], index: 14, kind: input, shape index: {}]   ;;  %s8782_s15 = inlined_call_operand.vmem [shape: f32[1,3,1,32], index: 15, kind: input, shape index: {}]   ;;  %s8783_s16 = inlined_call_operand.vmem [shape: f32[24,24], index: 16, kind: input, shape index: {}]   ;;  %s8784_s17 = inlined_call_operand.vmem [shape: f32[96,48], index: 17, kind: input, shape index: {}]   ;;  %s8785_s18 = inlined_call_operand.vmem [shape: f32[1,48], index: 18, kind: input, shape index: {}]   ;;  %s8786_s19 = inlined_call_operand.vmem [shape: f32[8,48], index: 19, kind: output, shape index: {}]  }
   0x1   :  { %8791 = sst [smem:[#allocation2_spill]] %s8767_s3  ;;  %6203 = vmatprep.subr.bf16.mxu0 %v6726_v0  ;;  %6206 = vmatprep.subr.bf16.mxu1 %v6726_v0  ;;  %vm380_vm2 = vcmask 1046528   ;;  %v361_v17 = vld [vmem:[%s8771_s5] sm:$0xff]  ;;  %v362_v18 = vld [vmem:[%s8771_s5 + $0x8] sm:$0x7f]  ;;  %vm6729_vm3 = vmmov 1  }
   0x2   :  { %8792 = sst [smem:[#allocation3_spill]] %s8768_s1  ;;  %s8795_s20 = sld [smem:[#allocation2_spill]]  ;;  %5210 = vmatprep.mubr.msk.f32.mxu0 %vm6727_vm0, %v6728_v6  ;;  %5225 = vmatprep.mubr.msk.f32.mxu1 %vm6727_vm0, %v6728_v6  ;;  %vm6214_vm4 = vmpackc.low %vm380_vm2, %vm6729_vm3  ;;  %v6213_v19 = vpack.c.bf16 %v362_v18, %v361_v17  ;;  %v464_v20 = vld [vmem:[%s8772_s7] sm:$0xff]  ;;  %v465_v21 = vld [vmem:[%s8772_s7 + $0x8] sm:$0xff]  ;;  %vm370_vm6 = vcmask 121856   ;;  %vm606_vm12 = vcmask 588800  }
   0x3   :  { %8793 = sst [smem:[#allocation4_spill]] %s8769_s2  ;;  %s8796_s23 = sld [smem:[#allocation3_spill]]  ;;  %v6217_v22 = vpack.c.bf16 %v465_v21, %v464_v20  ;;  %v466_v23 = vld [vmem:[%s8772_s7 + $0x10] sm:$0xff]  ;;  %v4458_v32 = vld [vmem:[%s8773_s4] ss:$0 sm:$0xff]  ;;  %vm944_vm13 = vcmask 261120  }
   0x4   :  { %8794 = sst [smem:[#allocation5_spill]] %s8770_s0  ;;  %s8797_s29 = sld [smem:[#allocation4_spill]]  ;;  %vm954_vm14 = vcmask 523264   ;;  %vm970_vm15 = vcmask 785408   ;;  %vm2575_vm2 = vcmask 1043456   ;;  %vm8051_vm3 = vmpackc.low %vm944_vm13, %vm944_vm13 }
   0x5   :  { %s8798_s24 = sld [smem:[#allocation5_spill]]  ;;  %s6731_s1 = smov 64  }
   0x8   :  { %v65_v1 = vld [vmem:[%s8795_s20] sm:$0xff]  ;;  %v66_v2 = vld [vmem:[%s8795_s20 + $0x8] sm:$0xff]  ;;  %v67_v8 = vld [vmem:[%s8795_s20 + $0x10] sm:$0xff] }
   0x9   :  { %v165_v3 = vld [vmem:[%s8796_s23] sm:$0xff]  ;;  %v6204_v4 = vpack.c.bf16 %v66_v2, %v65_v1  ;;  %v166_v5 = vld [vmem:[%s8796_s23 + $0x8] sm:$0xff]  ;;  %v167_v11 = vld [vmem:[%s8796_s23 + $0x10] sm:$0xff]  ;;  %s6730_s23 = smov 32  }
   0xa   :  { %v6207_v7 = vpack.c.bf16 %v166_v5, %v165_v3  ;;  %v248_v9 = vld [vmem:[%s8797_s29] sm:$0xff]  ;;  %v249_v10 = vld [vmem:[%s8797_s29 + $0x8] sm:$0xff]  ;;  %v250_v15 = vld [vmem:[%s8797_s29 + $0x10] sm:$0xff] }
   0xb   :  { %6205 = vmatpush3.bf16.msra.mxu0 %v6204_v4  ;;  %v62_v12 = vld [vmem:[%s8798_s24] sm:$0xff]  ;;  %v6210_v13 = vpack.c.bf16 %v249_v10, %v248_v9  ;;  %v63_v14 = vld [vmem:[%s8798_s24 + $0x8] sm:$0xff]  ;;  %v64_v16 = vld [vmem:[%s8798_s24 + $0x10] sm:$0xff] }
   0xc   :  { %6208 = vmatpush3.bf16.msra.mxu1 %v6207_v7  ;;  %5208 = vmatprep.subr.mxu0 %v6728_v6 }
   0xd   :  { %5223 = vmatprep.subr.mxu1 %v6728_v6 }
   0xf   :  { %5209 = vmatpush3.msra.mxu0 %v67_v8 }
  0x10   :  { %5224 = vmatpush3.msra.mxu1 %v167_v11  ;;  %5211 = vmatmul.mubr.msk.f32.vlgmr.msra.gmra.mrb[0].mxu0 %vm75_vm1, %v62_v12 }
  0x11   :  { %5226 = vmatmul.mubr.msk.f32.vlgmr.msra.gmra.mrb[0].mxu1 %vm75_vm1, %v62_v12  ;;  %5213 = vmatprep.mubr.msk.f32.mxu0 %vm6727_vm0, %v6728_v6 }
  0x12   :  { %5228 = vmatprep.mubr.msk.f32.mxu1 %vm6727_vm0, %v6728_v6  ;;  %6209 = vmatprep.subr.bf16.mxu0 %v6726_v0 }
  0x13   :  { %6606 = vmatprep.subr.bf16.mxu1 %v6726_v0  ;;  %6211 = vmatpush3.bf16.msra.mxu0 %v6210_v13 }
  0x14   :  { %5214 = vmatmul.mubr.msk.f32.gmra.mrb[2].mxu0 %vm75_vm1, %v63_v14  ;;  %6608 = vmatpush3.bf16.msra.mxu1 %v6210_v13 }
  0x15   :  { %5229 = vmatmul.mubr.msk.f32.gmra.mrb[2].mxu1 %vm75_vm1, %v63_v14  ;;  %5216 = vmatprep.mubr.msk.f32.mxu0 %vm6727_vm0, %v6728_v6 }
  0x16   :  { %5231 = vmatprep.mubr.msk.f32.mxu1 %vm6727_vm0, %v6728_v6  ;;  %5238 = vmatprep.subr.mxu0 %v6728_v6 }
  0x17   :  { %6607 = vmatprep.subr.mxu1 %v6728_v6  ;;  %5239 = vmatpush3.msra.mxu0 %v250_v15 }
  0x18   :  { %5217 = vmatmul.mubr.msk.f32.gmra.mrb[4].mxu0 %vm75_vm1, %v64_v16  ;;  %6609 = vmatpush3.msra.mxu1 %v250_v15  ;;  %v4468_v15 = vld [vmem:[%s8774_s6] ss:$0 sm:$0xff] }
  0x19   :  { %5232 = vmatmul.mubr.msk.f32.gmra.mrb[4].mxu1 %vm75_vm1, %v64_v16  ;;  %5240 = vmatprep.mubr.msk.f32.mxu0 %vm6727_vm0, %v6728_v6 }
  0x1a   :  { %5246 = vmatprep.mubr.msk.f32.mxu1 %vm6727_vm0, %v6728_v6  ;;  %6212 = vmatprep.subr.bf16.mxu1 %v6726_v0 }
  0x1b   :  { %6216 = vmatprep.subr.bf16.mxu0 %v6726_v0 }
  0x1c   :  { %5241 = vmatmul.mubr.msk.f32.vlgmr.msra.gmra.mrb[6].mxu0 %vm75_vm1, %v62_v12 }
  0x1d   :  { %5247 = vmatmul.mubr.msk.f32.vlgmr.msra.gmra.mrb[6].mxu1 %vm75_vm1, %v64_v16  ;;  %5243 = vmatprep.mubr.msk.f32.mxu0 %vm6727_vm0, %v6728_v6 }
  0x1e   :  { %5253 = vmatprep.mubr.msk.f32.mxu1 %vm6727_vm0, %v6728_v6  ;;  %6215 = vmatpush3.bf16.msk.msra.mxu1 %vm6214_vm4, %v6213_v19  ;;  %vm2679_vm4 = vcmask 293888  }
  0x1f   :  { %6218 = vmatpush3.bf16.msra.mxu0 %v6217_v22  ;;  %6219 = vmatprep.subr.bf16.mxu1 %v6726_v0  ;;  %v4473_v22 = vld [vmem:[%s8775_s8] ss:$0 sm:$0xff] }
  0x20   :  { %5244 = vmatmul.mubr.msk.f32.gmra.mrb[8].mxu0 %vm75_vm1, %v63_v14  ;;  %5266 = vmatprep.subr.mxu0 %v6728_v6 }
  0x21   :  { %5268 = vmatprep.mubr.msk.f32.mxu0 %vm6727_vm0, %v6728_v6 }
  0x23   :  { %5267 = vmatpush3.msra.mxu0 %v466_v23 }
  0x24   :  { %5269 = vmatmul.mubr.msk.f32.vlgmr.msra.gmra.mrb[10].mxu0 %vm75_vm1, %v62_v12  ;;  %6231 = vmatprep.subr.bf16.mxu0 %v6726_v0 }
  0x25   :  { %5271 = vmatprep.mubr.msk.f32.mxu0 %vm6727_vm0, %v6728_v6 }
  0x28   :  { %5272 = vmatmul.mubr.msk.f32.gmra.mrb[12].mxu0 %vm75_vm1, %v63_v14 }
  0x29   :  { %5274 = vmatprep.mubr.msk.f32.mxu0 %vm6727_vm0, %v6728_v6 }
  0x2c   :  { %5275 = vmatmul.mubr.msk.f32.gmra.mrb[14].mxu0 %vm75_vm1, %v64_v16 }
  0x2d   :  { %5340 = vmatprep.mubr.msk.f32.mxu0 %vm6727_vm0, %v6728_v6 }
  0xe3   :  { %v151_v24 = vpop.f32.mrb[0].mxu0 }
  0xe4   :  { %v5212_v25 = vpop.f32.mrb[1].mxu0  ;;  %v234_v26 = vpop.f32.mrb[0].mxu1  ;;  %v6944_v57 = vadd.f32 %v4458_v32, %v151_v24 }
  0xe5   :  { %v5227_v27 = vpop.f32.mrb[1].mxu1  ;;  %v331_v40 = vmul.f32 %v234_v26, %v234_v26 }
  0xe7   :  { %v156_v28 = vpop.f32.mrb[2].mxu0 }
  0xe8   :  { %v5215_v29 = vpop.f32.mrb[3].mxu0  ;;  %v239_v30 = vpop.f32.mrb[2].mxu1  ;;  %v6942_v54 = vadd.f32 %v4458_v32, %v156_v28 }
  0xe9   :  { %v5230_v31 = vpop.f32.mrb[3].mxu1  ;;  %v332_v49 = vmul.f32 %v239_v30, %v239_v30 }
  0xea   :  { %v6220_v61 = vpack.c.bf16 %v6942_v54, %v6944_v57 }
  0xeb   :  { %v161_v33 = vpop.f32.mrb[4].mxu0 }
  0xec   :  { %v6940_v34 = vadd.f32 %v4458_v32, %v161_v33  ;;  %v5218_v35 = vpop.f32.mrb[5].mxu0  ;;  %v244_v36 = vpop.f32.mrb[4].mxu1  ;;  %v6988_v32 = vld [vmem:[%s8776_s9] sm:$0xff]  ;;  %v6999_v33 = vld [vmem:[%s8776_s9 + $0x8] sm:$0xff] }
  0xed   :  { %v5233_v37 = vpop.f32.mrb[5].mxu1  ;;  %v333_v38 = vmul.f32 %v244_v36, %v244_v36  ;;  %v7008_v35 = vld [vmem:[%s8776_s9 + $0x10] sm:$0xff]  ;;  %v7017_v36 = vld [vmem:[%s8776_s9 + $0x18] sm:$0xff] }
  0xee   :  { %v7026_v37 = vld [vmem:[%s8776_s9 + $0x20] sm:$0xff] }
  0xef   :  { %v317_v39 = vpop.f32.mrb[6].mxu0 }
  0xf0   :  { %v334_v41 = vmul.f32 %v317_v39, %v317_v39  ;;  %v327_v42 = vpop.f32.mrb[6].mxu1  ;;  %v5242_v43 = vpop.f32.mrb[7].mxu0  ;;  %v7044_v39 = vld [vmem:[%s8776_s9 + $0x30] sm:$0xff] }
  0xf1   :  { %v336_v44 = vmul.f32 %v327_v42, %v327_v42  ;;  %v5248_v45 = vpop.f32.mrb[7].mxu1 }
  0xf2   :  { %v337_v46 = vadd.f32 %v334_v41, %v331_v40  ;;  %v7053_v40 = vld [vmem:[%s8776_s9 + $0x38] sm:$0xff]  ;;  %v7062_v41 = vld [vmem:[%s8776_s9 + $0x40] sm:$0xff] }
  0xf3   :  { %v339_v47 = vadd.f32 %v336_v44, %v333_v38  ;;  %v322_v48 = vpop.f32.mrb[8].mxu0  ;;  %v7035_v38 = vld [vmem:[%s8776_s9 + $0x28] sm:$0xff] }
  0xf4   :  { %6646 = vrsqrt.f32 %v337_v46  ;;  %v335_v50 = vmul.f32 %v322_v48, %v322_v48  ;;  %v5245_v51 = vpop.f32.mrb[9].mxu0  ;;  %vm342_vm5 = vcmp.eq.f32.partialorder %v337_v46, inf  ;;  %v345_v58 = vand.u32 2147483648, %v337_v46 }
  0xf5   :  { %6648 = vrsqrt.f32 %v339_v47  ;;  %vm344_vm7 = vcmp.eq.f32.partialorder %v337_v46, 0.0  ;;  %vm356_vm10 = vcmp.eq.f32.partialorder %v339_v47, inf  ;;  %v359_v7 = vand.u32 2147483648, %v339_v47 }
  0xf6   :  { %v338_v52 = vadd.f32 %v335_v50, %v332_v49  ;;  %vm358_vm11 = vcmp.eq.f32.partialorder %v339_v47, 0.0 }
  0xf7   :  { %v540_v9 = vpop.f32.mrb[10].mxu0 }
  0xf8   :  { %6650 = vrsqrt.f32 %v338_v52  ;;  %vm349_vm8 = vcmp.eq.f32.partialorder %v338_v52, inf  ;;  %v352_v2 = vand.u32 2147483648, %v338_v52  ;;  %vm351_vm9 = vcmp.eq.f32.partialorder %v338_v52, 0.0  ;;  %v5270_v10 = vpop.f32.mrb[11].mxu0 }
  0xf9   :  { %v6973_v27 = vadd.f32 %v4473_v22, %v540_v9  ;;  %v4477_v9 = vld [vmem:[%s8777_s10 + $0x60] sm:$0xff]  ;;  %v4478_v10 = vld [vmem:[%s8777_s10 + $0x68] sm:$0xff] }
  0xfb   :  { %v545_v11 = vpop.f32.mrb[12].mxu0 }
  0xfc   :  { %v5273_v12 = vpop.f32.mrb[13].mxu0  ;;  %v6977_v29 = vadd.f32 %v4473_v22, %v545_v11 }
  0xfd   :  { %v567_v12 = vld [vmem:[%s8777_s10 + $0x20] sm:$0xff] }
  0xfe   :  { %v6647_v53 = vpop.eup %6646  ;;  %v6229_v30 = vpack.c.bf16 %v6977_v29, %v6973_v27 }
  0xff   :  { %v341_v55 = vmul.f32 %v6647_v53, %v337_v46  ;;  %v6649_v56 = vpop.eup %6648  ;;  %v550_v13 = vpop.f32.mrb[14].mxu0 }
 0x100   :  { %v355_v1 = vmul.f32 %v6649_v56, %v339_v47  ;;  %v5276_v14 = vpop.f32.mrb[15].mxu0  ;;  %v6982_v31 = vadd.f32 %v4473_v22, %v550_v13  ;;  %v6262_v13 = vpack.c.bf16 %v4478_v10, %v4477_v9  ;;  %v569_v22 = vld [vmem:[%s8777_s10 + $0x30] sm:$0xff] }
 0x101   :  { %v343_v59 = vsel %vm342_vm5, %v337_v46, %v341_v55  ;;  %v568_v14 = vld [vmem:[%s8777_s10 + $0x28] sm:$0xff]  ;;  %vm2886_vm5 = vcmask 130048  }
 0x102   :  { %v6651_v60 = vpop.eup %6650  ;;  %v346_v62 = vsel %vm344_vm7, %v345_v58, %v343_v59  ;;  %v357_v5 = vsel %vm356_vm10, %v339_v47, %v355_v1 }
 0x103   :  { %5254 = vmatmul.mubr.msk.f32.vlgmr.msra.gmra.mrb[8].mxu1 %vm370_vm6, %v346_v62  ;;  %v348_v63 = vmul.f32 %v6651_v60, %v338_v52  ;;  %v360_v8 = vsel %vm358_vm11, %v359_v7, %v357_v5  ;;  %v565_v5 = vld [vmem:[%s8777_s10 + $0x10] sm:$0xff] }
 0x104   :  { %6221 = vmatpush3.bf16.msra.mxu1 %v6220_v61  ;;  %5256 = vmatprep.mubr.msk.f32.mxu1 %vm6727_vm0, %v6728_v6 }
 0x105   :  { %v350_v3 = vsel %vm349_vm8, %v338_v52, %v348_v63  ;;  %6222 = vmatprep.subr.bf16.mxu1 %v6726_v0 }
 0x106   :  { %v353_v4 = vsel %vm351_vm9, %v352_v2, %v350_v3  ;;  %v563_v3 = vld [vmem:[%s8777_s10] sm:$0xff] }
 0x107   :  { %5257 = vmatmul.mubr.msk.f32.gmra.mrb[10].mxu1 %vm370_vm6, %v353_v4  ;;  %v564_v4 = vld [vmem:[%s8777_s10 + $0x8] sm:$0xff] }
 0x108   :  { %5259 = vmatprep.mubr.msk.f32.mxu1 %vm6727_vm0, %v6728_v6  ;;  %v6244_v7 = vpack.c.bf16 %v564_v4, %v563_v3 }
 0x10b   :  { %5260 = vmatmul.mubr.msk.f32.gmra.mrb[12].mxu1 %vm370_vm6, %v360_v8  ;;  %v566_v8 = vld [vmem:[%s8777_s10 + $0x18] sm:$0xff]  ;;  %vm2899_vm6 = vcmask 125952  }
 0x10c   :  { %5295 = vmatprep.mubr.msk.f32.mxu1 %vm6727_vm0, %v6728_v6  ;;  %v6247_v11 = vpack.c.bf16 %v566_v8, %v565_v5 }
 0x1d6   :  { %v450_v16 = vpop.f32.mrb[8].mxu1 }
 0x1d7   :  { %v6961_v17 = vadd.f32 %v4468_v15, %v450_v16  ;;  %v5255_v18 = vpop.f32.mrb[9].mxu1  ;;  %v4480_v16 = vld [vmem:[%s8777_s10 + $0x78] sm:$0xff] }
 0x1d9   :  { %v6223_v19 = vpack.c.bf16 %v6961_v17, %v6940_v34 }
 0x1da   :  { %v455_v20 = vpop.f32.mrb[10].mxu1 }
 0x1db   :  { %v5258_v21 = vpop.f32.mrb[11].mxu1  ;;  %6224 = vmatpush3.bf16.msra.mxu1 %v6223_v19  ;;  %v6969_v24 = vadd.f32 %v4468_v15, %v455_v20  ;;  %v4481_v19 = vld [vmem:[%s8777_s10 + $0x80] sm:$0xff]  ;;  %v4482_v20 = vld [vmem:[%s8777_s10 + $0x88] sm:$0xff] }
 0x1dc   :  { %6225 = vmatprep.subr.bf16.mxu1 %v6726_v0  ;;  %v6250_v21 = vpack.c.bf16 %v568_v14, %v567_v12 }
 0x1de   :  { %v460_v23 = vpop.f32.mrb[12].mxu1 }
 0x1df   :  { %v6971_v25 = vadd.f32 %v4468_v15, %v460_v23  ;;  %v5261_v26 = vpop.f32.mrb[13].mxu1  ;;  %v4479_v15 = vld [vmem:[%s8777_s10 + $0x70] sm:$0xff]  ;;  %v570_v23 = vld [vmem:[%s8777_s10 + $0x38] sm:$0xff] }
 0x1e0   :  { %v6265_v18 = vpack.c.bf16 %v4480_v16, %v4479_v15  ;;  %v6268_v26 = vpack.c.bf16 %v4482_v20, %v4481_v19 }
 0x1e1   :  { %v6226_v28 = vpack.c.bf16 %v6971_v25, %v6969_v24 }
 0x1e3   :  { %6227 = vmatpush3.bf16.msra.mxu1 %v6226_v28  ;;  %v6253_v28 = vpack.c.bf16 %v570_v23, %v569_v22 }
 0x1e4   :  { %6228 = vmatprep.subr.bf16.mxu1 %v6726_v0 }
 0x1e7   :  { %6230 = vmatpush3.bf16.msra.mxu1 %v6229_v30  ;;  %v571_v30 = vld [vmem:[%s8777_s10 + $0x40] sm:$0xff] }
 0x1e8   :  { %5293 = vmatprep.subr.mxu1 %v6728_v6 }
 0x1eb   :  { %5294 = vmatpush3.msra.mxu1 %v6982_v31 }
 0x1ec   :  { %5296 = vmatmul.mubr.msk.f32.vlgmr.msra.gmra.mrb[14].mxu1 %vm606_vm12, %v6988_v32  ;;  %6243 = vmatprep.subr.bf16.mxu1 %v6726_v0 }
 0x1ed   :  { %5298 = vmatprep.mubr.msk.f32.mxu1 %vm6727_vm0, %v6728_v6  ;;  %6245 = vmatpush3.bf16.msra.mxu1 %v6244_v7 }
 0x1ee   :  { %6246 = vmatprep.subr.bf16.mxu1 %v6726_v0 }
 0x1f0   :  { %5299 = vmatmul.mubr.msk.f32.gmra.mrb[16].mxu1 %vm606_vm12, %v6999_v33 }
 0x1f1   :  { %5301 = vmatprep.mubr.msk.f32.mxu1 %vm6727_vm0, %v6728_v6  ;;  %6248 = vmatpush3.bf16.msra.mxu1 %v6247_v11 }
 0x1f2   :  { %6249 = vmatprep.subr.bf16.mxu1 %v6726_v0 }
 0x1f4   :  { %5302 = vmatmul.mubr.msk.f32.gmra.mrb[18].mxu1 %vm606_vm12, %v7008_v35 }
 0x1f5   :  { %5304 = vmatprep.mubr.msk.f32.mxu1 %vm6727_vm0, %v6728_v6  ;;  %6251 = vmatpush3.bf16.msra.mxu1 %v6250_v21 }
 0x1f6   :  { %6252 = vmatprep.subr.bf16.mxu1 %v6726_v0 }
 0x1f8   :  { %5305 = vmatmul.mubr.msk.f32.gmra.mrb[20].mxu1 %vm606_vm12, %v7017_v36 }
 0x1f9   :  { %5307 = vmatprep.mubr.msk.f32.mxu1 %vm6727_vm0, %v6728_v6  ;;  %6254 = vmatpush3.bf16.msra.mxu1 %v6253_v28 }
 0x1fa   :  { %6255 = vmatprep.subr.bf16.mxu1 %v6726_v0 }
 0x1fc   :  { %5308 = vmatmul.mubr.msk.f32.gmra.mrb[22].mxu1 %vm606_vm12, %v7026_v37 }
 0x1fd   :  { %5310 = vmatprep.mubr.msk.f32.mxu1 %vm6727_vm0, %v6728_v6 }
 0x200   :  { %5311 = vmatmul.mubr.msk.f32.gmra.mrb[24].mxu1 %vm606_vm12, %v7035_v38 }
 0x201   :  { %5313 = vmatprep.mubr.msk.f32.mxu1 %vm6727_vm0, %v6728_v6 }
 0x204   :  { %5314 = vmatmul.mubr.msk.f32.gmra.mrb[26].mxu1 %vm606_vm12, %v7044_v39 }
 0x205   :  { %5316 = vmatprep.mubr.msk.f32.mxu1 %vm6727_vm0, %v6728_v6 }
 0x208   :  { %5317 = vmatmul.mubr.msk.f32.gmra.mrb[28].mxu1 %vm606_vm12, %v7053_v40 }
 0x209   :  { %5319 = vmatprep.mubr.msk.f32.mxu1 %vm6727_vm0, %v6728_v6 }
 0x20c   :  { %5320 = vmatmul.mubr.msk.f32.gmra.mrb[30].mxu1 %vm606_vm12, %v7062_v41 }
 0x20d   :  { %5391 = vmatprep.mubr.msk.f32.mxu1 %vm6727_vm0, %v6728_v6 }
 0x2bf   :  { %v700_v42 = vpop.f32.mrb[14].mxu1 }
 0x2c0   :  { %881 = vrot.lane.b32.xlu0 %v700_v42, %s6730_s23  ;;  %v5297_v43 = vpop.f32.mrb[15].mxu1 }
 0x2c3   :  { %v705_v44 = vpop.f32.mrb[16].mxu1 }
 0x2c4   :  { %v6232_v45 = vpack.c.bf16 %v705_v44, %v700_v42  ;;  %883 = vrot.lane.b32.xlu1 %v705_v44, %s6730_s23  ;;  %v5300_v46 = vpop.f32.mrb[17].mxu1  ;;  %v572_v42 = vld [vmem:[%s8777_s10 + $0x48] sm:$0xff]  ;;  %v573_v44 = vld [vmem:[%s8777_s10 + $0x50] sm:$0xff] }
 0x2c5   :  { %v6256_v43 = vpack.c.bf16 %v572_v42, %v571_v30 }
 0x2c6   :  { %6233 = vmatpush3.bf16.msra.mxu0 %v6232_v45  ;;  %v574_v45 = vld [vmem:[%s8777_s10 + $0x58] sm:$0xff] }
 0x2c7   :  { %v7070_v47 = vpop.f32.mrb[18].mxu1  ;;  %6234 = vmatprep.subr.bf16.mxu0 %v6726_v0  ;;  %6257 = vmatpush3.bf16.msra.mxu1 %v6256_v43  ;;  %v6259_v46 = vpack.c.bf16 %v574_v45, %v573_v44 }
 0x2c8   :  { %v5303_v48 = vpop.f32.mrb[19].mxu1  ;;  %6258 = vmatprep.subr.bf16.mxu1 %v6726_v0 }
 0x2c9   :  { %v4483_v48 = vld [vmem:[%s8777_s10 + $0x90] sm:$0xff] }
 0x2cb   :  { %v715_v49 = vpop.f32.mrb[20].mxu1  ;;  %6260 = vmatpush3.bf16.msra.mxu1 %v6259_v46 }
 0x2cc   :  { %v6235_v50 = vpack.c.bf16 %v715_v49, %v7070_v47  ;;  %887 = vrot.lane.b32.xlu1 %v715_v49, %s6730_s23  ;;  %v5306_v51 = vpop.f32.mrb[21].mxu1  ;;  %6279 = vmatprep.subr.bf16.mxu1 %v6726_v0  ;;  %v4484_v49 = vld [vmem:[%s8777_s10 + $0x98] sm:$0xff] }
 0x2cd   :  { %v4485_v51 = vld [vmem:[%s8777_s10 + $0xa0] sm:$0xff] }
 0x2ce   :  { %6236 = vmatpush3.bf16.msra.mxu0 %v6235_v50  ;;  %v6271_v50 = vpack.c.bf16 %v4484_v49, %v4483_v48 }
 0x2cf   :  { %v720_v52 = vpop.f32.mrb[22].mxu1  ;;  %6237 = vmatprep.subr.bf16.mxu0 %v6726_v0 }
 0x2d0   :  { %889 = vrot.lane.b32.xlu1 %v720_v52, %s6730_s23  ;;  %v5309_v53 = vpop.f32.mrb[23].mxu1 }
 0x2d3   :  { %v7077_v55 = vpop.f32.mrb[24].mxu1 }
 0x2d4   :  { %v6238_v56 = vpack.c.bf16 %v7077_v55, %v720_v52  ;;  %v5312_v58 = vpop.f32.mrb[25].mxu1  ;;  %v4486_v52 = vld [vmem:[%s8777_s10 + $0xa8] sm:$0xff] }
 0x2d5   :  { %v6274_v53 = vpack.c.bf16 %v4486_v52, %v4485_v51  ;;  %v4487_v58 = vld [vmem:[%s8777_s10 + $0xb0] sm:$0xff] }
 0x2d6   :  { %6239 = vmatpush3.bf16.msra.mxu0 %v6238_v56 }
 0x2d7   :  { %v730_v59 = vpop.f32.mrb[26].mxu1  ;;  %6240 = vmatprep.subr.bf16.mxu0 %v6726_v0 }
 0x2d8   :  { %893 = vrot.lane.b32.xlu1 %v730_v59, %s6730_s23  ;;  %v5315_v60 = vpop.f32.mrb[27].mxu1 }
 0x2db   :  { %v7082_v61 = vpop.f32.mrb[28].mxu1 }
 0x2dc   :  { %v6241_v62 = vpack.c.bf16 %v7082_v61, %v730_v59  ;;  %v5318_v63 = vpop.f32.mrb[29].mxu1  ;;  %v4488_v59 = vld [vmem:[%s8777_s10 + $0xb8] sm:$0xff] }
 0x2dd   :  { %v6277_v63 = vpack.c.bf16 %v4488_v59, %v4487_v58 }
 0x2de   :  { %6242 = vmatpush3.bf16.msra.mxu0 %v6241_v62 }
 0x2df   :  { %v7085_v1 = vpop.f32.mrb[30].mxu1  ;;  %5338 = vmatprep.subr.mxu0 %v6728_v6 }
 0x2e0   :  { %v5321_v2 = vpop.f32.mrb[31].mxu1 }
 0x2e2   :  { %5339 = vmatpush3.msra.mxu0 %v7085_v1 }
 0x2e3   :  { %5341 = vmatmul.mubr.msk.f32.vlgmr.msra.gmra.mrb[16].mxu0 %vm606_vm12, %v6988_v32  ;;  %6261 = vmatprep.subr.bf16.mxu0 %v6726_v0 }
 0x2e4   :  { %5343 = vmatprep.mubr.msk.f32.mxu0 %vm6727_vm0, %v6728_v6  ;;  %6263 = vmatpush3.bf16.msra.mxu0 %v6262_v13 }
 0x2e5   :  { %6264 = vmatprep.subr.bf16.mxu0 %v6726_v0 }
 0x2e7   :  { %5344 = vmatmul.mubr.msk.f32.gmra.mrb[18].mxu0 %vm606_vm12, %v6999_v33 }
 0x2e8   :  { %5346 = vmatprep.mubr.msk.f32.mxu0 %vm6727_vm0, %v6728_v6  ;;  %6266 = vmatpush3.bf16.msra.mxu0 %v6265_v18 }
 0x2e9   :  { %6267 = vmatprep.subr.bf16.mxu0 %v6726_v0 }
 0x2eb   :  { %5347 = vmatmul.mubr.msk.f32.gmra.mrb[20].mxu0 %vm606_vm12, %v7008_v35 }
 0x2ec   :  { %5349 = vmatprep.mubr.msk.f32.mxu0 %vm6727_vm0, %v6728_v6  ;;  %6269 = vmatpush3.bf16.msra.mxu0 %v6268_v26 }
 0x2ed   :  { %6270 = vmatprep.subr.bf16.mxu0 %v6726_v0 }
 0x2ef   :  { %5350 = vmatmul.mubr.msk.f32.gmra.mrb[22].mxu0 %vm606_vm12, %v7017_v36 }
 0x2f0   :  { %5352 = vmatprep.mubr.msk.f32.mxu0 %vm6727_vm0, %v6728_v6  ;;  %6272 = vmatpush3.bf16.msra.mxu0 %v6271_v50 }
 0x2f1   :  { %6273 = vmatprep.subr.bf16.mxu0 %v6726_v0 }
 0x2f3   :  { %5353 = vmatmul.mubr.msk.f32.gmra.mrb[24].mxu0 %vm606_vm12, %v7026_v37 }
 0x2f4   :  { %5355 = vmatprep.mubr.msk.f32.mxu0 %vm6727_vm0, %v6728_v6  ;;  %6275 = vmatpush3.bf16.msra.mxu0 %v6274_v53  ;;  %v4491_v53 = vld [vmem:[%s8777_s10 + $0xc8] sm:$0xff] }
 0x2f5   :  { %6276 = vmatprep.subr.bf16.mxu0 %v6726_v0 }
 0x2f7   :  { %5356 = vmatmul.mubr.msk.f32.gmra.mrb[26].mxu0 %vm606_vm12, %v7035_v38 }
 0x2f8   :  { %5358 = vmatprep.mubr.msk.f32.mxu0 %vm6727_vm0, %v6728_v6  ;;  %6278 = vmatpush3.bf16.msra.mxu0 %v6277_v63 }
 0x2f9   :  { %6297 = vmatprep.subr.bf16.mxu0 %v6726_v0 }
 0x2fb   :  { %5359 = vmatmul.mubr.msk.f32.gmra.mrb[28].mxu0 %vm606_vm12, %v7044_v39 }
 0x2fc   :  { %5361 = vmatprep.mubr.msk.f32.mxu0 %vm6727_vm0, %v6728_v6 }
 0x2ff   :  { %5362 = vmatmul.mubr.msk.f32.gmra.mrb[30].mxu0 %vm606_vm12, %v7053_v40 }
 0x300   :  { %5364 = vmatprep.mubr.msk.f32.mxu0 %vm6727_vm0, %v6728_v6 }
 0x303   :  { %5365 = vmatmul.mubr.msk.f32.gmra.mrb[32].mxu0 %vm606_vm12, %v7062_v41 }
 0x304   :  { %5424 = vmatprep.mubr.msk.f32.mxu0 %vm6727_vm0, %v6728_v6 }
 0x332   :  { %v882_v52 = vpop.permute.xlu0 %881 }
 0x333   :  { %v945_v58 = vsel %vm944_vm13, %v6944_v57, %v882_v52 }
 0x336   :  { %v884_v51 = vpop.permute.xlu1 %883 }
 0x3b6   :  { %v810_v56 = vpop.f32.mrb[16].mxu0 }
 0x3b7   :  { %v854_v60 = vmul.f32 2.0, %v810_v56  ;;  %v5342_v62 = vpop.f32.mrb[17].mxu0  ;;  %v888_v56 = vpop.permute.xlu1 %887 }
 0x3b8   :  { %v4493_v62 = vld [vmem:[%s8777_s10 + $0xd8] sm:$0xff] }
 0x3b9   :  { %v863_v2 = vsub.f32 %v854_v60, %v6944_v57  ;;  %v4492_v60 = vld [vmem:[%s8777_s10 + $0xd0] sm:$0xff] }
 0x3ba   :  { %v815_v3 = vpop.f32.mrb[18].mxu0 }
 0x3bb   :  { %917 = vrot.lane.b32.xlu0 %v863_v2, %s6731_s1  ;;  %v5345_v4 = vpop.f32.mrb[19].mxu0  ;;  %v855_v8 = vmul.f32 2.0, %v815_v3  ;;  %v6283_v2 = vpack.c.bf16 %v4493_v62, %v4492_v60  ;;  %v890_v3 = vpop.permute.xlu1 %889 }
 0x3bc   :  { %v4494_v4 = vld [vmem:[%s8777_s10 + $0xe0] sm:$0xff] }
 0x3bd   :  { %v864_v12 = vsub.f32 %v855_v8, %v6942_v54 }
 0x3be   :  { %v820_v5 = vpop.f32.mrb[20].mxu0 }
 0x3bf   :  { %885 = vrot.lane.b32.xlu0 %v7070_v47, %s6730_s23  ;;  %v5348_v7 = vpop.f32.mrb[21].mxu0  ;;  %v856_v13 = vmul.f32 2.0, %v820_v5  ;;  %v4495_v5 = vld [vmem:[%s8777_s10 + $0xe8] sm:$0xff]  ;;  %v894_v8 = vpop.permute.xlu1 %893 }
 0x3c0   :  { %v6286_v7 = vpack.c.bf16 %v4495_v5, %v4494_v4 }
 0x3c1   :  { %v865_v18 = vsub.f32 %v856_v13, %v6940_v34  ;;  %v946_v13 = vsel %vm944_vm13, %v6942_v54, %v884_v51 }
 0x3c2   :  { %v825_v9 = vpop.f32.mrb[22].mxu0 }
 0x3c3   :  { %v857_v10 = vmul.f32 2.0, %v825_v9  ;;  %891 = vrot.lane.b32.xlu0 %v7077_v55, %s6730_s23  ;;  %v5351_v11 = vpop.f32.mrb[23].mxu0 }
 0x3c4   :  { %v4497_v11 = vld [vmem:[%s8777_s10 + $0xf8] sm:$0xff] }
 0x3c5   :  { %v866_v14 = vsub.f32 %v857_v10, %v6961_v17  ;;  %v4496_v10 = vld [vmem:[%s8777_s10 + $0xf0] sm:$0xff] }
 0x3c6   :  { %v830_v15 = vpop.f32.mrb[24].mxu0 }
 0x3c7   :  { %v858_v16 = vmul.f32 2.0, %v830_v15  ;;  %919 = vrot.lane.b32.xlu0 %v864_v12, %s6731_s1  ;;  %923 = vrot.lane.b32.xlu1 %v866_v14, %s6731_s1  ;;  %v5354_v47 = vpop.f32.mrb[25].mxu0  ;;  %v6289_v12 = vpack.c.bf16 %v4497_v11, %v4496_v10  ;;  %v948_v14 = vsel %vm944_vm13, %v6961_v17, %v888_v56  ;;  %v949_v17 = vsel %vm944_vm13, %v6969_v24, %v890_v3  ;;  %v4521_v56 = vld [vmem:[%s8778_s11] ss:$0 sm:$0xff] }
 0x3c8   :  { %v4498_v47 = vld [vmem:[%s8777_s10 + $0x100] sm:$0xff] }
 0x3c9   :  { %v867_v19 = vsub.f32 %v858_v16, %v6969_v24 }
 0x3ca   :  { %v835_v20 = vpop.f32.mrb[26].mxu0 }
 0x3cb   :  { %v859_v21 = vmul.f32 2.0, %v835_v20  ;;  %921 = vrot.lane.b32.xlu0 %v865_v18, %s6731_s1  ;;  %925 = vrot.lane.b32.xlu1 %v867_v19, %s6731_s1  ;;  %v5357_v55 = vpop.f32.mrb[27].mxu0  ;;  %v4499_v18 = vld [vmem:[%s8777_s10 + $0x108] sm:$0xff] }
 0x3cc   :  { %v6292_v54 = vpack.c.bf16 %v4499_v18, %v4498_v47  ;;  %v4529_v47 = vld [vmem:[%s8778_s11 + $0x2] ss:$0 sm:$0xff] }
 0x3cd   :  { %v868_v22 = vsub.f32 %v859_v21, %v6971_v25 }
 0x3ce   :  { %v840_v23 = vpop.f32.mrb[28].mxu0 }
 0x3cf   :  { %v860_v26 = vmul.f32 2.0, %v840_v23  ;;  %927 = vrot.lane.b32.xlu0 %v868_v22, %s6731_s1  ;;  %v5360_v28 = vpop.f32.mrb[29].mxu0  ;;  %v4500_v23 = vld [vmem:[%s8777_s10 + $0x110] sm:$0xff] }
 0x3d1   :  { %v869_v30 = vsub.f32 %v860_v26, %v6973_v27  ;;  %v4501_v26 = vld [vmem:[%s8777_s10 + $0x118] sm:$0xff] }
 0x3d2   :  { %v845_v42 = vpop.f32.mrb[30].mxu0 }
 0x3d3   :  { %v861_v43 = vmul.f32 2.0, %v845_v42  ;;  %895 = vrot.lane.b32.xlu0 %v7082_v61, %s6730_s23  ;;  %929 = vrot.lane.b32.xlu1 %v869_v30, %s6731_s1  ;;  %v5363_v44 = vpop.f32.mrb[31].mxu0  ;;  %v4490_v61 = vld [vmem:[%s8777_s10 + $0xc0] sm:$0xff] }
 0x3d4   :  { %v951_v44 = vsel %vm944_vm13, %v6973_v27, %v894_v8 }
 0x3d5   :  { %v870_v45 = vsub.f32 %v861_v43, %v6977_v29 }
 0x3d6   :  { %v850_v46 = vpop.f32.mrb[32].mxu0 }
 0x3d7   :  { %v862_v48 = vmul.f32 2.0, %v850_v46  ;;  %897 = vrot.lane.b32.xlu0 %v7085_v1, %s6730_s23  ;;  %931 = vrot.lane.b32.xlu1 %v870_v45, %s6731_s1  ;;  %v5366_v49 = vpop.f32.mrb[33].mxu0  ;;  %v6280_v1 = vpack.c.bf16 %v4491_v53, %v4490_v61 }
 0x3d9   :  { %v871_v50 = vsub.f32 %v862_v48, %v6982_v31 }
 0x3db   :  { %933 = vrot.lane.b32.xlu1 %v871_v50, %s6731_s1 }
 0x42d   :  { %v918_v59 = vpop.permute.xlu0 %917 }
 0x42e   :  { %v955_v63 = vsel %vm954_vm14, %v945_v58, %v918_v59 }
 0x42f   :  { %5392 = vmatmul.mubr.msk.f32.vlgmr.msra.gmra.mrb[32].mxu1 %vm970_vm15, %v955_v63  ;;  %v4525_v63 = vld [vmem:[%s8778_s11 + $0x1] ss:$0 sm:$0xff] }
 0x430   :  { %6281 = vmatpush3.bf16.msra.mxu1 %v6280_v1  ;;  %5394 = vmatprep.mubr.msk.f32.mxu1 %vm6727_vm0, %v6728_v6 }
 0x431   :  { %v886_v57 = vpop.permute.xlu0 %885  ;;  %6282 = vmatprep.subr.bf16.mxu1 %v6726_v0 }
 0x432   :  { %v947_v21 = vsel %vm944_vm13, %v6940_v34, %v886_v57  ;;  %v6295_v34 = vpack.c.bf16 %v4501_v26, %v4500_v23 }
 0x434   :  { %6284 = vmatpush3.bf16.msra.mxu1 %v6283_v2 }
 0x435   :  { %v892_v9 = vpop.permute.xlu0 %891  ;;  %6285 = vmatprep.subr.bf16.mxu1 %v6726_v0 }
 0x436   :  { %v950_v30 = vsel %vm944_vm13, %v6971_v25, %v892_v9 }
 0x438   :  { %6287 = vmatpush3.bf16.msra.mxu1 %v6286_v7 }
 0x439   :  { %v920_v15 = vpop.permute.xlu0 %919  ;;  %v924_v16 = vpop.permute.xlu1 %923  ;;  %6288 = vmatprep.subr.bf16.mxu1 %v6726_v0 }
 0x43a   :  { %v956_v19 = vsel %vm954_vm14, %v946_v13, %v920_v15  ;;  %v958_v20 = vsel %vm954_vm14, %v948_v14, %v924_v16 }
 0x43b   :  { %5395 = vmatmul.mubr.msk.f32.gmra.mrb[34].mxu1 %vm970_vm15, %v956_v19  ;;  %5425 = vmatmul.mubr.msk.f32.vlgmr.msra.gmra.mrb[34].mxu0 %vm970_vm15, %v958_v20 }
 0x43c   :  { %6290 = vmatpush3.bf16.msra.mxu1 %v6289_v12  ;;  %5397 = vmatprep.mubr.msk.f32.mxu1 %vm6727_vm0, %v6728_v6 }
 0x43d   :  { %v922_v55 = vpop.permute.xlu0 %921  ;;  %v926_v22 = vpop.permute.xlu1 %925  ;;  %5427 = vmatprep.mubr.msk.f32.mxu0 %vm6727_vm0, %v6728_v6  ;;  %6291 = vmatprep.subr.bf16.mxu1 %v6726_v0 }
 0x43e   :  { %v957_v24 = vsel %vm954_vm14, %v947_v21, %v922_v55  ;;  %v959_v28 = vsel %vm954_vm14, %v949_v17, %v926_v22 }
 0x43f   :  { %5398 = vmatmul.mubr.msk.f32.gmra.mrb[36].mxu1 %vm970_vm15, %v957_v24  ;;  %5428 = vmatmul.mubr.msk.f32.gmra.mrb[36].mxu0 %vm970_vm15, %v959_v28 }
 0x440   :  { %6293 = vmatpush3.bf16.msra.mxu1 %v6292_v54  ;;  %5430 = vmatprep.mubr.msk.f32.mxu0 %vm6727_vm0, %v6728_v6 }
 0x441   :  { %v928_v42 = vpop.permute.xlu0 %927  ;;  %6294 = vmatprep.subr.bf16.mxu1 %v6726_v0  ;;  %5457 = vmatprep.mubr.msk.f32.mxu1 %vm6727_vm0, %v6728_v6 }
 0x442   :  { %v960_v43 = vsel %vm954_vm14, %v950_v30, %v928_v42 }
 0x443   :  { %5431 = vmatmul.mubr.msk.f32.gmra.mrb[38].mxu0 %vm970_vm15, %v960_v43 }
 0x444   :  { %6296 = vmatpush3.bf16.msra.mxu1 %v6295_v34  ;;  %5484 = vmatprep.mubr.msk.f32.mxu0 %vm6727_vm0, %v6728_v6 }
 0x445   :  { %v896_v45 = vpop.permute.xlu0 %895  ;;  %v930_v46 = vpop.permute.xlu1 %929  ;;  %6309 = vmatprep.subr.bf16.mxu1 %v6726_v0 }
 0x446   :  { %v961_v25 = vsel %vm954_vm14, %v951_v44, %v930_v46  ;;  %v952_v48 = vsel %vm944_vm13, %v6977_v29, %v896_v45 }
 0x447   :  { %5458 = vmatmul.mubr.msk.f32.vlgmr.msra.gmra.mrb[38].mxu1 %vm970_vm15, %v961_v25 }
 0x448   :  { %5460 = vmatprep.mubr.msk.f32.mxu1 %vm6727_vm0, %v6728_v6 }
 0x449   :  { %v932_v49 = vpop.permute.xlu1 %931  ;;  %v898_v50 = vpop.permute.xlu0 %897 }
 0x44a   :  { %v962_v51 = vsel %vm954_vm14, %v952_v48, %v932_v49  ;;  %v953_v27 = vsel %vm944_vm13, %v6982_v31, %v898_v50 }
 0x44b   :  { %5461 = vmatmul.mubr.msk.f32.gmra.mrb[40].mxu1 %vm970_vm15, %v962_v51 }
 0x44c   :  { %5463 = vmatprep.mubr.msk.f32.mxu1 %vm6727_vm0, %v6728_v6 }
 0x44d   :  { %v934_v52 = vpop.permute.xlu1 %933 }
 0x44e   :  { %v963_v61 = vsel %vm954_vm14, %v953_v27, %v934_v52 }
 0x44f   :  { %5464 = vmatmul.mubr.msk.f32.gmra.mrb[42].mxu1 %vm970_vm15, %v963_v61 }
 0x450   :  { %5529 = vmatprep.mubr.msk.f32.mxu1 %vm6727_vm0, %v6728_v6 }
 0x502   :  { %v1046_v29 = vpop.f32.mrb[32].mxu1 }
 0x503   :  { %v5393_v53 = vpop.f32.mrb[33].mxu1  ;;  %v7335_v59 = vadd.f32 %v4521_v56, %v1046_v29 }
 0x50e   :  { %v1051_v1 = vpop.f32.mrb[34].mxu1  ;;  %v1141_v58 = vpop.f32.mrb[34].mxu0 }
 0x50f   :  { %v7337_v60 = vadd.f32 %v4521_v56, %v1051_v1  ;;  %v5396_v31 = vpop.f32.mrb[35].mxu1  ;;  %v5426_v62 = vpop.f32.mrb[35].mxu0  ;;  %v7344_v4 = vadd.f32 %v4525_v63, %v1141_v58  ;;  %v4538_v58 = vld [vmem:[%s8777_s10 + $0x148] sm:$0xff] }
 0x510   :  { %v4548_v31 = vld [vmem:[%s8777_s10 + $0x190] sm:$0xff]  ;;  %v4549_v62 = vld [vmem:[%s8777_s10 + $0x198] sm:$0xff] }
 0x511   :  { %v6298_v2 = vpack.c.bf16 %v7337_v60, %v7335_v59 }
 0x512   :  { %v1056_v3 = vpop.f32.mrb[36].mxu1  ;;  %v1146_v57 = vpop.f32.mrb[36].mxu0 }
 0x513   :  { %v7346_v5 = vadd.f32 %v4521_v56, %v1056_v3  ;;  %v5399_v7 = vpop.f32.mrb[37].mxu1  ;;  %v5429_v8 = vpop.f32.mrb[37].mxu0  ;;  %6299 = vmatpush3.bf16.msra.mxu0 %v6298_v2  ;;  %v7351_v11 = vadd.f32 %v4525_v63, %v1146_v57  ;;  %v4539_v3 = vld [vmem:[%s8777_s10 + $0x150] sm:$0xff]  ;;  %v4540_v57 = vld [vmem:[%s8777_s10 + $0x158] sm:$0xff] }
 0x514   :  { %6300 = vmatprep.subr.bf16.mxu0 %v6726_v0  ;;  %v6331_v7 = vpack.c.bf16 %v4540_v57, %v4539_v3  ;;  %v4541_v8 = vld [vmem:[%s8777_s10 + $0x160] sm:$0xff] }
 0x515   :  { %v6301_v9 = vpack.c.bf16 %v7344_v4, %v7346_v5 }
 0x516   :  { %v1151_v10 = vpop.f32.mrb[38].mxu0 }
 0x517   :  { %v7353_v12 = vadd.f32 %v4525_v63, %v1151_v10  ;;  %v5432_v13 = vpop.f32.mrb[39].mxu0  ;;  %6302 = vmatpush3.bf16.msra.mxu0 %v6301_v9  ;;  %v6343_v63 = vpack.c.bf16 %v4549_v62, %v4548_v31  ;;  %v4542_v9 = vld [vmem:[%s8777_s10 + $0x168] sm:$0xff] }
 0x518   :  { %6303 = vmatprep.subr.bf16.mxu0 %v6726_v0  ;;  %v6334_v10 = vpack.c.bf16 %v4542_v9, %v4541_v8  ;;  %v4543_v13 = vld [vmem:[%s8777_s10 + $0x170] sm:$0xff] }
 0x519   :  { %v6304_v14 = vpack.c.bf16 %v7353_v12, %v7351_v11 }
 0x51a   :  { %v1236_v15 = vpop.f32.mrb[38].mxu1 }
 0x51b   :  { %v5459_v16 = vpop.f32.mrb[39].mxu1  ;;  %6305 = vmatpush3.bf16.msra.mxu0 %v6304_v14  ;;  %v7362_v19 = vadd.f32 %v4529_v47, %v1236_v15  ;;  %v4544_v14 = vld [vmem:[%s8777_s10 + $0x178] sm:$0xff] }
 0x51c   :  { %6306 = vmatprep.subr.bf16.mxu0 %v6726_v0  ;;  %v6337_v15 = vpack.c.bf16 %v4544_v14, %v4543_v13  ;;  %v4550_v16 = vld [vmem:[%s8777_s10 + $0x1a0] sm:$0xff] }
 0x51e   :  { %v1241_v18 = vpop.f32.mrb[40].mxu1 }
 0x51f   :  { %v7364_v20 = vadd.f32 %v4529_v47, %v1241_v18  ;;  %v5462_v54 = vpop.f32.mrb[41].mxu1 }
 0x520   :  { %v4552_v54 = vld [vmem:[%s8777_s10 + $0x1b0] sm:$0xff] }
 0x521   :  { %v6307_v17 = vpack.c.bf16 %v7364_v20, %v7362_v19 }
 0x522   :  { %v1246_v21 = vpop.f32.mrb[42].mxu1 }
 0x523   :  { %v5465_v55 = vpop.f32.mrb[43].mxu1  ;;  %6308 = vmatpush3.bf16.msra.mxu0 %v6307_v17  ;;  %v7369_v22 = vadd.f32 %v4529_v47, %v1246_v21  ;;  %v4551_v47 = vld [vmem:[%s8777_s10 + $0x1a8] sm:$0xff]  ;;  %v4553_v17 = vld [vmem:[%s8777_s10 + $0x1b8] sm:$0xff] }
 0x524   :  { %5482 = vmatprep.subr.mxu0 %v6728_v6  ;;  %v6346_v18 = vpack.c.bf16 %v4551_v47, %v4550_v16  ;;  %v6349_v21 = vpack.c.bf16 %v4553_v17, %v4552_v54  ;;  %v4560_v16 = vld [vmem:[%s8777_s10 + $0x1e8] sm:$0xff]  ;;  %v4561_v17 = vld [vmem:[%s8777_s10 + $0x1f0] sm:$0xff] }
 0x527   :  { %5483 = vmatpush3.msra.mxu0 %v7369_v22 }
 0x528   :  { %5485 = vmatmul.mubr.msk.f32.vlgmr.msra.gmra.mrb[40].mxu0 %vm606_vm12, %v6988_v32  ;;  %6321 = vmatprep.subr.bf16.mxu0 %v6726_v0 }
 0x529   :  { %5487 = vmatprep.mubr.msk.f32.mxu0 %vm6727_vm0, %v6728_v6 }
 0x52c   :  { %5488 = vmatmul.mubr.msk.f32.gmra.mrb[42].mxu0 %vm606_vm12, %v6999_v33 }
 0x52d   :  { %5490 = vmatprep.mubr.msk.f32.mxu0 %vm6727_vm0, %v6728_v6 }
 0x530   :  { %5491 = vmatmul.mubr.msk.f32.gmra.mrb[44].mxu0 %vm606_vm12, %v7008_v35 }
 0x531   :  { %5493 = vmatprep.mubr.msk.f32.mxu0 %vm6727_vm0, %v6728_v6 }
 0x534   :  { %5494 = vmatmul.mubr.msk.f32.gmra.mrb[46].mxu0 %vm606_vm12, %v7017_v36 }
 0x535   :  { %5496 = vmatprep.mubr.msk.f32.mxu0 %vm6727_vm0, %v6728_v6 }
 0x538   :  { %5497 = vmatmul.mubr.msk.f32.gmra.mrb[48].mxu0 %vm606_vm12, %v7026_v37 }
 0x539   :  { %5499 = vmatprep.mubr.msk.f32.mxu0 %vm6727_vm0, %v6728_v6 }
 0x53c   :  { %5500 = vmatmul.mubr.msk.f32.gmra.mrb[50].mxu0 %vm606_vm12, %v7035_v38 }
 0x53d   :  { %5502 = vmatprep.mubr.msk.f32.mxu0 %vm6727_vm0, %v6728_v6 }
 0x540   :  { %5503 = vmatmul.mubr.msk.f32.gmra.mrb[52].mxu0 %vm606_vm12, %v7044_v39 }
 0x541   :  { %5505 = vmatprep.mubr.msk.f32.mxu0 %vm6727_vm0, %v6728_v6 }
 0x544   :  { %5506 = vmatmul.mubr.msk.f32.gmra.mrb[54].mxu0 %vm606_vm12, %v7053_v40 }
 0x545   :  { %5508 = vmatprep.mubr.msk.f32.mxu0 %vm6727_vm0, %v6728_v6 }
 0x548   :  { %5509 = vmatmul.mubr.msk.f32.gmra.mrb[56].mxu0 %vm606_vm12, %v7062_v41 }
 0x549   :  { %5580 = vmatprep.mubr.msk.f32.mxu0 %vm6727_vm0, %v6728_v6 }
 0x5fb   :  { %v1361_v23 = vpop.f32.mrb[40].mxu0 }
 0x5fc   :  { %1542 = vrot.lane.b32.xlu0 %v1361_v23, %s6730_s23  ;;  %v5486_v26 = vpop.f32.mrb[41].mxu0 }
 0x5fd   :  { %v4555_v26 = vld [vmem:[%s8777_s10 + $0x1c8] sm:$0xff] }
 0x5ff   :  { %v1366_v24 = vpop.f32.mrb[42].mxu0 }
 0x600   :  { %v6310_v28 = vpack.c.bf16 %v1366_v24, %v1361_v23  ;;  %1544 = vrot.lane.b32.xlu0 %v1366_v24, %s6730_s23  ;;  %v5489_v34 = vpop.f32.mrb[43].mxu0  ;;  %v4554_v23 = vld [vmem:[%s8777_s10 + $0x1c0] sm:$0xff] }
 0x601   :  { %v6352_v34 = vpack.c.bf16 %v4555_v26, %v4554_v23 }
 0x602   :  { %6311 = vmatpush3.bf16.msra.mxu1 %v6310_v28 }
 0x603   :  { %v1371_v30 = vpop.f32.mrb[44].mxu0  ;;  %6312 = vmatprep.subr.bf16.mxu1 %v6726_v0 }
 0x604   :  { %1546 = vrot.lane.b32.xlu0 %v1371_v30, %s6730_s23  ;;  %v5492_v42 = vpop.f32.mrb[45].mxu0 }
 0x607   :  { %v7413_v43 = vpop.f32.mrb[46].mxu0 }
 0x608   :  { %v6313_v44 = vpack.c.bf16 %v7413_v43, %v1371_v30  ;;  %v5495_v45 = vpop.f32.mrb[47].mxu0 }
 0x609   :  { %v4557_v45 = vld [vmem:[%s8777_s10 + $0x1d8] sm:$0xff] }
 0x60a   :  { %6314 = vmatpush3.bf16.msra.mxu1 %v6313_v44  ;;  %v4556_v44 = vld [vmem:[%s8777_s10 + $0x1d0] sm:$0xff] }
 0x60b   :  { %v7416_v46 = vpop.f32.mrb[48].mxu0  ;;  %6315 = vmatprep.subr.bf16.mxu1 %v6726_v0 }
 0x60c   :  { %v5498_v25 = vpop.f32.mrb[49].mxu0 }
 0x60f   :  { %v1386_v48 = vpop.f32.mrb[50].mxu0 }
 0x610   :  { %v6316_v49 = vpack.c.bf16 %v1386_v48, %v7416_v46  ;;  %1552 = vrot.lane.b32.xlu0 %v1386_v48, %s6730_s23  ;;  %v5501_v50 = vpop.f32.mrb[51].mxu0 }
 0x612   :  { %6317 = vmatpush3.bf16.msra.mxu1 %v6316_v49  ;;  %v6355_v49 = vpack.c.bf16 %v4557_v45, %v4556_v44 }
 0x613   :  { %v7421_v51 = vpop.f32.mrb[52].mxu0  ;;  %6318 = vmatprep.subr.bf16.mxu1 %v6726_v0 }
 0x614   :  { %v5504_v27 = vpop.f32.mrb[53].mxu0 }
 0x617   :  { %v7424_v52 = vpop.f32.mrb[54].mxu0 }
 0x618   :  { %v6319_v61 = vpack.c.bf16 %v7424_v52, %v7421_v51  ;;  %v5507_v29 = vpop.f32.mrb[55].mxu0 }
 0x61a   :  { %6320 = vmatpush3.bf16.msra.mxu1 %v6319_v61 }
 0x61b   :  { %v7428_v53 = vpop.f32.mrb[56].mxu0  ;;  %5527 = vmatprep.subr.mxu1 %v6728_v6 }
 0x61c   :  { %v5510_v56 = vpop.f32.mrb[57].mxu0 }
 0x61e   :  { %5528 = vmatpush3.msra.mxu1 %v7428_v53 }
 0x61f   :  { %5530 = vmatmul.mubr.msk.f32.vlgmr.msra.gmra.mrb[44].mxu1 %vm606_vm12, %v6988_v32  ;;  %6339 = vmatprep.subr.bf16.mxu1 %v6726_v0  ;;  %v4533_v32 = vld [vmem:[%s8777_s10 + $0x120] sm:$0xff] }
 0x620   :  { %5532 = vmatprep.mubr.msk.f32.mxu1 %vm6727_vm0, %v6728_v6 }
 0x623   :  { %5533 = vmatmul.mubr.msk.f32.gmra.mrb[46].mxu1 %vm606_vm12, %v6999_v33  ;;  %v4534_v33 = vld [vmem:[%s8777_s10 + $0x128] sm:$0xff] }
 0x624   :  { %5535 = vmatprep.mubr.msk.f32.mxu1 %vm6727_vm0, %v6728_v6 }
 0x627   :  { %5536 = vmatmul.mubr.msk.f32.gmra.mrb[48].mxu1 %vm606_vm12, %v7008_v35  ;;  %v4535_v35 = vld [vmem:[%s8777_s10 + $0x130] sm:$0xff] }
 0x628   :  { %5538 = vmatprep.mubr.msk.f32.mxu1 %vm6727_vm0, %v6728_v6 }
 0x62b   :  { %5539 = vmatmul.mubr.msk.f32.gmra.mrb[50].mxu1 %vm606_vm12, %v7017_v36  ;;  %v6322_v36 = vpack.c.bf16 %v4534_v33, %v4533_v32 }
 0x62c   :  { %5541 = vmatprep.mubr.msk.f32.mxu1 %vm6727_vm0, %v6728_v6 }
 0x62d   :  { %6323 = vmatpush3.bf16.msra.mxu0 %v6322_v36 }
 0x62e   :  { %6324 = vmatprep.subr.bf16.mxu0 %v6726_v0 }
 0x62f   :  { %5542 = vmatmul.mubr.msk.f32.gmra.mrb[52].mxu1 %vm606_vm12, %v7026_v37  ;;  %v4536_v37 = vld [vmem:[%s8777_s10 + $0x138] sm:$0xff] }
 0x630   :  { %5544 = vmatprep.mubr.msk.f32.mxu1 %vm6727_vm0, %v6728_v6 }
 0x633   :  { %5545 = vmatmul.mubr.msk.f32.gmra.mrb[54].mxu1 %vm606_vm12, %v7035_v38  ;;  %v4546_v38 = vld [vmem:[%s8777_s10 + $0x180] sm:$0xff] }
 0x634   :  { %5547 = vmatprep.mubr.msk.f32.mxu1 %vm6727_vm0, %v6728_v6 }
 0x637   :  { %5548 = vmatmul.mubr.msk.f32.gmra.mrb[56].mxu1 %vm606_vm12, %v7044_v39  ;;  %v4547_v39 = vld [vmem:[%s8777_s10 + $0x188] sm:$0xff] }
 0x638   :  { %5550 = vmatprep.mubr.msk.f32.mxu1 %vm6727_vm0, %v6728_v6  ;;  %v6340_v1 = vpack.c.bf16 %v4547_v39, %v4546_v38 }
 0x63a   :  { %6341 = vmatpush3.bf16.msra.mxu1 %v6340_v1 }
 0x63b   :  { %5551 = vmatmul.mubr.msk.f32.gmra.mrb[58].mxu1 %vm606_vm12, %v7053_v40  ;;  %v6325_v40 = vpack.c.bf16 %v4536_v37, %v4535_v35  ;;  %6342 = vmatprep.subr.bf16.mxu1 %v6726_v0 }
 0x63c   :  { %5553 = vmatprep.mubr.msk.f32.mxu1 %vm6727_vm0, %v6728_v6 }
 0x63d   :  { %6326 = vmatpush3.bf16.msra.mxu0 %v6325_v40 }
 0x63e   :  { %6327 = vmatprep.subr.bf16.mxu0 %v6726_v0  ;;  %6344 = vmatpush3.bf16.msra.mxu1 %v6343_v63 }
 0x63f   :  { %5554 = vmatmul.mubr.msk.f32.gmra.mrb[60].mxu1 %vm606_vm12, %v7062_v41  ;;  %v4537_v41 = vld [vmem:[%s8777_s10 + $0x140] sm:$0xff]  ;;  %6345 = vmatprep.subr.bf16.mxu1 %v6726_v0 }
 0x640   :  { %5613 = vmatprep.mubr.msk.f32.mxu1 %vm6727_vm0, %v6728_v6  ;;  %v6328_v2 = vpack.c.bf16 %v4538_v58, %v4537_v41 }
 0x642   :  { %6329 = vmatpush3.bf16.msra.mxu0 %v6328_v2  ;;  %6347 = vmatpush3.bf16.msra.mxu1 %v6346_v18 }
 0x643   :  { %6330 = vmatprep.subr.bf16.mxu0 %v6726_v0  ;;  %6348 = vmatprep.subr.bf16.mxu1 %v6726_v0 }
 0x646   :  { %6332 = vmatpush3.bf16.msra.mxu0 %v6331_v7  ;;  %6350 = vmatpush3.bf16.msra.mxu1 %v6349_v21  ;;  %v4562_v21 = vld [vmem:[%s8777_s10 + $0x1f8] sm:$0xff] }
 0x647   :  { %6333 = vmatprep.subr.bf16.mxu0 %v6726_v0  ;;  %6351 = vmatprep.subr.bf16.mxu1 %v6726_v0  ;;  %v6361_v23 = vpack.c.bf16 %v4562_v21, %v4561_v17 }
 0x64a   :  { %6335 = vmatpush3.bf16.msra.mxu0 %v6334_v10  ;;  %6353 = vmatpush3.bf16.msra.mxu1 %v6352_v34  ;;  %v4564_v34 = vld [vmem:[%s8777_s10 + $0x208] sm:$0xff] }
 0x64b   :  { %6336 = vmatprep.subr.bf16.mxu0 %v6726_v0  ;;  %6354 = vmatprep.subr.bf16.mxu1 %v6726_v0 }
 0x64e   :  { %6338 = vmatpush3.bf16.msra.mxu0 %v6337_v15  ;;  %6356 = vmatpush3.bf16.msra.mxu1 %v6355_v49  ;;  %v4559_v15 = vld [vmem:[%s8777_s10 + $0x1e0] sm:$0xff] }
 0x64f   :  { %6357 = vmatprep.subr.bf16.mxu0 %v6726_v0  ;;  %6375 = vmatprep.subr.bf16.mxu1 %v6726_v0  ;;  %v6358_v47 = vpack.c.bf16 %v4560_v16, %v4559_v15 }
 0x66e   :  { %v1543_v13 = vpop.permute.xlu0 %1542 }
 0x672   :  { %v1545_v14 = vpop.permute.xlu0 %1544 }
 0x6f2   :  { %v1471_v55 = vpop.f32.mrb[44].mxu1 }
 0x6f3   :  { %v1515_v24 = vmul.f32 2.0, %v1471_v55  ;;  %v5531_v28 = vpop.f32.mrb[45].mxu1 }
 0x6f4   :  { %v4563_v28 = vld [vmem:[%s8777_s10 + $0x200] sm:$0xff] }
 0x6f5   :  { %v1524_v30 = vsub.f32 %v1515_v24, %v7335_v59 }
 0x6f6   :  { %v1476_v42 = vpop.f32.mrb[46].mxu1 }
 0x6f7   :  { %v1516_v25 = vmul.f32 2.0, %v1476_v42  ;;  %1578 = vrot.lane.b32.xlu1 %v1524_v30, %s6731_s1  ;;  %v5534_v48 = vpop.f32.mrb[47].mxu1 }
 0x6f8   :  { %v4566_v48 = vld [vmem:[%s8777_s10 + $0x218] sm:$0xff] }
 0x6f9   :  { %v1525_v50 = vsub.f32 %v1516_v25, %v7337_v60  ;;  %v4565_v25 = vld [vmem:[%s8777_s10 + $0x210] sm:$0xff] }
 0x6fa   :  { %v1481_v27 = vpop.f32.mrb[48].mxu1 }
 0x6fb   :  { %v1517_v61 = vmul.f32 2.0, %v1481_v27  ;;  %1548 = vrot.lane.b32.xlu1 %v7413_v43, %s6730_s23  ;;  %1580 = vrot.lane.b32.xlu0 %v1525_v50, %s6731_s1  ;;  %v5537_v29 = vpop.f32.mrb[49].mxu1  ;;  %v6367_v50 = vpack.c.bf16 %v4566_v48, %v4565_v25  ;;  %v4567_v27 = vld [vmem:[%s8777_s10 + $0x220] sm:$0xff] }
 0x6fd   :  { %v1526_v56 = vsub.f32 %v1517_v61, %v7346_v5  ;;  %v4568_v61 = vld [vmem:[%s8777_s10 + $0x228] sm:$0xff] }
 0x6fe   :  { %v1486_v32 = vpop.f32.mrb[50].mxu1  ;;  %v6370_v29 = vpack.c.bf16 %v4568_v61, %v4567_v27  ;;  %v6710_v27 = vld [vmem:[%s8776_s9 + $0x10] sm:$0xff]  ;;  %v6711_v61 = vld [vmem:[%s8776_s9 + $0x18] sm:$0xff] }
 0x6ff   :  { %1550 = vrot.lane.b32.xlu1 %v7416_v46, %s6730_s23  ;;  %1582 = vrot.lane.b32.xlu0 %v1526_v56, %s6731_s1  ;;  %v5540_v33 = vpop.f32.mrb[51].mxu1  ;;  %v1518_v35 = vmul.f32 2.0, %v1486_v32 }
 0x700   :  { %v4569_v33 = vld [vmem:[%s8777_s10 + $0x230] sm:$0xff] }
 0x701   :  { %v1527_v43 = vsub.f32 %v1518_v35, %v7344_v4  ;;  %v4570_v35 = vld [vmem:[%s8777_s10 + $0x238] sm:$0xff] }
 0x702   :  { %v1491_v36 = vpop.f32.mrb[52].mxu1 }
 0x703   :  { %1554 = vrot.lane.b32.xlu1 %v7421_v51, %s6730_s23  ;;  %v5543_v37 = vpop.f32.mrb[53].mxu1  ;;  %v1519_v38 = vmul.f32 2.0, %v1491_v36 }
 0x705   :  { %v1528_v1 = vsub.f32 %v1519_v38, %v7351_v11 }
 0x706   :  { %v1496_v39 = vpop.f32.mrb[54].mxu1 }
 0x707   :  { %v1520_v40 = vmul.f32 2.0, %v1496_v39  ;;  %1584 = vrot.lane.b32.xlu1 %v1527_v43, %s6731_s1  ;;  %v5546_v41 = vpop.f32.mrb[55].mxu1 }
 0x709   :  { %v1529_v46 = vsub.f32 %v1520_v40, %v7353_v12 }
 0x70a   :  { %v1501_v58 = vpop.f32.mrb[56].mxu1 }
 0x70b   :  { %v1521_v31 = vmul.f32 2.0, %v1501_v58  ;;  %1586 = vrot.lane.b32.xlu1 %v1528_v1, %s6731_s1  ;;  %1588 = vrot.lane.b32.xlu0 %v1529_v46, %s6731_s1  ;;  %v5549_v51 = vpop.f32.mrb[57].mxu1 }
 0x70d   :  { %v1530_v62 = vsub.f32 %v1521_v31, %v7362_v19 }
 0x70e   :  { %v1506_v63 = vpop.f32.mrb[58].mxu1 }
 0x70f   :  { %v1522_v2 = vmul.f32 2.0, %v1506_v63  ;;  %1556 = vrot.lane.b32.xlu0 %v7424_v52, %s6730_s23  ;;  %1590 = vrot.lane.b32.xlu1 %v1530_v62, %s6731_s1  ;;  %v5552_v3 = vpop.f32.mrb[59].mxu1  ;;  %v1547_v52 = vpop.permute.xlu0 %1546 }
 0x710   :  { %v1607_v42 = vsel %vm944_vm13, %v7346_v5, %v1547_v52  ;;  %v4594_v52 = vld [vmem:[%s8778_s11 + $0x4] ss:$0 sm:$0xff] }
 0x711   :  { %v1531_v57 = vsub.f32 %v1522_v2, %v7364_v20 }
 0x712   :  { %v1511_v7 = vpop.f32.mrb[60].mxu1 }
 0x713   :  { %v1523_v8 = vmul.f32 2.0, %v1511_v7  ;;  %1558 = vrot.lane.b32.xlu0 %v7428_v53, %s6730_s23  ;;  %1592 = vrot.lane.b32.xlu1 %v1531_v57, %s6731_s1  ;;  %v5555_v9 = vpop.f32.mrb[61].mxu1  ;;  %v1605_v53 = vsel %vm944_vm13, %v7335_v59, %v1543_v13  ;;  %v1553_v18 = vpop.permute.xlu0 %1552  ;;  %v1606_v59 = vsel %vm944_vm13, %v7337_v60, %v1545_v14  ;;  %v6364_v60 = vpack.c.bf16 %v4564_v34, %v4563_v28  ;;  %v4590_v57 = vld [vmem:[%s8778_s11 + $0x3] ss:$0 sm:$0xff]  ;;  %v4598_v28 = vld [vmem:[%s8778_s11 + $0x5] ss:$0 sm:$0xff] }
 0x714   :  { %v1610_v40 = vsel %vm944_vm13, %v7353_v12, %v1553_v18 }
 0x715   :  { %v1532_v10 = vsub.f32 %v1523_v8, %v7369_v22 }
 0x717   :  { %1594 = vrot.lane.b32.xlu1 %v1532_v10, %s6731_s1 }
 0x769   :  { %v1579_v54 = vpop.permute.xlu1 %1578 }
 0x76a   :  { %v1614_v55 = vsel %vm954_vm14, %v1605_v53, %v1579_v54 }
 0x76b   :  { %5581 = vmatmul.mubr.msk.f32.vlgmr.msra.gmra.mrb[58].mxu0 %vm970_vm15, %v1614_v55 }
 0x76c   :  { %6359 = vmatpush3.bf16.msra.mxu0 %v6358_v47  ;;  %5583 = vmatprep.mubr.msk.f32.mxu0 %vm6727_vm0, %v6728_v6 }
 0x76d   :  { %v1549_v26 = vpop.permute.xlu1 %1548  ;;  %v1581_v24 = vpop.permute.xlu0 %1580  ;;  %6360 = vmatprep.subr.bf16.mxu0 %v6726_v0 }
 0x76e   :  { %v1615_v30 = vsel %vm954_vm14, %v1606_v59, %v1581_v24  ;;  %v1608_v56 = vsel %vm944_vm13, %v7344_v4, %v1549_v26  ;;  %v6373_v4 = vpack.c.bf16 %v4570_v35, %v4569_v33  ;;  %v6715_v33 = vld [vmem:[%s8776_s9 + $0x38] sm:$0xff]  ;;  %v6716_v35 = vld [vmem:[%s8776_s9 + $0x40] sm:$0xff] }
 0x76f   :  { %5584 = vmatmul.mubr.msk.f32.gmra.mrb[60].mxu0 %vm970_vm15, %v1615_v30 }
 0x770   :  { %6362 = vmatpush3.bf16.msra.mxu0 %v6361_v23  ;;  %5586 = vmatprep.mubr.msk.f32.mxu0 %vm6727_vm0, %v6728_v6 }
 0x771   :  { %v1551_v44 = vpop.permute.xlu1 %1550  ;;  %v1583_v45 = vpop.permute.xlu0 %1582  ;;  %6363 = vmatprep.subr.bf16.mxu0 %v6726_v0 }
 0x772   :  { %v1616_v49 = vsel %vm954_vm14, %v1607_v42, %v1583_v45  ;;  %v1609_v37 = vsel %vm944_vm13, %v7351_v11, %v1551_v44 }
 0x773   :  { %5587 = vmatmul.mubr.msk.f32.gmra.mrb[62].mxu0 %vm970_vm15, %v1616_v49 }
 0x774   :  { %6365 = vmatpush3.bf16.msra.mxu0 %v6364_v60  ;;  %5646 = vmatprep.mubr.msk.f32.mxu0 %vm6727_vm0, %v6728_v6 }
 0x775   :  { %v1555_v5 = vpop.permute.xlu1 %1554  ;;  %6366 = vmatprep.subr.bf16.mxu0 %v6726_v0 }
 0x776   :  { %v1611_v41 = vsel %vm944_vm13, %v7362_v19, %v1555_v5  ;;  %v6709_v5 = vld [vmem:[%s8776_s9 + $0x8] sm:$0xff] }
 0x778   :  { %6368 = vmatpush3.bf16.msra.mxu0 %v6367_v50  ;;  %v7720_v50 = vld [vmem:[%s8776_s9] sm:$0xff] }
 0x779   :  { %v1585_v32 = vpop.permute.xlu1 %1584  ;;  %6369 = vmatprep.subr.bf16.mxu0 %v6726_v0 }
 0x77a   :  { %v1617_v36 = vsel %vm954_vm14, %v1608_v56, %v1585_v32  ;;  %v6713_v56 = vld [vmem:[%s8776_s9 + $0x28] sm:$0xff]  ;;  %v6714_v32 = vld [vmem:[%s8776_s9 + $0x30] sm:$0xff] }
 0x77b   :  { %5614 = vmatmul.mubr.msk.f32.vlgmr.msra.gmra.mrb[62].mxu1 %vm970_vm15, %v1617_v36 }
 0x77c   :  { %6371 = vmatpush3.bf16.msra.mxu0 %v6370_v29  ;;  %5616 = vmatprep.mubr.msk.f32.mxu1 %vm6727_vm0, %v6728_v6  ;;  %v6712_v29 = vld [vmem:[%s8776_s9 + $0x20] sm:$0xff] }
 0x77d   :  { %v1587_v43 = vpop.permute.xlu1 %1586  ;;  %v1589_v38 = vpop.permute.xlu0 %1588  ;;  %6372 = vmatprep.subr.bf16.mxu0 %v6726_v0 }
 0x77e   :  { %v1618_v39 = vsel %vm954_vm14, %v1609_v37, %v1587_v43  ;;  %v1619_v46 = vsel %vm954_vm14, %v1610_v40, %v1589_v38 }
 0x77f   :  { %5617 = vmatmul.mubr.msk.f32.gmra.mrb[64].mxu1 %vm970_vm15, %v1618_v39 }
 0x780   :  { %6374 = vmatpush3.bf16.msra.mxu0 %v6373_v4  ;;  %5619 = vmatprep.mubr.msk.f32.mxu1 %vm6727_vm0, %v6728_v6 }
 0x781   :  { %v1557_v1 = vpop.permute.xlu0 %1556  ;;  %v1591_v11 = vpop.permute.xlu1 %1590  ;;  %6387 = vmatprep.subr.bf16.mxu0 %v6726_v0 }
 0x782   :  { %v1620_v58 = vsel %vm954_vm14, %v1611_v41, %v1591_v11  ;;  %v1612_v12 = vsel %vm944_vm13, %v7364_v20, %v1557_v1 }
 0x783   :  { %5620 = vmatmul.mubr.msk.f32.gmra.mrb[66].mxu1 %vm970_vm15, %v1619_v46  ;;  %5647 = vmatmul.mubr.msk.f32.vlgmr.msra.gmra.mrb[64].mxu0 %vm970_vm15, %v1620_v58 }
 0x784   :  { %5649 = vmatprep.mubr.msk.f32.mxu0 %vm6727_vm0, %v6728_v6  ;;  %5673 = vmatprep.mubr.msk.f32.mxu1 %vm6727_vm0, %v6728_v6 }
 0x785   :  { %v1593_v19 = vpop.permute.xlu1 %1592  ;;  %v1559_v31 = vpop.permute.xlu0 %1558 }
 0x786   :  { %v1621_v51 = vsel %vm954_vm14, %v1612_v12, %v1593_v19  ;;  %v1613_v62 = vsel %vm944_vm13, %v7369_v22, %v1559_v31 }
 0x787   :  { %5650 = vmatmul.mubr.msk.f32.gmra.mrb[66].mxu0 %vm970_vm15, %v1621_v51 }
 0x788   :  { %5652 = vmatprep.mubr.msk.f32.mxu0 %vm6727_vm0, %v6728_v6 }
 0x789   :  { %v1595_v63 = vpop.permute.xlu1 %1594 }
 0x78a   :  { %v1622_v2 = vsel %vm954_vm14, %v1613_v62, %v1595_v63 }
 0x78b   :  { %5653 = vmatmul.mubr.msk.f32.gmra.mrb[68].mxu0 %vm970_vm15, %v1622_v2 }
 0x78c   :  { %5718 = vmatprep.mubr.msk.f32.mxu0 %vm6727_vm0, %v6728_v6 }
 0x83e   :  { %v1704_v20 = vpop.f32.mrb[58].mxu0 }
 0x83f   :  { %v5582_v3 = vpop.f32.mrb[59].mxu0  ;;  %v7680_v8 = vadd.f32 %v4590_v57, %v1704_v20 }
 0x842   :  { %v1709_v7 = vpop.f32.mrb[60].mxu0 }
 0x843   :  { %v7682_v9 = vadd.f32 %v4590_v57, %v1709_v7  ;;  %v5585_v22 = vpop.f32.mrb[61].mxu0  ;;  %v4602_v7 = vld [vmem:[%s8777_s10 + $0x240] sm:$0xff] }
 0x844   :  { %v4603_v22 = vld [vmem:[%s8777_s10 + $0x248] sm:$0xff] }
 0x845   :  { %v6376_v10 = vpack.c.bf16 %v7682_v9, %v7680_v8 }
 0x846   :  { %v1714_v13 = vpop.f32.mrb[62].mxu0 }
 0x847   :  { %v5588_v14 = vpop.f32.mrb[63].mxu0  ;;  %6377 = vmatpush3.bf16.msra.mxu1 %v6376_v10  ;;  %v7690_v16 = vadd.f32 %v4590_v57, %v1714_v13  ;;  %v4604_v10 = vld [vmem:[%s8777_s10 + $0x250] sm:$0xff]  ;;  %v6400_v13 = vpack.c.bf16 %v4603_v22, %v4602_v7 }
 0x848   :  { %6378 = vmatprep.subr.bf16.mxu1 %v6726_v0  ;;  %v4605_v14 = vld [vmem:[%s8777_s10 + $0x258] sm:$0xff] }
 0x84e   :  { %v1799_v15 = vpop.f32.mrb[62].mxu1 }
 0x84f   :  { %v7692_v47 = vadd.f32 %v4594_v52, %v1799_v15  ;;  %v5615_v53 = vpop.f32.mrb[63].mxu1  ;;  %v4616_v15 = vld [vmem:[%s8777_s10 + $0x2a8] sm:$0xff] }
 0x850   :  { %v6403_v53 = vpack.c.bf16 %v4605_v14, %v4604_v10 }
 0x851   :  { %v6379_v18 = vpack.c.bf16 %v7692_v47, %v7690_v16 }
 0x852   :  { %v1804_v54 = vpop.f32.mrb[64].mxu1 }
 0x853   :  { %v5618_v17 = vpop.f32.mrb[65].mxu1  ;;  %6380 = vmatpush3.bf16.msra.mxu1 %v6379_v18  ;;  %v7697_v23 = vadd.f32 %v4594_v52, %v1804_v54  ;;  %v4617_v54 = vld [vmem:[%s8777_s10 + $0x2b0] sm:$0xff] }
 0x854   :  { %6381 = vmatprep.subr.bf16.mxu1 %v6726_v0  ;;  %v4618_v17 = vld [vmem:[%s8777_s10 + $0x2b8] sm:$0xff] }
 0x856   :  { %v1809_v21 = vpop.f32.mrb[66].mxu1  ;;  %v1894_v55 = vpop.f32.mrb[64].mxu0 }
 0x857   :  { %v7699_v59 = vadd.f32 %v4594_v52, %v1809_v21  ;;  %v5621_v26 = vpop.f32.mrb[67].mxu1  ;;  %v5648_v24 = vpop.f32.mrb[65].mxu0  ;;  %v7706_v60 = vadd.f32 %v4598_v28, %v1894_v55  ;;  %v4615_v52 = vld [vmem:[%s8777_s10 + $0x2a0] sm:$0xff]  ;;  %v4607_v55 = vld [vmem:[%s8777_s10 + $0x268] sm:$0xff] }
 0x858   :  { %v6418_v18 = vpack.c.bf16 %v4616_v15, %v4615_v52  ;;  %v4606_v21 = vld [vmem:[%s8777_s10 + $0x260] sm:$0xff]  ;;  %v6421_v26 = vpack.c.bf16 %v4618_v17, %v4617_v54 }
 0x859   :  { %v6382_v34 = vpack.c.bf16 %v7699_v59, %v7697_v23  ;;  %v4619_v24 = vld [vmem:[%s8777_s10 + $0x2c0] sm:$0xff] }
 0x85a   :  { %v1899_v30 = vpop.f32.mrb[66].mxu0 }
 0x85b   :  { %v7708_v42 = vadd.f32 %v4598_v28, %v1899_v30  ;;  %v5651_v44 = vpop.f32.mrb[67].mxu0  ;;  %6383 = vmatpush3.bf16.msra.mxu1 %v6382_v34  ;;  %v6406_v34 = vpack.c.bf16 %v4607_v55, %v4606_v21  ;;  %v4608_v30 = vld [vmem:[%s8777_s10 + $0x270] sm:$0xff] }
 0x85c   :  { %6384 = vmatprep.subr.bf16.mxu1 %v6726_v0  ;;  %v4609_v44 = vld [vmem:[%s8777_s10 + $0x278] sm:$0xff] }
 0x85d   :  { %v6385_v45 = vpack.c.bf16 %v7708_v42, %v7706_v60 }
 0x85e   :  { %v1904_v25 = vpop.f32.mrb[68].mxu0 }
 0x85f   :  { %v5654_v48 = vpop.f32.mrb[69].mxu0  ;;  %6386 = vmatpush3.bf16.msra.mxu1 %v6385_v45  ;;  %v7714_v49 = vadd.f32 %v4598_v28, %v1904_v25  ;;  %v4620_v28 = vld [vmem:[%s8777_s10 + $0x2c8] sm:$0xff]  ;;  %v6409_v25 = vpack.c.bf16 %v4609_v44, %v4608_v30 }
 0x860   :  { %5671 = vmatprep.subr.mxu1 %v6728_v6  ;;  %v6424_v45 = vpack.c.bf16 %v4620_v28, %v4619_v24  ;;  %v4610_v48 = vld [vmem:[%s8777_s10 + $0x280] sm:$0xff] }
 0x863   :  { %5672 = vmatpush3.msra.mxu1 %v7714_v49 }
 0x864   :  { %5674 = vmatmul.mubr.msk.f32.vlgmr.msra.gmra.mrb[68].mxu1 %vm606_vm12, %v7720_v50  ;;  %6399 = vmatprep.subr.bf16.mxu1 %v6726_v0 }
 0x865   :  { %5676 = vmatprep.mubr.msk.f32.mxu1 %vm6727_vm0, %v6728_v6  ;;  %6401 = vmatpush3.bf16.msra.mxu1 %v6400_v13 }
 0x866   :  { %6402 = vmatprep.subr.bf16.mxu1 %v6726_v0 }
 0x868   :  { %5677 = vmatmul.mubr.msk.f32.gmra.mrb[70].mxu1 %vm606_vm12, %v6709_v5 }
 0x869   :  { %5679 = vmatprep.mubr.msk.f32.mxu1 %vm6727_vm0, %v6728_v6  ;;  %6404 = vmatpush3.bf16.msra.mxu1 %v6403_v53 }
 0x86a   :  { %6405 = vmatprep.subr.bf16.mxu1 %v6726_v0 }
 0x86c   :  { %5680 = vmatmul.mubr.msk.f32.gmra.mrb[72].mxu1 %vm606_vm12, %v6710_v27 }
 0x86d   :  { %5682 = vmatprep.mubr.msk.f32.mxu1 %vm6727_vm0, %v6728_v6  ;;  %6407 = vmatpush3.bf16.msra.mxu1 %v6406_v34 }
 0x86e   :  { %6408 = vmatprep.subr.bf16.mxu1 %v6726_v0 }
 0x870   :  { %5683 = vmatmul.mubr.msk.f32.gmra.mrb[74].mxu1 %vm606_vm12, %v6711_v61 }
 0x871   :  { %5685 = vmatprep.mubr.msk.f32.mxu1 %vm6727_vm0, %v6728_v6  ;;  %6410 = vmatpush3.bf16.msra.mxu1 %v6409_v25  ;;  %v4628_v25 = vld [vmem:[%s8777_s10 + $0x300] sm:$0xff] }
 0x872   :  { %6411 = vmatprep.subr.bf16.mxu1 %v6726_v0 }
 0x874   :  { %5686 = vmatmul.mubr.msk.f32.gmra.mrb[76].mxu1 %vm606_vm12, %v6712_v29 }
 0x875   :  { %5688 = vmatprep.mubr.msk.f32.mxu1 %vm6727_vm0, %v6728_v6 }
 0x878   :  { %5689 = vmatmul.mubr.msk.f32.gmra.mrb[78].mxu1 %vm606_vm12, %v6713_v56 }
 0x879   :  { %5691 = vmatprep.mubr.msk.f32.mxu1 %vm6727_vm0, %v6728_v6 }
 0x87c   :  { %5692 = vmatmul.mubr.msk.f32.gmra.mrb[80].mxu1 %vm606_vm12, %v6714_v32 }
 0x87d   :  { %5694 = vmatprep.mubr.msk.f32.mxu1 %vm6727_vm0, %v6728_v6 }
 0x880   :  { %5695 = vmatmul.mubr.msk.f32.gmra.mrb[82].mxu1 %vm606_vm12, %v6715_v33 }
 0x881   :  { %5697 = vmatprep.mubr.msk.f32.mxu1 %vm6727_vm0, %v6728_v6 }
 0x884   :  { %5698 = vmatmul.mubr.msk.f32.gmra.mrb[84].mxu1 %vm606_vm12, %v6716_v35 }
 0x885   :  { %5769 = vmatprep.mubr.msk.f32.mxu1 %vm6727_vm0, %v6728_v6 }
 0x937   :  { %v2019_v36 = vpop.f32.mrb[68].mxu1 }
 0x938   :  { %2200 = vrot.lane.b32.xlu0 %v2019_v36, %s6730_s23  ;;  %v5675_v4 = vpop.f32.mrb[69].mxu1 }
 0x93b   :  { %v2024_v37 = vpop.f32.mrb[70].mxu1 }
 0x93c   :  { %v6388_v43 = vpack.c.bf16 %v2024_v37, %v2019_v36  ;;  %v5678_v38 = vpop.f32.mrb[71].mxu1  ;;  %v4624_v36 = vld [vmem:[%s8777_s10 + $0x2e8] sm:$0xff] }
 0x93d   :  { %v4626_v38 = vld [vmem:[%s8777_s10 + $0x2f8] sm:$0xff] }
 0x93e   :  { %6389 = vmatpush3.bf16.msra.mxu0 %v6388_v43  ;;  %v4625_v43 = vld [vmem:[%s8777_s10 + $0x2f0] sm:$0xff] }
 0x93f   :  { %v2029_v39 = vpop.f32.mrb[72].mxu1  ;;  %6390 = vmatprep.subr.bf16.mxu0 %v6726_v0 }
 0x940   :  { %v5681_v40 = vpop.f32.mrb[73].mxu1 }
 0x943   :  { %v2034_v41 = vpop.f32.mrb[74].mxu1 }
 0x944   :  { %v6391_v1 = vpack.c.bf16 %v2034_v41, %v2029_v39  ;;  %2206 = vrot.lane.b32.xlu0 %v2034_v41, %s6730_s23  ;;  %v5684_v11 = vpop.f32.mrb[75].mxu1  ;;  %v6433_v41 = vpack.c.bf16 %v4626_v38, %v4625_v43 }
 0x946   :  { %6392 = vmatpush3.bf16.msra.mxu0 %v6391_v1 }
 0x947   :  { %v7778_v46 = vpop.f32.mrb[76].mxu1  ;;  %6393 = vmatprep.subr.bf16.mxu0 %v6726_v0 }
 0x948   :  { %2202 = vrot.lane.b32.xlu0 %v2024_v37, %s6730_s23  ;;  %v5687_v58 = vpop.f32.mrb[77].mxu1 }
 0x94b   :  { %v7782_v12 = vpop.f32.mrb[78].mxu1 }
 0x94c   :  { %v6394_v19 = vpack.c.bf16 %v7782_v12, %v7778_v46  ;;  %2204 = vrot.lane.b32.xlu0 %v2029_v39, %s6730_s23  ;;  %v5690_v31 = vpop.f32.mrb[79].mxu1 }
 0x94e   :  { %6395 = vmatpush3.bf16.msra.mxu0 %v6394_v19 }
 0x94f   :  { %v7787_v51 = vpop.f32.mrb[80].mxu1  ;;  %6396 = vmatprep.subr.bf16.mxu0 %v6726_v0 }
 0x950   :  { %v5693_v62 = vpop.f32.mrb[81].mxu1 }
 0x953   :  { %v7790_v63 = vpop.f32.mrb[82].mxu1 }
 0x954   :  { %v6397_v2 = vpack.c.bf16 %v7790_v63, %v7787_v51  ;;  %v5696_v20 = vpop.f32.mrb[83].mxu1 }
 0x956   :  { %6398 = vmatpush3.bf16.msra.mxu0 %v6397_v2 }
 0x957   :  { %v7794_v3 = vpop.f32.mrb[84].mxu1  ;;  %5716 = vmatprep.subr.mxu0 %v6728_v6 }
 0x958   :  { %v5699_v57 = vpop.f32.mrb[85].mxu1 }
 0x95a   :  { %5717 = vmatpush3.msra.mxu0 %v7794_v3 }
 0x95b   :  { %5719 = vmatmul.mubr.msk.f32.vlgmr.msra.gmra.mrb[70].mxu0 %vm606_vm12, %v7720_v50  ;;  %6417 = vmatprep.subr.bf16.mxu0 %v6726_v0  ;;  %v4611_v50 = vld [vmem:[%s8777_s10 + $0x288] sm:$0xff] }
 0x95c   :  { %5721 = vmatprep.mubr.msk.f32.mxu0 %vm6727_vm0, %v6728_v6  ;;  %6419 = vmatpush3.bf16.msra.mxu0 %v6418_v18 }
 0x95d   :  { %6420 = vmatprep.subr.bf16.mxu0 %v6726_v0 }
 0x95f   :  { %5722 = vmatmul.mubr.msk.f32.gmra.mrb[72].mxu0 %vm606_vm12, %v6709_v5  ;;  %v6412_v5 = vpack.c.bf16 %v4611_v50, %v4610_v48  ;;  %v4629_v48 = vld [vmem:[%s8777_s10 + $0x308] sm:$0xff] }
 0x960   :  { %5724 = vmatprep.mubr.msk.f32.mxu0 %vm6727_vm0, %v6728_v6  ;;  %6422 = vmatpush3.bf16.msra.mxu0 %v6421_v26 }
 0x961   :  { %6423 = vmatprep.subr.bf16.mxu0 %v6726_v0  ;;  %6413 = vmatpush3.bf16.msra.mxu1 %v6412_v5  ;;  %v6436_v5 = vpack.c.bf16 %v4629_v48, %v4628_v25 }
 0x962   :  { %6414 = vmatprep.subr.bf16.mxu1 %v6726_v0 }
 0x963   :  { %5725 = vmatmul.mubr.msk.f32.gmra.mrb[74].mxu0 %vm606_vm12, %v6710_v27  ;;  %v4612_v27 = vld [vmem:[%s8777_s10 + $0x290] sm:$0xff] }
 0x964   :  { %5727 = vmatprep.mubr.msk.f32.mxu0 %vm6727_vm0, %v6728_v6  ;;  %6425 = vmatpush3.bf16.msra.mxu0 %v6424_v45 }
 0x965   :  { %6426 = vmatprep.subr.bf16.mxu0 %v6726_v0 }
 0x967   :  { %5728 = vmatmul.mubr.msk.f32.gmra.mrb[76].mxu0 %vm606_vm12, %v6711_v61  ;;  %v4613_v61 = vld [vmem:[%s8777_s10 + $0x298] sm:$0xff] }
 0x968   :  { %5730 = vmatprep.mubr.msk.f32.mxu0 %vm6727_vm0, %v6728_v6 }
 0x96b   :  { %5731 = vmatmul.mubr.msk.f32.gmra.mrb[78].mxu0 %vm606_vm12, %v6712_v29  ;;  %v6415_v29 = vpack.c.bf16 %v4613_v61, %v4612_v27 }
 0x96c   :  { %5733 = vmatprep.mubr.msk.f32.mxu0 %vm6727_vm0, %v6728_v6 }
 0x96d   :  { %6416 = vmatpush3.bf16.msra.mxu1 %v6415_v29  ;;  %v4630_v29 = vld [vmem:[%s8777_s10 + $0x310] sm:$0xff] }
 0x96e   :  { %6435 = vmatprep.subr.bf16.mxu1 %v6726_v0 }
 0x96f   :  { %5734 = vmatmul.mubr.msk.f32.gmra.mrb[80].mxu0 %vm606_vm12, %v6713_v56  ;;  %v4621_v56 = vld [vmem:[%s8777_s10 + $0x2d0] sm:$0xff] }
 0x970   :  { %5736 = vmatprep.mubr.msk.f32.mxu0 %vm6727_vm0, %v6728_v6 }
 0x973   :  { %5737 = vmatmul.mubr.msk.f32.gmra.mrb[82].mxu0 %vm606_vm12, %v6714_v32  ;;  %v4622_v32 = vld [vmem:[%s8777_s10 + $0x2d8] sm:$0xff] }
 0x974   :  { %5739 = vmatprep.mubr.msk.f32.mxu0 %vm6727_vm0, %v6728_v6 }
 0x977   :  { %5740 = vmatmul.mubr.msk.f32.gmra.mrb[84].mxu0 %vm606_vm12, %v6715_v33  ;;  %v6427_v33 = vpack.c.bf16 %v4622_v32, %v4621_v56  ;;  %v4631_v56 = vld [vmem:[%s8777_s10 + $0x318] sm:$0xff] }
 0x978   :  { %5742 = vmatprep.mubr.msk.f32.mxu0 %vm6727_vm0, %v6728_v6 }
 0x979   :  { %6428 = vmatpush3.bf16.msra.mxu0 %v6427_v33  ;;  %v6439_v33 = vpack.c.bf16 %v4631_v56, %v4630_v29 }
 0x97a   :  { %6429 = vmatprep.subr.bf16.mxu0 %v6726_v0 }
 0x97b   :  { %5743 = vmatmul.mubr.msk.f32.gmra.mrb[86].mxu0 %vm606_vm12, %v6716_v35  ;;  %v4623_v35 = vld [vmem:[%s8777_s10 + $0x2e0] sm:$0xff] }
 0x97c   :  { %5802 = vmatprep.mubr.msk.f32.mxu0 %vm6727_vm0, %v6728_v6  ;;  %v6430_v4 = vpack.c.bf16 %v4624_v36, %v4623_v35 }
 0x97e   :  { %6431 = vmatpush3.bf16.msra.mxu0 %v6430_v4  ;;  %v4632_v4 = vld [vmem:[%s8777_s10 + $0x320] sm:$0xff] }
 0x97f   :  { %6432 = vmatprep.subr.bf16.mxu0 %v6726_v0 }
 0x982   :  { %6434 = vmatpush3.bf16.msra.mxu0 %v6433_v41  ;;  %v4635_v41 = vld [vmem:[%s8777_s10 + $0x338] sm:$0xff] }
 0x9aa   :  { %v2201_v44 = vpop.permute.xlu0 %2200 }
 0x9ab   :  { %v2263_v27 = vsel %vm944_vm13, %v7680_v8, %v2201_v44  ;;  %v4663_v44 = vld [vmem:[%s8778_s11 + $0x7] ss:$0 sm:$0xff] }
 0x9b6   :  { %v2207_v45 = vpop.permute.xlu0 %2206 }
 0x9ba   :  { %v2203_v50 = vpop.permute.xlu0 %2202 }
 0x9be   :  { %v2205_v35 = vpop.permute.xlu0 %2204 }
 0x9bf   :  { %v2265_v38 = vsel %vm944_vm13, %v7690_v16, %v2205_v35  ;;  %v8066_v35 = vld [vmem:[%s8778_s11 + $0x8] ss:$0 sm:$0xff] }
 0xa2e   :  { %v2129_v37 = vpop.f32.mrb[70].mxu0 }
 0xa2f   :  { %v2173_v39 = vmul.f32 2.0, %v2129_v37  ;;  %v5720_v40 = vpop.f32.mrb[71].mxu0  ;;  %v4633_v37 = vld [vmem:[%s8777_s10 + $0x328] sm:$0xff] }
 0xa30   :  { %v4634_v40 = vld [vmem:[%s8777_s10 + $0x330] sm:$0xff] }
 0xa31   :  { %v2182_v1 = vsub.f32 %v2173_v39, %v7680_v8  ;;  %v2264_v8 = vsel %vm944_vm13, %v7682_v9, %v2203_v50 }
 0xa32   :  { %v2134_v11 = vpop.f32.mrb[72].mxu0 }
 0xa33   :  { %v2174_v58 = vmul.f32 2.0, %v2134_v11  ;;  %2236 = vrot.lane.b32.xlu1 %v2182_v1, %s6731_s1  ;;  %v5723_v19 = vpop.f32.mrb[73].mxu0  ;;  %v6445_v11 = vpack.c.bf16 %v4635_v41, %v4634_v40 }
 0xa34   :  { %v4636_v19 = vld [vmem:[%s8777_s10 + $0x340] sm:$0xff] }
 0xa35   :  { %v2183_v31 = vsub.f32 %v2174_v58, %v7682_v9  ;;  %v6442_v9 = vpack.c.bf16 %v4633_v37, %v4632_v4 }
 0xa36   :  { %v2139_v62 = vpop.f32.mrb[74].mxu0 }
 0xa37   :  { %v2175_v2 = vmul.f32 2.0, %v2139_v62  ;;  %2238 = vrot.lane.b32.xlu1 %v2183_v31, %s6731_s1  ;;  %v5726_v20 = vpop.f32.mrb[75].mxu0  ;;  %v4637_v31 = vld [vmem:[%s8777_s10 + $0x348] sm:$0xff] }
 0xa38   :  { %v4638_v20 = vld [vmem:[%s8777_s10 + $0x350] sm:$0xff] }
 0xa39   :  { %v2184_v57 = vsub.f32 %v2175_v2, %v7690_v16  ;;  %v2266_v16 = vsel %vm944_vm13, %v7692_v47, %v2207_v45  ;;  %v6448_v2 = vpack.c.bf16 %v4637_v31, %v4636_v19 }
 0xa3a   :  { %v2144_v7 = vpop.f32.mrb[76].mxu0 }
 0xa3b   :  { %v2176_v22 = vmul.f32 2.0, %v2144_v7  ;;  %2240 = vrot.lane.b32.xlu0 %v2184_v57, %s6731_s1  ;;  %v5729_v10 = vpop.f32.mrb[77].mxu0  ;;  %v4639_v57 = vld [vmem:[%s8777_s10 + $0x358] sm:$0xff] }
 0xa3d   :  { %v2185_v13 = vsub.f32 %v2176_v22, %v7692_v47  ;;  %v6451_v22 = vpack.c.bf16 %v4639_v57, %v4638_v20 }
 0xa3e   :  { %v2149_v14 = vpop.f32.mrb[78].mxu0 }
 0xa3f   :  { %2212 = vrot.lane.b32.xlu0 %v7787_v51, %s6730_s23  ;;  %2242 = vrot.lane.b32.xlu1 %v2185_v13, %s6731_s1  ;;  %v5732_v52 = vpop.f32.mrb[79].mxu0  ;;  %v2177_v15 = vmul.f32 2.0, %v2149_v14 }
 0xa41   :  { %v2186_v54 = vsub.f32 %v2177_v15, %v7697_v23 }
 0xa42   :  { %v2154_v53 = vpop.f32.mrb[80].mxu0 }
 0xa43   :  { %2214 = vrot.lane.b32.xlu0 %v7790_v63, %s6730_s23  ;;  %2208 = vrot.lane.b32.xlu1 %v7778_v46, %s6730_s23  ;;  %v5735_v18 = vpop.f32.mrb[81].mxu0  ;;  %v2178_v28 = vmul.f32 2.0, %v2154_v53 }
 0xa46   :  { %v2159_v17 = vpop.f32.mrb[82].mxu0 }
 0xa47   :  { %v2179_v21 = vmul.f32 2.0, %v2159_v17  ;;  %2210 = vrot.lane.b32.xlu0 %v7782_v12, %s6730_s23  ;;  %2244 = vrot.lane.b32.xlu1 %v2186_v54, %s6731_s1  ;;  %v5738_v51 = vpop.f32.mrb[83].mxu0  ;;  %v2187_v12 = vsub.f32 %v2178_v28, %v7699_v59 }
 0xa49   :  { %v2188_v55 = vsub.f32 %v2179_v21, %v7706_v60 }
 0xa4a   :  { %v2164_v26 = vpop.f32.mrb[84].mxu0 }
 0xa4b   :  { %v2180_v24 = vmul.f32 2.0, %v2164_v26  ;;  %2248 = vrot.lane.b32.xlu1 %v2188_v55, %s6731_s1  ;;  %v5741_v63 = vpop.f32.mrb[85].mxu0 }
 0xa4d   :  { %v2189_v46 = vsub.f32 %v2180_v24, %v7708_v42 }
 0xa4e   :  { %v7931_v34 = vpop.f32.mrb[86].mxu0 }
 0xa4f   :  { %2250 = vrot.lane.b32.xlu1 %v2189_v46, %s6731_s1  ;;  %v5744_v30 = vpop.f32.mrb[87].mxu0 }
 0xa53   :  { %2246 = vrot.lane.b32.xlu1 %v2187_v12, %s6731_s1 }
 0xaa5   :  { %v2237_v61 = vpop.permute.xlu1 %2236 }
 0xaa6   :  { %v2272_v32 = vsel %vm954_vm14, %v2263_v27, %v2237_v61 }
 0xaa7   :  { %5770 = vmatmul.mubr.msk.f32.vlgmr.msra.gmra.mrb[86].mxu1 %vm970_vm15, %v2272_v32 }
 0xaa8   :  { %6437 = vmatpush3.bf16.msra.mxu1 %v6436_v5  ;;  %5772 = vmatprep.mubr.msk.f32.mxu1 %vm6727_vm0, %v6728_v6 }
 0xaa9   :  { %v2239_v36 = vpop.permute.xlu1 %2238  ;;  %6438 = vmatprep.subr.bf16.mxu1 %v6726_v0 }
 0xaaa   :  { %v2273_v43 = vsel %vm954_vm14, %v2264_v8, %v2239_v36 }
 0xaab   :  { %5773 = vmatmul.mubr.msk.f32.gmra.mrb[88].mxu1 %vm970_vm15, %v2273_v43 }
 0xaac   :  { %6440 = vmatpush3.bf16.msra.mxu1 %v6439_v33  ;;  %5775 = vmatprep.mubr.msk.f32.mxu1 %vm6727_vm0, %v6728_v6 }
 0xaad   :  { %v2241_v39 = vpop.permute.xlu0 %2240  ;;  %6441 = vmatprep.subr.bf16.mxu1 %v6726_v0 }
 0xaae   :  { %v2274_v1 = vsel %vm954_vm14, %v2265_v38, %v2241_v39 }
 0xaaf   :  { %5776 = vmatmul.mubr.msk.f32.gmra.mrb[90].mxu1 %vm970_vm15, %v2274_v1 }
 0xab0   :  { %6443 = vmatpush3.bf16.msra.mxu1 %v6442_v9  ;;  %5835 = vmatprep.mubr.msk.f32.mxu1 %vm6727_vm0, %v6728_v6 }
 0xab1   :  { %v2243_v58 = vpop.permute.xlu1 %2242  ;;  %6444 = vmatprep.subr.bf16.mxu1 %v6726_v0  ;;  %v2213_v7 = vpop.permute.xlu0 %2212 }
 0xab2   :  { %v2275_v62 = vsel %vm954_vm14, %v2266_v16, %v2243_v58  ;;  %v2269_v15 = vsel %vm944_vm13, %v7706_v60, %v2213_v7  ;;  %v8098_v58 = vld [vmem:[%s8779_s12 + $0x8] sm:$0xff] }
 0xab3   :  { %5803 = vmatmul.mubr.msk.f32.vlgmr.msra.gmra.mrb[88].mxu0 %vm970_vm15, %v2275_v62 }
 0xab4   :  { %6446 = vmatpush3.bf16.msra.mxu1 %v6445_v11  ;;  %5805 = vmatprep.mubr.msk.f32.mxu0 %vm6727_vm0, %v6728_v6 }
 0xab5   :  { %v2209_v47 = vpop.permute.xlu1 %2208  ;;  %6447 = vmatprep.subr.bf16.mxu1 %v6726_v0  ;;  %v2215_v52 = vpop.permute.xlu0 %2214 }
 0xab6   :  { %v2267_v10 = vsel %vm944_vm13, %v7697_v23, %v2209_v47  ;;  %v2270_v23 = vsel %vm944_vm13, %v7708_v42, %v2215_v52  ;;  %v8026_v42 = vld [vmem:[%s8779_s12] sm:$0xff] }
 0xab8   :  { %6449 = vmatpush3.bf16.msra.mxu1 %v6448_v2 }
 0xab9   :  { %v2245_v13 = vpop.permute.xlu1 %2244  ;;  %6450 = vmatprep.subr.bf16.mxu1 %v6726_v0  ;;  %v2211_v17 = vpop.permute.xlu0 %2210 }
 0xaba   :  { %v2276_v14 = vsel %vm954_vm14, %v2267_v10, %v2245_v13  ;;  %v2268_v60 = vsel %vm944_vm13, %v7699_v59, %v2211_v17  ;;  %v4659_v59 = vld [vmem:[%s8778_s11 + $0x6] ss:$0 sm:$0xff] }
 0xabb   :  { %5806 = vmatmul.mubr.msk.f32.gmra.mrb[90].mxu0 %vm970_vm15, %v2276_v14 }
 0xabc   :  { %6452 = vmatpush3.bf16.msra.mxu1 %v6451_v22  ;;  %5808 = vmatprep.mubr.msk.f32.mxu0 %vm6727_vm0, %v6728_v6 }
 0xabd   :  { %v2249_v53 = vpop.permute.xlu1 %2248 }
 0xabe   :  { %v2278_v18 = vsel %vm954_vm14, %v2269_v15, %v2249_v53 }
 0xabf   :  { %5836 = vmatmul.mubr.msk.f32.vlgmr.msra.gmra.mrb[92].mxu1 %vm970_vm15, %v2278_v18 }
 0xac0   :  { %5838 = vmatprep.mubr.msk.f32.mxu1 %vm6727_vm0, %v6728_v6 }
 0xac1   :  { %v2251_v54 = vpop.permute.xlu1 %2250 }
 0xac2   :  { %v2279_v21 = vsel %vm954_vm14, %v2270_v23, %v2251_v54  ;;  %v2181_v23 = vmul.f32 2.0, %v7931_v34 }
 0xac3   :  { %5839 = vmatmul.mubr.msk.f32.gmra.mrb[94].mxu1 %vm970_vm15, %v2279_v21 }
 0xac4   :  { %5841 = vmatprep.mubr.msk.f32.mxu1 %vm6727_vm0, %v6728_v6 }
 0xac5   :  { %v2247_v51 = vpop.permute.xlu1 %2246 }
 0xac6   :  { %v2277_v55 = vsel %vm954_vm14, %v2268_v60, %v2247_v51 }
 0xac7   :  { %5809 = vmatmul.mubr.msk.f32.gmra.mrb[92].mxu0 %vm970_vm15, %v2277_v55 }
 0xac8   :  { %5854 = vmatprep.mubr.msk.f32.mxu0 %vm944_vm13, %v8026_v42 }
 0xb7a   :  { %v2362_v26 = vpop.f32.mrb[86].mxu1 }
 0xb7b   :  { %v5771_v24 = vpop.f32.mrb[87].mxu1  ;;  %v8043_v27 = vadd.f32 %v4659_v59, %v2362_v26 }
 0xb7e   :  { %v2367_v63 = vpop.f32.mrb[88].mxu1 }
 0xb7f   :  { %v5774_v28 = vpop.f32.mrb[89].mxu1  ;;  %v8040_v50 = vadd.f32 %v4659_v59, %v2367_v63 }
 0xb82   :  { %v2372_v46 = vpop.f32.mrb[90].mxu1 }
 0xb83   :  { %v8033_v30 = vadd.f32 %v4659_v59, %v2372_v46  ;;  %v5777_v12 = vpop.f32.mrb[91].mxu1  ;;  %v3080_v46 = vrot.slane %v8040_v50, 4 }
 0xb86   :  { %v2457_v45 = vpop.f32.mrb[88].mxu0 }
 0xb87   :  { %v8038_v25 = vadd.f32 %v4663_v44, %v2457_v45  ;;  %v5804_v48 = vpop.f32.mrb[89].mxu0 }
 0xb89   :  { %v2576_v5 = vrot.slane %v8038_v25, 4 }
 0xb8b   :  { %v8047_v61 = vsel %vm2575_vm2, %v8040_v50, %v2576_v5 }
 0xb8c   :  { %v6453_v56 = vpack.c.bf16 %v8047_v61, %v8043_v27 }
 0xb8e   :  { %v2462_v32 = vpop.f32.mrb[90].mxu0  ;;  %6455 = vmatprep.subr.msk.bf16.mxu0 %vm8051_vm3, %v6453_v56  ;;  %6466 = vmatprep.subr.bf16.mxu1 %v6453_v56 }
 0xb8f   :  { %v8059_v33 = vadd.f32 %v4663_v44, %v2462_v32  ;;  %v5807_v8 = vpop.f32.mrb[91].mxu0  ;;  %6458 = vmatpush3.bf16.xpose.msk.msra.mxu0 %vm8051_vm3, %v6453_v56  ;;  %6468 = vmatpush3.bf16.msra.mxu1 %v6453_v56 }
 0xb91   :  { %v2577_v36 = vrot.slane %v8059_v33, 4 }
 0xb92   :  { %v2552_v4 = vpop.f32.mrb[92].mxu1 }
 0xb93   :  { %v8070_v37 = vadd.f32 %v8066_v35, %v2552_v4  ;;  %v8073_v43 = vsel %vm2575_vm2, %v2576_v5, %v2577_v36  ;;  %v5837_v9 = vpop.f32.mrb[93].mxu1 }
 0xb95   :  { %v6459_v38 = vpack.c.bf16 %v8070_v37, %v8073_v43 }
 0xb96   :  { %v2557_v39 = vpop.f32.mrb[94].mxu1 }
 0xb97   :  { %v8078_v40 = vadd.f32 %v8066_v35, %v2557_v39  ;;  %v5840_v41 = vpop.f32.mrb[95].mxu1  ;;  %6461 = vmatprep.subr.msk.bf16.mxu0 %vm8051_vm3, %v6459_v38  ;;  %6470 = vmatprep.subr.bf16.mxu1 %v6459_v38 }
 0xb98   :  { %6464 = vmatpush3.bf16.xpose.msk.msra.mxu0 %vm8051_vm3, %v6459_v38  ;;  %6472 = vmatpush3.bf16.msra.mxu1 %v6459_v38 }
 0xb99   :  { %5852 = vmatprep.subr.msk.mxu0 %vm944_vm13, %v8078_v40  ;;  %5865 = vmatprep.subr.msk.mxu1 %vm2575_vm2, %v8078_v40 }
 0xb9a   :  { %v2467_v1 = vpop.f32.mrb[92].mxu0 }
 0xb9b   :  { %v8088_v11 = vadd.f32 %v4663_v44, %v2467_v1  ;;  %v5810_v16 = vpop.f32.mrb[93].mxu0 }
 0xb9c   :  { %5866 = vmatpush3.msk.msra.mxu1 %vm2575_vm2, %v8078_v40 }
 0xb9d   :  { %6477 = vmatprep.subr.bf16.mxu1 %v6726_v0 }
 0xba0   :  { %5853 = vmatpush3.xpose.msk.msra.mxu0 %vm944_vm13, %v8078_v40 }
 0xba1   :  { %6473 = vmatprep.subr.bf16.mxu0 %v6726_v0 }
 0xba3   :  { %5855 = vmatmul.mubr.msk.f32.vlgmr.msra.gmra.mrb[94].mxu0 %vm944_vm13, %v8098_v58 }
 0xba4   :  { %5874 = vmatprep.mubr.msk.f32.mxu0 %vm6727_vm0, %v6728_v6 }
 0xc76   :  { %v5856_v19 = vpop.f32.mrb[94].mxu0 }
 0xc77   :  { %v2678_v31 = vmul.f32 0.17677669, %v5856_v19  ;;  %v2668_v62 = vpop.f32.mrb[95].mxu0 }
 0xc78   :  { %v2677_v2 = vmul.f32 0.17677669, %v2668_v62 }
 0xc79   :  { %v2683_v47 = vsel %vm2679_vm4, %v2678_v31, -inf }
 0xc7a   :  { %2684 = vmax.xlane.f32.xlu1 %v2683_v47  ;;  %v2680_v20 = vsel %vm2679_vm4, %v2677_v2, -inf }
 0xc7b   :  { %2681 = vmax.xlane.f32.xlu0 %v2680_v20 }
 0xc8b   :  { %2216 = vrot.lane.b32.xlu1 %v7794_v3, %s6730_s23  ;;  %v2190_v3 = vsub.f32 %v2181_v23, %v7714_v49 }
 0xd07   :  { %v2685_v57 = vpop.xlane.xlu1 %2684 }
 0xd08   :  { %v2687_v7 = vsub.f32 %v2678_v31, %v2685_v57  ;;  %v2682_v22 = vpop.xlane.xlu0 %2681 }
 0xd09   :  { %v2686_v10 = vsub.f32 %v2677_v2, %v2682_v22 }
 0xd0a   :  { %v2690_v13 = vmul.f32 1.442695, %v2687_v7 }
 0xd0b   :  { %v2688_v14 = vmul.f32 1.442695, %v2686_v10  ;;  %v2217_v21 = vpop.permute.xlu1 %2216 }
 0xd0c   :  { %6652 = vpow2.f32 %v2690_v13  ;;  %v2271_v60 = vsel %vm944_vm13, %v7714_v49, %v2217_v21  ;;  %v3081_v49 = vrot.slane %v8033_v30, 4 }
 0xd0d   :  { %6654 = vpow2.f32 %v2688_v14 }
 0xd0e   :  { %v8126_v12 = vsel %vm2575_vm2, %v3081_v49, %v8059_v33  ;;  %v8132_v5 = vsel %vm2575_vm2, %v3080_v46, %v3081_v49 }
 0xd0f   :  { %v8136_v32 = vpack.c.bf16 %v8126_v12, %v8132_v5 }
 0xd16   :  { %v6653_v52 = vpop.eup %6652 }
 0xd17   :  { %v2695_v15 = vsel %vm2679_vm4, %v6653_v52, 0.0  ;;  %v6655_v53 = vpop.eup %6654 }
 0xd18   :  { %2696 = vadd.xlane.f32.xlu0 %v2695_v15  ;;  %v2692_v18 = vsel %vm2679_vm4, %v6655_v53, 0.0 }
 0xd1c   :  { %2693 = vadd.xlane.f32.xlu0 %v2692_v18 }
 0xd32   :  { %2252 = vrot.lane.b32.xlu0 %v2190_v3, %s6731_s1 }
 0xda5   :  { %v2697_v54 = vpop.xlane.xlu0 %2696 }
 0xda6   :  { %6656 = vrcp.f32 %v2697_v54 }
 0xda9   :  { %v2694_v17 = vpop.xlane.xlu0 %2693 }
 0xdaa   :  { %6658 = vrcp.f32 %v2694_v17 }
 0xdad   :  { %v2253_v51 = vpop.permute.xlu0 %2252 }
 0xdae   :  { %v2280_v55 = vsel %vm954_vm14, %v2271_v60, %v2253_v51 }
 0xdaf   :  { %5842 = vmatmul.mubr.msk.f32.gmra.mrb[96].mxu1 %vm970_vm15, %v2280_v55 }
 0xdb0   :  { %v6657_v26 = vpop.eup %6656 }
 0xdb1   :  { %v2701_v63 = vmul.f32 %v6657_v26, %v6653_v52 }
 0xdb4   :  { %v6659_v24 = vpop.eup %6658 }
 0xdb5   :  { %v2700_v34 = vmul.f32 %v6659_v24, %v6655_v53 }
 0xdb7   :  { %5867 = vmatprep.mubr.msk.f32.mxu1 %vm2679_vm4, %v2700_v34 }
 0xdb8   :  { %5868 = vmatmul.mubr.msk.f32.vlgmr.msra.gmra.mrb[98].mxu1 %vm2679_vm4, %v2701_v63 }
 0xdb9   :  { %5893 = vmatprep.mubr.msk.f32.mxu1 %vm6727_vm0, %v6728_v6 }
 0xe82   :  { %v2562_v28 = vpop.f32.mrb[96].mxu1 }
 0xe83   :  { %v5843_v59 = vpop.f32.mrb[97].mxu1  ;;  %v8129_v44 = vadd.f32 %v8066_v35, %v2562_v28  ;;  %v3086_v35 = vrot.slane %v8078_v40, 4 }
 0xe85   :  { %v8139_v8 = vrot.slane %v8129_v44, 4 }
 0xe87   :  { %v8150_v36 = vsel %vm2575_vm2, %v3086_v35, %v8139_v8 }
 0xe88   :  { %v8156_v4 = vpack.c.bf16 %v8150_v36, %v8088_v11 }
 0xe8b   :  { %v5869_v45 = vpop.f32.mrb[98].mxu1 }
 0xe8c   :  { %v2776_v48 = vpop.f32.mrb[99].mxu1 }
 0xe8d   :  { %v6474_v56 = vpack.c.bf16 %v5869_v45, %v2776_v48 }
 0xe8f   :  { %6476 = vmatpush3.bf16.xpose.msk.msra.mxu0 %vm8051_vm3, %v6474_v56  ;;  %6479 = vmatpush3.bf16.msra.mxu1 %v6474_v56 }
 0xe90   :  { %6482 = vmatprep.subr.msk.bf16.mxu0 %vm8051_vm3, %v8136_v32  ;;  %6493 = vmatprep.subr.bf16.mxu1 %v8136_v32 }
 0xe96   :  { %5875 = vmatmul.mubr.msk.f32.vlgmr.msra.gmra.mrb[96].mxu0 %vm944_vm13, %v8043_v27 }
 0xe97   :  { %6485 = vmatpush3.bf16.xpose.msk.msra.mxu0 %vm8051_vm3, %v8136_v32  ;;  %5877 = vmatprep.mubr.msk.f32.mxu0 %vm6727_vm0, %v6728_v6 }
 0xe98   :  { %6488 = vmatprep.subr.msk.bf16.mxu0 %vm8051_vm3, %v8156_v4 }
 0xe9a   :  { %5878 = vmatmul.mubr.msk.f32.gmra.mrb[98].mxu0 %vm944_vm13, %v8047_v61 }
 0xe9b   :  { %5880 = vmatprep.mubr.msk.f32.mxu0 %vm6727_vm0, %v6728_v6 }
 0xe9e   :  { %5881 = vmatmul.mubr.msk.f32.gmra.mrb[100].mxu0 %vm944_vm13, %v8073_v43 }
 0xe9f   :  { %6491 = vmatpush3.bf16.xpose.msk.msra.mxu0 %vm8051_vm3, %v8156_v4  ;;  %5883 = vmatprep.mubr.msk.f32.mxu0 %vm6727_vm0, %v6728_v6 }
 0xea0   :  { %5916 = vmatprep.subr.msk.mxu0 %vm944_vm13, %v8139_v8 }
 0xea2   :  { %5884 = vmatmul.mubr.msk.f32.gmra.mrb[102].mxu0 %vm944_vm13, %v8070_v37 }
 0xea3   :  { %5886 = vmatprep.mubr.msk.f32.mxu0 %vm6727_vm0, %v6728_v6 }
 0xea6   :  { %5887 = vmatmul.mubr.msk.f32.gmra.mrb[104].mxu0 %vm944_vm13, %v8078_v40 }
 0xea7   :  { %5917 = vmatpush3.xpose.msk.msra.mxu0 %vm944_vm13, %v8139_v8  ;;  %5918 = vmatprep.mubr.msk.f32.mxu0 %vm944_vm13, %v8026_v42 }
 0xea8   :  { %6500 = vmatprep.subr.bf16.mxu0 %v6726_v0 }
 0xeaa   :  { %5919 = vmatmul.mubr.msk.f32.vlgmr.msra.gmra.mrb[106].mxu0 %vm944_vm13, %v8098_v58 }
 0xeab   :  { %5938 = vmatprep.mubr.msk.f32.mxu0 %vm6727_vm0, %v6728_v6 }
 0xf69   :  { %v2857_v61 = vpop.f32.mrb[96].mxu0 }
 0xf6a   :  { %v2881_v43 = vmul.f32 0.17677669, %v2857_v61  ;;  %v5876_v9 = vpop.f32.mrb[97].mxu0 }
 0xf6c   :  { %v2887_v38 = vsel %vm2886_vm5, %v2881_v43, -inf }
 0xf6d   :  { %2888 = vmax.xlane.f32.xlu1 %v2887_v38  ;;  %v2862_v39 = vpop.f32.mrb[98].mxu0 }
 0xf6e   :  { %v2882_v41 = vmul.f32 0.17677669, %v2862_v39  ;;  %v5879_v1 = vpop.f32.mrb[99].mxu0 }
 0xf70   :  { %v2890_v42 = vsel %vm2886_vm5, %v2882_v41, -inf }
 0xf71   :  { %2891 = vmax.xlane.f32.xlu0 %v2890_v42  ;;  %v2867_v16 = vpop.f32.mrb[100].mxu0 }
 0xf72   :  { %v2883_v19 = vmul.f32 0.17677669, %v2867_v16  ;;  %v5882_v31 = vpop.f32.mrb[101].mxu0 }
 0xf74   :  { %v2893_v58 = vsel %vm2886_vm5, %v2883_v19, -inf }
 0xf75   :  { %2894 = vmax.xlane.f32.xlu1 %v2893_v58  ;;  %v2872_v62 = vpop.f32.mrb[102].mxu0 }
 0xf76   :  { %v2884_v2 = vmul.f32 0.17677669, %v2872_v62  ;;  %v5885_v47 = vpop.f32.mrb[103].mxu0 }
 0xf78   :  { %v2896_v20 = vsel %vm2886_vm5, %v2884_v2, -inf }
 0xf79   :  { %2897 = vmax.xlane.f32.xlu0 %v2896_v20  ;;  %v2877_v57 = vpop.f32.mrb[104].mxu0 }
 0xf7a   :  { %v2885_v7 = vmul.f32 0.17677669, %v2877_v57  ;;  %v5888_v22 = vpop.f32.mrb[105].mxu0 }
 0xf7c   :  { %v2900_v10 = vsel %vm2899_vm6, %v2885_v7, -inf }
 0xf7d   :  { %2901 = vmax.xlane.f32.xlu1 %v2900_v10  ;;  %v5920_v13 = vpop.f32.mrb[106].mxu0 }
 0xf7e   :  { %v3179_v14 = vmul.f32 0.17677669, %v5920_v13  ;;  %v3169_v52 = vpop.f32.mrb[107].mxu0 }
 0xf7f   :  { %v3178_v15 = vmul.f32 0.17677669, %v3169_v52 }
 0xf80   :  { %v3183_v53 = vsel %vm2679_vm4, %v3179_v14, -inf }
 0xf81   :  { %3184 = vmax.xlane.f32.xlu1 %v3183_v53  ;;  %v3180_v18 = vsel %vm2679_vm4, %v3178_v15, -inf }
 0xf82   :  { %3181 = vmax.xlane.f32.xlu0 %v3180_v18 }
 0xffa   :  { %v2889_v23 = vpop.xlane.xlu1 %2888 }
 0xffb   :  { %v2903_v3 = vsub.f32 %v2881_v43, %v2889_v23 }
 0xffd   :  { %v2908_v54 = vmul.f32 1.442695, %v2903_v3 }
 0xffe   :  { %v2892_v17 = vpop.xlane.xlu0 %2891 }
 0xfff   :  { %6660 = vpow2.f32 %v2908_v54  ;;  %v2904_v21 = vsub.f32 %v2882_v41, %v2892_v17 }
0x1001   :  { %v2910_v60 = vmul.f32 1.442695, %v2904_v21 }
0x1002   :  { %v2895_v51 = vpop.xlane.xlu1 %2894 }
0x1003   :  { %6662 = vpow2.f32 %v2910_v60  ;;  %v2905_v55 = vsub.f32 %v2883_v19, %v2895_v51 }
0x1005   :  { %v2912_v26 = vmul.f32 1.442695, %v2905_v55 }
0x1006   :  { %v2898_v24 = vpop.xlane.xlu0 %2897 }
0x1007   :  { %6664 = vpow2.f32 %v2912_v26  ;;  %v2906_v34 = vsub.f32 %v2884_v2, %v2898_v24 }
0x1009   :  { %v6661_v63 = vpop.eup %6660  ;;  %v2914_v28 = vmul.f32 1.442695, %v2906_v34 }
0x100a   :  { %v2902_v59 = vpop.xlane.xlu1 %2901  ;;  %v2918_v49 = vsel %vm2886_vm5, %v6661_v63, 0.0 }
0x100b   :  { %6666 = vpow2.f32 %v2914_v28  ;;  %v2907_v46 = vsub.f32 %v2885_v7, %v2902_v59  ;;  %2919 = vadd.xlane.f32.xlu0 %v2918_v49 }
0x100d   :  { %v6663_v45 = vpop.eup %6662  ;;  %v2916_v48 = vmul.f32 1.442695, %v2907_v46 }
0x100e   :  { %v3185_v56 = vpop.xlane.xlu1 %3184  ;;  %v2921_v35 = vsel %vm2886_vm5, %v6663_v45, 0.0 }
0x100f   :  { %6668 = vpow2.f32 %v2916_v48  ;;  %v3187_v61 = vsub.f32 %v3179_v14, %v3185_v56  ;;  %2922 = vadd.xlane.f32.xlu1 %v2921_v35  ;;  %v3182_v43 = vpop.xlane.xlu0 %3181 }
0x1010   :  { %v3186_v9 = vsub.f32 %v3178_v15, %v3182_v43 }
0x1011   :  { %v6665_v38 = vpop.eup %6664  ;;  %v3190_v39 = vmul.f32 1.442695, %v3187_v61 }
0x1012   :  { %v3188_v41 = vmul.f32 1.442695, %v3186_v9  ;;  %v2924_v1 = vsel %vm2886_vm5, %v6665_v38, 0.0 }
0x1013   :  { %6670 = vpow2.f32 %v3190_v39  ;;  %2925 = vadd.xlane.f32.xlu0 %v2924_v1 }
0x1014   :  { %6672 = vpow2.f32 %v3188_v41 }
0x1015   :  { %v6667_v42 = vpop.eup %6666 }
0x1016   :  { %v2927_v16 = vsel %vm2886_vm5, %v6667_v42, 0.0 }
0x1017   :  { %2928 = vadd.xlane.f32.xlu1 %v2927_v16 }
0x1019   :  { %v6669_v19 = vpop.eup %6668 }
0x101a   :  { %v2930_v31 = vsel %vm2899_vm6, %v6669_v19, 0.0 }
0x101b   :  { %2931 = vadd.xlane.f32.xlu0 %v2930_v31 }
0x101d   :  { %v6671_v58 = vpop.eup %6670 }
0x101e   :  { %v6673_v62 = vpop.eup %6672  ;;  %v3195_v2 = vsel %vm2679_vm4, %v6671_v58, 0.0 }
0x101f   :  { %3196 = vadd.xlane.f32.xlu0 %v3195_v2  ;;  %v3192_v47 = vsel %vm2679_vm4, %v6673_v62, 0.0 }
0x1020   :  { %3193 = vadd.xlane.f32.xlu1 %v3192_v47 }
0x1098   :  { %v2920_v20 = vpop.xlane.xlu0 %2919 }
0x1099   :  { %6674 = vrcp.f32 %v2920_v20 }
0x109c   :  { %v2923_v57 = vpop.xlane.xlu1 %2922 }
0x109d   :  { %6676 = vrcp.f32 %v2923_v57  ;;  %v6732_v57 = vmov 0  }
0x109e   :  { %6644 = vset.pattern.permute.xlu1 %v6732_v57  ;;  %6645 = vset.pattern.permute.xlu0 %v6732_v57 }
0x10a0   :  { %v2926_v7 = vpop.xlane.xlu0 %2925 }
0x10a1   :  { %6678 = vrcp.f32 %v2926_v7 }
0x10a3   :  { %v6675_v22 = vpop.eup %6674 }
0x10a4   :  { %v2938_v10 = vmul.f32 %v6675_v22, %v6661_v63  ;;  %v2929_v13 = vpop.xlane.xlu1 %2928 }
0x10a5   :  { %6680 = vrcp.f32 %v2929_v13 }
0x10a6   :  { %5894 = vmatmul.mubr.msk.f32.vlgmr.msra.gmra.mrb[100].mxu1 %vm2886_vm5, %v2938_v10 }
0x10a7   :  { %v6677_v14 = vpop.eup %6676  ;;  %6495 = vmatpush3.bf16.msra.mxu1 %v8136_v32  ;;  %5896 = vmatprep.mubr.msk.f32.mxu1 %vm6727_vm0, %v6728_v6 }
0x10a8   :  { %6497 = vmatprep.subr.bf16.mxu1 %v8156_v4  ;;  %v2932_v52 = vpop.xlane.xlu0 %2931  ;;  %v2939_v15 = vmul.f32 %v6677_v14, %v6663_v45 }
0x10a9   :  { %6682 = vrcp.f32 %v2932_v52 }
0x10aa   :  { %5897 = vmatmul.mubr.msk.f32.gmra.mrb[102].mxu1 %vm2886_vm5, %v2939_v15 }
0x10ab   :  { %v6679_v53 = vpop.eup %6678  ;;  %6499 = vmatpush3.bf16.msra.mxu1 %v8156_v4  ;;  %5899 = vmatprep.mubr.msk.f32.mxu1 %vm6727_vm0, %v6728_v6 }
0x10ac   :  { %5929 = vmatprep.subr.msk.mxu1 %vm2575_vm2, %v8139_v8  ;;  %v3197_v32 = vpop.xlane.xlu0 %3196  ;;  %v2940_v18 = vmul.f32 %v6679_v53, %v6665_v38 }
0x10ad   :  { %6684 = vrcp.f32 %v3197_v32  ;;  %v3194_v23 = vpop.xlane.xlu1 %3193 }
0x10ae   :  { %6686 = vrcp.f32 %v3194_v23  ;;  %5900 = vmatmul.mubr.msk.f32.gmra.mrb[104].mxu1 %vm2886_vm5, %v2940_v18 }
0x10af   :  { %v6681_v3 = vpop.eup %6680  ;;  %5930 = vmatpush3.msk.msra.mxu1 %vm2575_vm2, %v8139_v8  ;;  %5902 = vmatprep.mubr.msk.f32.mxu1 %vm6727_vm0, %v6728_v6 }
0x10b0   :  { %v2941_v4 = vmul.f32 %v6681_v3, %v6667_v42  ;;  %6504 = vmatprep.subr.bf16.mxu1 %v6726_v0 }
0x10b2   :  { %5903 = vmatmul.mubr.msk.f32.gmra.mrb[106].mxu1 %vm2886_vm5, %v2941_v4 }
0x10b3   :  { %v6683_v54 = vpop.eup %6682  ;;  %5905 = vmatprep.mubr.msk.f32.mxu1 %vm6727_vm0, %v6728_v6 }
0x10b4   :  { %v2942_v17 = vmul.f32 %v6683_v54, %v6669_v19 }
0x10b6   :  { %5906 = vmatmul.mubr.msk.f32.gmra.mrb[108].mxu1 %vm2886_vm5, %v2942_v17 }
0x10b7   :  { %v6685_v21 = vpop.eup %6684 }
0x10b8   :  { %v6687_v60 = vpop.eup %6686  ;;  %v3201_v55 = vmul.f32 %v6685_v21, %v6671_v58 }
0x10b9   :  { %v3200_v51 = vmul.f32 %v6687_v60, %v6673_v62 }
0x10bb   :  { %5931 = vmatprep.mubr.msk.f32.mxu1 %vm2679_vm4, %v3200_v51 }
0x10bc   :  { %5932 = vmatmul.mubr.msk.f32.vlgmr.msra.gmra.mrb[110].mxu1 %vm2679_vm4, %v3201_v55 }
0x10bd   :  { %5957 = vmatprep.mubr.msk.f32.mxu1 %vm6727_vm0, %v6728_v6 }
0x1179   :  { %v8233_v26 = vpop.f32.mrb[100].mxu1 }
0x117a   :  { %v5895_v24 = vpop.f32.mrb[101].mxu1 }
0x117d   :  { %v8235_v34 = vpop.f32.mrb[102].mxu1 }
0x117e   :  { %v5898_v63 = vpop.f32.mrb[103].mxu1 }
0x1181   :  { %v8237_v28 = vpop.f32.mrb[104].mxu1 }
0x1182   :  { %v5901_v59 = vpop.f32.mrb[105].mxu1 }
0x1185   :  { %v8239_v49 = vpop.f32.mrb[106].mxu1 }
0x1186   :  { %v5904_v46 = vpop.f32.mrb[107].mxu1 }
0x1189   :  { %v8241_v45 = vpop.f32.mrb[108].mxu1 }
0x118a   :  { %v5907_v48 = vpop.f32.mrb[109].mxu1 }
0x118f   :  { %v5933_v56 = vpop.f32.mrb[110].mxu1 }
0x1190   :  { %v3276_v35 = vpop.f32.mrb[111].mxu1 }
0x1191   :  { %v6501_v61 = vpack.c.bf16 %v5933_v56, %v3276_v35  ;;  %v2568_v35 = vld [vmem:[%s8780_s13] sm:$0xff] }
0x1193   :  { %6503 = vmatpush3.bf16.xpose.msk.msra.mxu0 %vm8051_vm3, %v6501_v61  ;;  %6506 = vmatpush3.bf16.msra.mxu1 %v6501_v61  ;;  %v2570_v61 = vld [vmem:[%s8780_s13 + $0x10] sm:$0xff] }
0x1194   :  { %6507 = vmatprep.subr.bf16.mxu1 %v6726_v0  ;;  %6519 = vmatprep.subr.bf16.mxu0 %v6726_v0 }
0x119a   :  { %5939 = vmatmul.mubr.msk.f32.vlgmr.msra.gmra.mrb[108].mxu0 %vm944_vm13, %v8132_v5 }
0x119b   :  { %5941 = vmatprep.mubr.msk.f32.mxu0 %vm6727_vm0, %v6728_v6 }
0x119e   :  { %5942 = vmatmul.mubr.msk.f32.gmra.mrb[110].mxu0 %vm944_vm13, %v8126_v12 }
0x119f   :  { %5944 = vmatprep.mubr.msk.f32.mxu0 %vm6727_vm0, %v6728_v6 }
0x11a2   :  { %5945 = vmatmul.mubr.msk.f32.gmra.mrb[112].mxu0 %vm944_vm13, %v8088_v11 }
0x11a3   :  { %5947 = vmatprep.mubr.msk.f32.mxu0 %vm6727_vm0, %v6728_v6 }
0x11a6   :  { %5948 = vmatmul.mubr.msk.f32.gmra.mrb[114].mxu0 %vm944_vm13, %v8150_v36 }
0x11a7   :  { %5950 = vmatprep.mubr.msk.f32.mxu0 %vm6727_vm0, %v6728_v6 }
0x11aa   :  { %5951 = vmatmul.mubr.msk.f32.gmra.mrb[116].mxu0 %vm944_vm13, %v8139_v8 }
0x11ab   :  { %6035 = vmatprep.mubr.msk.f32.mxu0 %vm6727_vm0, %v6728_v6 }
0x126d   :  { %v3357_v29 = vpop.f32.mrb[108].mxu0 }
0x126e   :  { %v3381_v12 = vmul.f32 0.17677669, %v3357_v29  ;;  %v5940_v5 = vpop.f32.mrb[109].mxu0  ;;  %v2571_v29 = vld [vmem:[%s8780_s13 + $0x18] sm:$0xff] }
0x126f   :  { %v2572_v5 = vld [vmem:[%s8780_s13 + $0x20] sm:$0xf] }
0x1270   :  { %v3386_v43 = vsel %vm2886_vm5, %v3381_v12, -inf }
0x1271   :  { %3387 = vmax.xlane.f32.xlu1 %v3386_v43  ;;  %v3362_v9 = vpop.f32.mrb[110].mxu0 }
0x1272   :  { %v3382_v38 = vmul.f32 0.17677669, %v3362_v9  ;;  %v5943_v39 = vpop.f32.mrb[111].mxu0 }
0x1274   :  { %v3389_v36 = vsel %vm2886_vm5, %v3382_v38, -inf }
0x1275   :  { %3390 = vmax.xlane.f32.xlu0 %v3389_v36  ;;  %v3367_v41 = vpop.f32.mrb[112].mxu0 }
0x1276   :  { %v3383_v1 = vmul.f32 0.17677669, %v3367_v41  ;;  %v5946_v42 = vpop.f32.mrb[113].mxu0 }
0x1278   :  { %v3392_v8 = vsel %vm2886_vm5, %v3383_v1, -inf }
0x1279   :  { %3393 = vmax.xlane.f32.xlu1 %v3392_v8  ;;  %v3372_v16 = vpop.f32.mrb[114].mxu0 }
0x127a   :  { %v3384_v19 = vmul.f32 0.17677669, %v3372_v16  ;;  %v5949_v31 = vpop.f32.mrb[115].mxu0 }
0x127c   :  { %v3395_v58 = vsel %vm2886_vm5, %v3384_v19, -inf }
0x127d   :  { %3396 = vmax.xlane.f32.xlu0 %v3395_v58  ;;  %v3377_v62 = vpop.f32.mrb[116].mxu0 }
0x127e   :  { %v3385_v2 = vmul.f32 0.17677669, %v3377_v62  ;;  %v5952_v47 = vpop.f32.mrb[117].mxu0 }
0x1280   :  { %v3398_v20 = vsel %vm2899_vm6, %v3385_v2, -inf }
0x1281   :  { %3399 = vmax.xlane.f32.xlu1 %v3398_v20 }
0x12fe   :  { %v3388_v7 = vpop.xlane.xlu1 %3387 }
0x12ff   :  { %v3401_v22 = vsub.f32 %v3381_v12, %v3388_v7  ;;  %v2569_v12 = vld [vmem:[%s8780_s13 + $0x8] sm:$0xff] }
0x1301   :  { %v3406_v10 = vmul.f32 1.442695, %v3401_v22 }
0x1302   :  { %v3391_v13 = vpop.xlane.xlu0 %3390 }
0x1303   :  { %6688 = vpow2.f32 %v3406_v10  ;;  %v3402_v14 = vsub.f32 %v3382_v38, %v3391_v13 }
0x1305   :  { %v3408_v52 = vmul.f32 1.442695, %v3402_v14 }
0x1306   :  { %v3394_v15 = vpop.xlane.xlu1 %3393 }
0x1307   :  { %6690 = vpow2.f32 %v3408_v52  ;;  %v3403_v53 = vsub.f32 %v3383_v1, %v3394_v15 }
0x1309   :  { %v3410_v32 = vmul.f32 1.442695, %v3403_v53 }
0x130a   :  { %v3397_v18 = vpop.xlane.xlu0 %3396 }
0x130b   :  { %6692 = vpow2.f32 %v3410_v32  ;;  %v3404_v23 = vsub.f32 %v3384_v19, %v3397_v18 }
0x130d   :  { %v6689_v3 = vpop.eup %6688  ;;  %v3412_v4 = vmul.f32 1.442695, %v3404_v23 }
0x130e   :  { %v3400_v54 = vpop.xlane.xlu1 %3399  ;;  %v3416_v17 = vsel %vm2886_vm5, %v6689_v3, 0.0 }
0x130f   :  { %6694 = vpow2.f32 %v3412_v4  ;;  %v3405_v21 = vsub.f32 %v3385_v2, %v3400_v54  ;;  %3417 = vadd.xlane.f32.xlu0 %v3416_v17 }
0x1311   :  { %v6691_v60 = vpop.eup %6690  ;;  %v3414_v51 = vmul.f32 1.442695, %v3405_v21 }
0x1312   :  { %v3419_v55 = vsel %vm2886_vm5, %v6691_v60, 0.0 }
0x1313   :  { %6696 = vpow2.f32 %v3414_v51  ;;  %3420 = vadd.xlane.f32.xlu1 %v3419_v55 }
0x1315   :  { %v6693_v24 = vpop.eup %6692 }
0x1316   :  { %v3422_v63 = vsel %vm2886_vm5, %v6693_v24, 0.0 }
0x1317   :  { %3423 = vadd.xlane.f32.xlu0 %v3422_v63 }
0x1319   :  { %v6695_v59 = vpop.eup %6694 }
0x131a   :  { %v3425_v46 = vsel %vm2886_vm5, %v6695_v59, 0.0 }
0x131b   :  { %3426 = vadd.xlane.f32.xlu1 %v3425_v46 }
0x131d   :  { %v6697_v48 = vpop.eup %6696 }
0x131e   :  { %v3428_v56 = vsel %vm2899_vm6, %v6697_v48, 0.0 }
0x131f   :  { %3429 = vadd.xlane.f32.xlu0 %v3428_v56 }
0x132c   :  { %3050 = vperm.xlu1 %6644, %v2568_v35  }
0x1330   :  { %3060 = vperm.xlu1 %6644, %v2570_v61  }
0x1334   :  { %3065 = vperm.xlu1 %6644, %v2571_v29  }
0x1335   :  { %3055 = vperm.xlu0 %6645, %v2569_v12  }
0x1338   :  { %3070 = vperm.xlu1 %6644, %v2572_v5  }
0x139c   :  { %v3418_v43 = vpop.xlane.xlu0 %3417 }
0x139d   :  { %6698 = vrcp.f32 %v3418_v43 }
0x13a0   :  { %v3421_v9 = vpop.xlane.xlu1 %3420 }
0x13a1   :  { %6700 = vrcp.f32 %v3421_v9 }
0x13a4   :  { %v3424_v38 = vpop.xlane.xlu0 %3423 }
0x13a5   :  { %6702 = vrcp.f32 %v3424_v38 }
0x13a7   :  { %v6699_v39 = vpop.eup %6698 }
0x13a8   :  { %v3436_v36 = vmul.f32 %v6699_v39, %v6689_v3  ;;  %v3427_v41 = vpop.xlane.xlu1 %3426 }
0x13a9   :  { %6704 = vrcp.f32 %v3427_v41 }
0x13aa   :  { %5958 = vmatmul.mubr.msk.f32.vlgmr.msra.gmra.mrb[112].mxu1 %vm2886_vm5, %v3436_v36 }
0x13ab   :  { %v6701_v1 = vpop.eup %6700  ;;  %5960 = vmatprep.mubr.msk.f32.mxu1 %vm6727_vm0, %v6728_v6 }
0x13ac   :  { %v3430_v42 = vpop.xlane.xlu0 %3429  ;;  %v3051_v8 = vpop.permute.xlu1 %3050  ;;  %v3437_v16 = vmul.f32 %v6701_v1, %v6691_v60  ;;  %v6720_v1 = vld [vmem:[%s8776_s9 + $0x18] sm:$0xff] }
0x13ad   :  { %6706 = vrcp.f32 %v3430_v42  ;;  %v6721_v42 = vld [vmem:[%s8776_s9 + $0x20] sm:$0xff] }
0x13ae   :  { %5961 = vmatmul.mubr.msk.f32.gmra.mrb[114].mxu1 %vm2886_vm5, %v3437_v16  ;;  %v6723_v16 = vld [vmem:[%s8776_s9 + $0x30] sm:$0xff] }
0x13af   :  { %v6703_v19 = vpop.eup %6702  ;;  %5963 = vmatprep.mubr.msk.f32.mxu1 %vm6727_vm0, %v6728_v6 }
0x13b0   :  { %v3061_v31 = vpop.permute.xlu1 %3060  ;;  %v3438_v58 = vmul.f32 %v6703_v19, %v6693_v24  ;;  %v6724_v19 = vld [vmem:[%s8776_s9 + $0x38] sm:$0xff] }
0x13b1   :  { %v3075_v2 = vmul.f32 %v3061_v31, %v8237_v28 }
0x13b2   :  { %5964 = vmatmul.mubr.msk.f32.gmra.mrb[116].mxu1 %vm2886_vm5, %v3438_v58 }
0x13b3   :  { %v6705_v62 = vpop.eup %6704  ;;  %5966 = vmatprep.mubr.msk.f32.mxu1 %vm6727_vm0, %v6728_v6  ;;  %v3561_v22 = vrot.slane %v3075_v2, 4 }
0x13b4   :  { %v3056_v47 = vpop.permute.xlu0 %3055  ;;  %v3439_v20 = vmul.f32 %v6705_v62, %v6695_v59  ;;  %v3066_v54 = vpop.permute.xlu1 %3065 }
0x13b5   :  { %v3074_v57 = vmul.f32 %v3056_v47, %v8235_v34  ;;  %v3073_v34 = vmul.f32 %v3051_v8, %v8233_v26  ;;  %v3076_v29 = vmul.f32 %v3066_v54, %v8239_v49 }
0x13b6   :  { %5967 = vmatmul.mubr.msk.f32.gmra.mrb[118].mxu1 %vm2886_vm5, %v3439_v20 }
0x13b7   :  { %v6707_v7 = vpop.eup %6706  ;;  %v3560_v10 = vrot.slane %v3074_v57, 4  ;;  %5969 = vmatprep.mubr.msk.f32.mxu1 %vm6727_vm0, %v6728_v6  ;;  %v8313_v4 = vadd.f32 %v3073_v34, %v8043_v27  ;;  %v8344_v39 = vadd.f32 %v3076_v29, %v8070_v37  ;;  %v6717_v37 = vld [vmem:[%s8776_s9] sm:$0xff] }
0x13b8   :  { %v3440_v13 = vmul.f32 %v6707_v7, %v6697_v48 }
0x13b9   :  { %v3562_v14 = vsel %vm2575_vm2, %v3560_v10, %v3561_v22 }
0x13ba   :  { %5970 = vmatmul.mubr.msk.f32.gmra.mrb[120].mxu1 %vm2886_vm5, %v3440_v13  ;;  %v8323_v59 = vadd.f32 %v3562_v14, %v8038_v25 }
0x13bb   :  { %5990 = vmatprep.mubr.msk.f32.mxu1 %vm6727_vm0, %v6728_v6 }
0x147d   :  { %v3522_v28 = vpop.f32.mrb[112].mxu1 }
0x147e   :  { %v3546_v52 = vmul.f32 %v3522_v28, %v3051_v8  ;;  %v5959_v15 = vpop.f32.mrb[113].mxu1  ;;  %v6722_v8 = vld [vmem:[%s8776_s9 + $0x28] sm:$0xff] }
0x1480   :  { %v3553_v53 = vrot.slane %v3546_v52, 4 }
0x1481   :  { %v3527_v32 = vpop.f32.mrb[114].mxu1 }
0x1482   :  { %v3572_v18 = vsel %vm2575_vm2, %v3074_v57, %v3553_v53  ;;  %v3547_v23 = vmul.f32 %v3527_v32, %v3056_v47  ;;  %v5962_v3 = vpop.f32.mrb[115].mxu1 }
0x1483   :  { %v8316_v17 = vadd.f32 %v3572_v18, %v8040_v50  ;;  %v3071_v50 = vpop.permute.xlu1 %3070 }
0x1484   :  { %v3554_v21 = vrot.slane %v3547_v23, 4  ;;  %v3573_v60 = vsel %vm2575_vm2, %v3561_v22, %v3547_v23 }
0x1485   :  { %v3532_v51 = vpop.f32.mrb[116].mxu1  ;;  %v6508_v26 = vpack.c.bf16 %v8316_v17, %v8313_v4  ;;  %v8336_v25 = vadd.f32 %v3573_v60, %v8059_v33  ;;  %v4715_v60 = vld [vmem:[%s8781_s14 + $0x60] sm:$0xff] }
0x1486   :  { %v3555_v55 = vsel %vm2575_vm2, %v3553_v53, %v3554_v21  ;;  %v3548_v24 = vmul.f32 %v3532_v51, %v3061_v31  ;;  %v5965_v63 = vpop.f32.mrb[117].mxu1  ;;  %v6725_v31 = vld [vmem:[%s8776_s9 + $0x40] sm:$0xff]  ;;  %v4716_v51 = vld [vmem:[%s8781_s14 + $0x68] sm:$0xff] }
0x1487   :  { %v8326_v27 = vadd.f32 %v3555_v55, %v8033_v30  ;;  %6509 = vmatpush3.bf16.msra.mxu1 %v6508_v26  ;;  %v3077_v30 = vmul.f32 %v3071_v50, %v8241_v45  ;;  %v4717_v26 = vld [vmem:[%s8781_s14 + $0x70] sm:$0xff]  ;;  %v6550_v55 = vpack.c.bf16 %v4716_v51, %v4715_v60  ;;  %v3584_v63 = vld [vmem:[%s8781_s14] sm:$0xff] }
0x1488   :  { %6510 = vmatprep.subr.bf16.mxu1 %v6726_v0  ;;  %v8330_v46 = vadd.f32 %v3548_v24, %v8088_v11  ;;  %v4718_v24 = vld [vmem:[%s8781_s14 + $0x78] sm:$0xff] }
0x1489   :  { %v3537_v48 = vpop.f32.mrb[118].mxu1  ;;  %v6511_v56 = vpack.c.bf16 %v8323_v59, %v8326_v27 }
0x148a   :  { %v3549_v35 = vmul.f32 %v3537_v48, %v3066_v54  ;;  %v5968_v61 = vpop.f32.mrb[119].mxu1  ;;  %v6514_v11 = vpack.c.bf16 %v8330_v46, %v8336_v25  ;;  %v6553_v48 = vpack.c.bf16 %v4718_v24, %v4717_v26 }
0x148b   :  { %6512 = vmatpush3.bf16.msra.mxu1 %v6511_v56  ;;  %v4720_v61 = vld [vmem:[%s8781_s14 + $0x88] sm:$0xff] }
0x148c   :  { %v3567_v12 = vrot.slane %v3549_v35, 4  ;;  %6513 = vmatprep.subr.bf16.mxu1 %v6726_v0  ;;  %v4719_v35 = vld [vmem:[%s8781_s14 + $0x80] sm:$0xff] }
0x148d   :  { %v3542_v5 = vpop.f32.mrb[120].mxu1  ;;  %v6556_v29 = vpack.c.bf16 %v4720_v61, %v4719_v35 }
0x148e   :  { %v3574_v43 = vsel %vm2575_vm2, %v3077_v30, %v3567_v12  ;;  %v3550_v9 = vmul.f32 %v3542_v5, %v3071_v50  ;;  %v5971_v38 = vpop.f32.mrb[121].mxu1  ;;  %v3585_v50 = vld [vmem:[%s8781_s14 + $0x8] sm:$0xff]  ;;  %v4721_v30 = vld [vmem:[%s8781_s14 + $0x90] sm:$0xff] }
0x148f   :  { %v8347_v33 = vadd.f32 %v3574_v43, %v8078_v40  ;;  %6515 = vmatpush3.bf16.msra.mxu1 %v6514_v11  ;;  %v6718_v40 = vld [vmem:[%s8776_s9 + $0x8] sm:$0xff]  ;;  %v6532_v56 = vpack.c.bf16 %v3585_v50, %v3584_v63  ;;  %v3586_v5 = vld [vmem:[%s8781_s14 + $0x10] sm:$0xff]  ;;  %v3587_v43 = vld [vmem:[%s8781_s14 + $0x18] sm:$0xff] }
0x1490   :  { %v3568_v49 = vrot.slane %v3550_v9, 4  ;;  %6516 = vmatprep.subr.bf16.mxu1 %v6726_v0  ;;  %v6535_v9 = vpack.c.bf16 %v3587_v43, %v3586_v5  ;;  %v4723_v38 = vld [vmem:[%s8781_s14 + $0xa0] sm:$0xff] }
0x1491   :  { %v6517_v45 = vpack.c.bf16 %v8347_v33, %v8344_v39 }
0x1492   :  { %v3569_v36 = vsel %vm2575_vm2, %v3567_v12, %v3568_v49  ;;  %v4722_v12 = vld [vmem:[%s8781_s14 + $0x98] sm:$0xff]  ;;  %v4724_v49 = vld [vmem:[%s8781_s14 + $0xa8] sm:$0xff] }
0x1493   :  { %6518 = vmatpush3.bf16.msra.mxu1 %v6517_v45  ;;  %v8355_v41 = vadd.f32 %v3569_v36, %v8129_v44  ;;  %v6719_v44 = vld [vmem:[%s8776_s9 + $0x10] sm:$0xff]  ;;  %v6559_v11 = vpack.c.bf16 %v4722_v12, %v4721_v30  ;;  %v3588_v45 = vld [vmem:[%s8781_s14 + $0x20] sm:$0xff]  ;;  %v6562_v36 = vpack.c.bf16 %v4724_v49, %v4723_v38 }
0x1494   :  { %5988 = vmatprep.subr.mxu1 %v6728_v6 }
0x1497   :  { %5989 = vmatpush3.msra.mxu1 %v8355_v41 }
0x1498   :  { %5991 = vmatmul.mubr.msk.f32.vlgmr.msra.gmra.mrb[122].mxu1 %vm606_vm12, %v6717_v37  ;;  %6549 = vmatprep.subr.bf16.mxu1 %v6726_v0 }
0x1499   :  { %5993 = vmatprep.mubr.msk.f32.mxu1 %vm6727_vm0, %v6728_v6  ;;  %6551 = vmatpush3.bf16.msra.mxu1 %v6550_v55 }
0x149a   :  { %6552 = vmatprep.subr.bf16.mxu1 %v6726_v0 }
0x149c   :  { %5994 = vmatmul.mubr.msk.f32.gmra.mrb[124].mxu1 %vm606_vm12, %v6718_v40 }
0x149d   :  { %5996 = vmatprep.mubr.msk.f32.mxu1 %vm6727_vm0, %v6728_v6  ;;  %6554 = vmatpush3.bf16.msra.mxu1 %v6553_v48 }
0x149e   :  { %6555 = vmatprep.subr.bf16.mxu1 %v6726_v0 }
0x14a0   :  { %5997 = vmatmul.mubr.msk.f32.gmra.mrb[126].mxu1 %vm606_vm12, %v6719_v44 }
0x14a1   :  { %5999 = vmatprep.mubr.msk.f32.mxu1 %vm6727_vm0, %v6728_v6  ;;  %6557 = vmatpush3.bf16.msra.mxu1 %v6556_v29 }
0x14a2   :  { %6558 = vmatprep.subr.bf16.mxu1 %v6726_v0 }
0x14a4   :  { %6000 = vmatmul.mubr.msk.f32.gmra.mrb[128].mxu1 %vm606_vm12, %v6720_v1 }
0x14a5   :  { %6002 = vmatprep.mubr.msk.f32.mxu1 %vm6727_vm0, %v6728_v6  ;;  %6560 = vmatpush3.bf16.msra.mxu1 %v6559_v11 }
0x14a6   :  { %6561 = vmatprep.subr.bf16.mxu1 %v6726_v0 }
0x14a8   :  { %6003 = vmatmul.mubr.msk.f32.gmra.mrb[130].mxu1 %vm606_vm12, %v6721_v42 }
0x14a9   :  { %6005 = vmatprep.mubr.msk.f32.mxu1 %vm6727_vm0, %v6728_v6  ;;  %6563 = vmatpush3.bf16.msra.mxu1 %v6562_v36 }
0x14aa   :  { %6564 = vmatprep.subr.bf16.mxu1 %v6726_v0 }
0x14ac   :  { %6006 = vmatmul.mubr.msk.f32.gmra.mrb[132].mxu1 %vm606_vm12, %v6722_v8 }
0x14ad   :  { %6008 = vmatprep.mubr.msk.f32.mxu1 %vm6727_vm0, %v6728_v6 }
0x14b0   :  { %6009 = vmatmul.mubr.msk.f32.gmra.mrb[134].mxu1 %vm606_vm12, %v6723_v16 }
0x14b1   :  { %6011 = vmatprep.mubr.msk.f32.mxu1 %vm6727_vm0, %v6728_v6 }
0x14b4   :  { %6012 = vmatmul.mubr.msk.f32.gmra.mrb[136].mxu1 %vm606_vm12, %v6724_v19 }
0x14b5   :  { %6014 = vmatprep.mubr.msk.f32.mxu1 %vm6727_vm0, %v6728_v6 }
0x14b8   :  { %6015 = vmatmul.mubr.msk.f32.gmra.mrb[138].mxu1 %vm606_vm12, %v6725_v31 }
0x14b9   :  { %6119 = vmatprep.mubr.msk.f32.mxu1 %vm6727_vm0, %v6728_v6 }
0x156b   :  { %v8413_v58 = vpop.f32.mrb[122].mxu1 }
0x156c   :  { %v5992_v62 = vpop.f32.mrb[123].mxu1 }
0x156f   :  { %v8415_v2 = vpop.f32.mrb[124].mxu1 }
0x1570   :  { %v6520_v47 = vpack.c.bf16 %v8415_v2, %v8413_v58  ;;  %v5995_v20 = vpop.f32.mrb[125].mxu1 }
0x1572   :  { %6521 = vmatpush3.bf16.msra.mxu0 %v6520_v47 }
0x1573   :  { %v8419_v57 = vpop.f32.mrb[126].mxu1  ;;  %6522 = vmatprep.subr.bf16.mxu0 %v6726_v0 }
0x1574   :  { %v5998_v7 = vpop.f32.mrb[127].mxu1 }
0x1577   :  { %v3708_v22 = vpop.f32.mrb[128].mxu1 }
0x1578   :  { %v6523_v10 = vpack.c.bf16 %v3708_v22, %v8419_v57  ;;  %3880 = vrot.lane.b32.xlu1 %v3708_v22, %s6730_s23  ;;  %v6001_v13 = vpop.f32.mrb[129].mxu1 }
0x1579   :  { %v3592_v13 = vld [vmem:[%s8781_s14 + $0x40] sm:$0xff] }
0x157a   :  { %6524 = vmatpush3.bf16.msra.mxu0 %v6523_v10 }
0x157b   :  { %v3713_v14 = vpop.f32.mrb[130].mxu1  ;;  %6525 = vmatprep.subr.bf16.mxu0 %v6726_v0 }
0x157c   :  { %3882 = vrot.lane.b32.xlu1 %v3713_v14, %s6730_s23  ;;  %v6004_v28 = vpop.f32.mrb[131].mxu1 }
0x157f   :  { %v8426_v52 = vpop.f32.mrb[132].mxu1 }
0x1580   :  { %v6526_v15 = vpack.c.bf16 %v8426_v52, %v3713_v14  ;;  %v6007_v34 = vpop.f32.mrb[133].mxu1  ;;  %v3593_v14 = vld [vmem:[%s8781_s14 + $0x48] sm:$0xff] }
0x1581   :  { %v6544_v28 = vpack.c.bf16 %v3593_v14, %v3592_v13  ;;  %v4734_v13 = vld [vmem:[%s8781_s14 + $0xf0] sm:$0xff]  ;;  %v4735_v14 = vld [vmem:[%s8781_s14 + $0xf8] sm:$0xff] }
0x1582   :  { %6527 = vmatpush3.bf16.msra.mxu0 %v6526_v15 }
0x1583   :  { %v8429_v53 = vpop.f32.mrb[134].mxu1  ;;  %6528 = vmatprep.subr.bf16.mxu0 %v6726_v0 }
0x1584   :  { %v6010_v32 = vpop.f32.mrb[135].mxu1 }
0x1587   :  { %v8432_v18 = vpop.f32.mrb[136].mxu1 }
0x1588   :  { %v6529_v23 = vpack.c.bf16 %v8432_v18, %v8429_v53  ;;  %v6013_v3 = vpop.f32.mrb[137].mxu1 }
0x1589   :  { %v3595_v3 = vld [vmem:[%s8781_s14 + $0x58] sm:$0xff] }
0x158a   :  { %6530 = vmatpush3.bf16.msra.mxu0 %v6529_v23  ;;  %v3594_v23 = vld [vmem:[%s8781_s14 + $0x50] sm:$0xff] }
0x158b   :  { %v8436_v54 = vpop.f32.mrb[138].mxu1  ;;  %6033 = vmatprep.subr.mxu0 %v6728_v6 }
0x158c   :  { %v6016_v21 = vpop.f32.mrb[139].mxu1 }
0x158d   :  { %v6547_v21 = vpack.c.bf16 %v3595_v3, %v3594_v23 }
0x158e   :  { %6034 = vmatpush3.msra.mxu0 %v8436_v54 }
0x158f   :  { %6036 = vmatmul.mubr.msk.f32.vlgmr.msra.gmra.mrb[118].mxu0 %vm606_vm12, %v6717_v37  ;;  %6531 = vmatprep.subr.bf16.mxu0 %v6726_v0  ;;  %v3589_v37 = vld [vmem:[%s8781_s14 + $0x28] sm:$0xff] }
0x1590   :  { %6038 = vmatprep.mubr.msk.f32.mxu0 %vm6727_vm0, %v6728_v6  ;;  %6533 = vmatpush3.bf16.msra.mxu0 %v6532_v56 }
0x1591   :  { %6534 = vmatprep.subr.bf16.mxu0 %v6726_v0 }
0x1593   :  { %6039 = vmatmul.mubr.msk.f32.gmra.mrb[120].mxu0 %vm606_vm12, %v6718_v40  ;;  %v4725_v40 = vld [vmem:[%s8781_s14 + $0xb0] sm:$0xff] }
0x1594   :  { %6041 = vmatprep.mubr.msk.f32.mxu0 %vm6727_vm0, %v6728_v6  ;;  %6536 = vmatpush3.bf16.msra.mxu0 %v6535_v9 }
0x1595   :  { %6537 = vmatprep.subr.bf16.mxu0 %v6726_v0 }
0x1597   :  { %6042 = vmatmul.mubr.msk.f32.gmra.mrb[122].mxu0 %vm606_vm12, %v6719_v44  ;;  %v4726_v44 = vld [vmem:[%s8781_s14 + $0xb8] sm:$0xff] }
0x1598   :  { %6044 = vmatprep.mubr.msk.f32.mxu0 %vm6727_vm0, %v6728_v6 }
0x159b   :  { %6045 = vmatmul.mubr.msk.f32.gmra.mrb[124].mxu0 %vm606_vm12, %v6720_v1  ;;  %v6538_v1 = vpack.c.bf16 %v3589_v37, %v3588_v45 }
0x159c   :  { %6047 = vmatprep.mubr.msk.f32.mxu0 %vm6727_vm0, %v6728_v6 }
0x159d   :  { %6539 = vmatpush3.bf16.msra.mxu0 %v6538_v1  ;;  %v4729_v1 = vld [vmem:[%s8781_s14 + $0xc8] sm:$0xff] }
0x159e   :  { %6540 = vmatprep.subr.bf16.mxu0 %v6726_v0 }
0x159f   :  { %6048 = vmatmul.mubr.msk.f32.gmra.mrb[126].mxu0 %vm606_vm12, %v6721_v42  ;;  %v3590_v42 = vld [vmem:[%s8781_s14 + $0x30] sm:$0xff] }
0x15a0   :  { %6050 = vmatprep.mubr.msk.f32.mxu0 %vm6727_vm0, %v6728_v6 }
0x15a3   :  { %6051 = vmatmul.mubr.msk.f32.gmra.mrb[128].mxu0 %vm606_vm12, %v6722_v8  ;;  %v3591_v8 = vld [vmem:[%s8781_s14 + $0x38] sm:$0xff] }
0x15a4   :  { %6053 = vmatprep.mubr.msk.f32.mxu0 %vm6727_vm0, %v6728_v6 }
0x15a7   :  { %6054 = vmatmul.mubr.msk.f32.gmra.mrb[130].mxu0 %vm606_vm12, %v6723_v16  ;;  %v6565_v16 = vpack.c.bf16 %v4726_v44, %v4725_v40 }
0x15a8   :  { %6056 = vmatprep.mubr.msk.f32.mxu0 %vm6727_vm0, %v6728_v6 }
0x15a9   :  { %6566 = vmatpush3.bf16.msra.mxu1 %v6565_v16 }
0x15aa   :  { %6567 = vmatprep.subr.bf16.mxu1 %v6726_v0 }
0x15ab   :  { %6057 = vmatmul.mubr.msk.f32.gmra.mrb[132].mxu0 %vm606_vm12, %v6724_v19  ;;  %v6541_v19 = vpack.c.bf16 %v3591_v8, %v3590_v42 }
0x15ac   :  { %6059 = vmatprep.mubr.msk.f32.mxu0 %vm6727_vm0, %v6728_v6 }
0x15ad   :  { %6542 = vmatpush3.bf16.msra.mxu0 %v6541_v19 }
0x15ae   :  { %6543 = vmatprep.subr.bf16.mxu0 %v6726_v0 }
0x15af   :  { %6060 = vmatmul.mubr.msk.f32.gmra.mrb[134].mxu0 %vm606_vm12, %v6725_v31 }
0x15b0   :  { %6086 = vmatprep.mubr.msk.f32.mxu0 %vm6727_vm0, %v6728_v6 }
0x15b1   :  { %6545 = vmatpush3.bf16.msra.mxu0 %v6544_v28 }
0x15b2   :  { %6546 = vmatprep.subr.bf16.mxu0 %v6726_v0 }
0x15b5   :  { %6548 = vmatpush3.bf16.msra.mxu0 %v6547_v21  ;;  %v4736_v21 = vld [vmem:[%s8781_s14 + $0x100] sm:$0xff] }
0x15b6   :  { %6585 = vmatprep.subr.bf16.mxu0 %v6726_v0 }
0x1662   :  { %v3803_v31 = vpop.f32.mrb[118].mxu0 }
0x1663   :  { %v3847_v62 = vmul.f32 2.0, %v3803_v31  ;;  %v6037_v47 = vpop.f32.mrb[119].mxu0 }
0x1664   :  { %v4732_v47 = vld [vmem:[%s8781_s14 + $0xe0] sm:$0xff] }
0x1665   :  { %v3856_v20 = vsub.f32 %v3847_v62, %v8313_v4 }
0x1666   :  { %v3808_v7 = vpop.f32.mrb[120].mxu0 }
0x1667   :  { %v3848_v22 = vmul.f32 2.0, %v3808_v7  ;;  %3910 = vrot.lane.b32.xlu0 %v3856_v20, %s6731_s1  ;;  %v6040_v10 = vpop.f32.mrb[121].mxu0  ;;  %v4733_v20 = vld [vmem:[%s8781_s14 + $0xe8] sm:$0xff] }
0x1669   :  { %v3857_v15 = vsub.f32 %v3848_v22, %v8316_v17  ;;  %v6574_v22 = vpack.c.bf16 %v4733_v20, %v4732_v47 }
0x166a   :  { %v3813_v34 = vpop.f32.mrb[122].mxu0 }
0x166b   :  { %3912 = vrot.lane.b32.xlu0 %v3857_v15, %s6731_s1  ;;  %v6043_v32 = vpop.f32.mrb[123].mxu0  ;;  %v3849_v38 = vmul.f32 2.0, %v3813_v34 }
0x166c   :  { %v6577_v32 = vpack.c.bf16 %v4735_v14, %v4734_v13 }
0x166d   :  { %v3858_v36 = vsub.f32 %v3849_v38, %v8326_v27 }
0x166e   :  { %v3818_v60 = vpop.f32.mrb[124].mxu0 }
0x166f   :  { %v3850_v51 = vmul.f32 2.0, %v3818_v60  ;;  %v6046_v26 = vpop.f32.mrb[125].mxu0  ;;  %v4737_v60 = vld [vmem:[%s8781_s14 + $0x108] sm:$0xff] }
0x1671   :  { %v3859_v55 = vsub.f32 %v3850_v51, %v8323_v59 }
0x1672   :  { %v3823_v24 = vpop.f32.mrb[126].mxu0 }
0x1673   :  { %3916 = vrot.lane.b32.xlu1 %v3859_v55, %s6731_s1  ;;  %v6049_v63 = vpop.f32.mrb[127].mxu0  ;;  %v3851_v35 = vmul.f32 2.0, %v3823_v24  ;;  %v6580_v55 = vpack.c.bf16 %v4737_v60, %v4736_v21 }
0x1675   :  { %v3860_v5 = vsub.f32 %v3851_v35, %v8336_v25 }
0x1676   :  { %v3828_v50 = vpop.f32.mrb[128].mxu0 }
0x1677   :  { %v3852_v48 = vmul.f32 2.0, %v3828_v50  ;;  %3884 = vrot.lane.b32.xlu1 %v8426_v52, %s6730_s23  ;;  %v6052_v56 = vpop.f32.mrb[129].mxu0  ;;  %v4738_v50 = vld [vmem:[%s8781_s14 + $0x110] sm:$0xff] }
0x1679   :  { %v3861_v61 = vsub.f32 %v3852_v48, %v8330_v46  ;;  %v4739_v48 = vld [vmem:[%s8781_s14 + $0x118] sm:$0xff] }
0x167a   :  { %v3833_v29 = vpop.f32.mrb[130].mxu0  ;;  %v6583_v35 = vpack.c.bf16 %v4739_v48, %v4738_v50  ;;  %v4259_v50 = vld [vmem:[%s8783_s16 + $0x8] sm:$0xff]  ;;  %v4260_v48 = vld [vmem:[%s8783_s16 + $0x10] sm:$0xff] }
0x167b   :  { %v3853_v30 = vmul.f32 2.0, %v3833_v29  ;;  %3874 = vrot.lane.b32.xlu1 %v8413_v58, %s6730_s23  ;;  %3920 = vrot.lane.b32.xlu0 %v3861_v61, %s6731_s1  ;;  %v6055_v12 = vpop.f32.mrb[131].mxu0 }
0x167d   :  { %v3862_v11 = vsub.f32 %v3853_v30, %v8344_v39 }
0x167e   :  { %v3838_v43 = vpop.f32.mrb[132].mxu0 }
0x167f   :  { %v3854_v9 = vmul.f32 2.0, %v3838_v43  ;;  %3918 = vrot.lane.b32.xlu1 %v3860_v5, %s6731_s1  ;;  %3922 = vrot.lane.b32.xlu0 %v3862_v11, %s6731_s1  ;;  %v6058_v52 = vpop.f32.mrb[133].mxu0 }
0x1681   :  { %v3863_v49 = vsub.f32 %v3854_v9, %v8347_v33 }
0x1682   :  { %v3843_v45 = vpop.f32.mrb[134].mxu0 }
0x1683   :  { %3886 = vrot.lane.b32.xlu1 %v8429_v53, %s6730_s23  ;;  %3924 = vrot.lane.b32.xlu0 %v3863_v49, %s6731_s1  ;;  %v6061_v58 = vpop.f32.mrb[135].mxu0  ;;  %v3855_v37 = vmul.f32 2.0, %v3843_v45  ;;  %v3881_v53 = vpop.permute.xlu1 %3880 }
0x1684   :  { %v3940_v8 = vsel %vm944_vm13, %v8323_v59, %v3881_v53 }
0x1685   :  { %v3864_v40 = vsub.f32 %v3855_v37, %v8355_v41 }
0x1687   :  { %3876 = vrot.lane.b32.xlu1 %v8415_v2, %s6730_s23  ;;  %3914 = vrot.lane.b32.xlu0 %v3858_v36, %s6731_s1  ;;  %v3883_v44 = vpop.permute.xlu1 %3882  ;;  %v4728_v2 = vld [vmem:[%s8781_s14 + $0xc0] sm:$0xff] }
0x1688   :  { %v3941_v23 = vsel %vm944_vm13, %v8336_v25, %v3883_v44  ;;  %v6610_v44 = vadd.f32 %v8323_v59, %v8313_v4 }
0x168b   :  { %3888 = vrot.lane.b32.xlu1 %v8432_v18, %s6730_s23  ;;  %3926 = vrot.lane.b32.xlu0 %v3864_v40, %s6731_s1  ;;  %v6568_v18 = vpack.c.bf16 %v4729_v1, %v4728_v2  ;;  %v6611_v1 = vadd.f32 %v6610_v44, %v8344_v39 }
0x168f   :  { %3878 = vrot.lane.b32.xlu1 %v8419_v57, %s6730_s23  ;;  %v4730_v57 = vld [vmem:[%s8781_s14 + $0xd0] sm:$0xff] }
0x1693   :  { %3890 = vrot.lane.b32.xlu1 %v8436_v54, %s6730_s23  ;;  %v4731_v54 = vld [vmem:[%s8781_s14 + $0xd8] sm:$0xff] }
0x1694   :  { %v6571_v31 = vpack.c.bf16 %v4731_v54, %v4730_v57  ;;  %v4763_v54 = vld [vmem:[%s8782_s15 + $0x1] ss:$0 sm:$0xff] }
0x16d9   :  { %v3911_v42 = vpop.permute.xlu0 %3910 }
0x16dd   :  { %v3913_v7 = vpop.permute.xlu0 %3912 }
0x16e5   :  { %v3917_v16 = vpop.permute.xlu1 %3916 }
0x16e6   :  { %v3949_v19 = vsel %vm954_vm14, %v3940_v8, %v3917_v16  ;;  %v6617_v8 = vadd.f32 %v8336_v25, %v8316_v17 }
0x16e7   :  { %6120 = vmatmul.mubr.msk.f32.vlgmr.msra.gmra.mrb[140].mxu1 %vm970_vm15, %v3949_v19  ;;  %v4767_v19 = vld [vmem:[%s8782_s15 + $0x2] ss:$0 sm:$0xff] }
0x16e8   :  { %6569 = vmatpush3.bf16.msra.mxu1 %v6568_v18  ;;  %6122 = vmatprep.mubr.msk.f32.mxu1 %vm6727_vm0, %v6728_v6  ;;  %v6618_v57 = vadd.f32 %v6617_v8, %v8347_v33 }
0x16e9   :  { %v3885_v62 = vpop.permute.xlu1 %3884  ;;  %6570 = vmatprep.subr.bf16.mxu1 %v6726_v0 }
0x16ea   :  { %v3942_v24 = vsel %vm944_vm13, %v8330_v46, %v3885_v62 }
0x16ec   :  { %6572 = vmatpush3.bf16.msra.mxu1 %v6571_v31 }
0x16ed   :  { %v3875_v10 = vpop.permute.xlu1 %3874  ;;  %6573 = vmatprep.subr.bf16.mxu1 %v6726_v0  ;;  %v3921_v15 = vpop.permute.xlu0 %3920 }
0x16ee   :  { %v3937_v28 = vsel %vm944_vm13, %v8313_v4, %v3875_v10  ;;  %v3951_v56 = vsel %vm954_vm14, %v3942_v24, %v3921_v15  ;;  %v6624_v4 = vadd.f32 %v8330_v46, %v8326_v27 }
0x16ef   :  { %v3946_v34 = vsel %vm954_vm14, %v3937_v28, %v3911_v42  ;;  %v4759_v42 = vld [vmem:[%s8782_s15] ss:$0 sm:$0xff] }
0x16f0   :  { %6575 = vmatpush3.bf16.msra.mxu1 %v6574_v22  ;;  %6087 = vmatmul.mubr.msk.f32.vlgmr.msra.gmra.mrb[136].mxu0 %vm970_vm15, %v3946_v34  ;;  %v6612_v16 = vadd.f32 %v6611_v1, %v4759_v42  ;;  %v6625_v31 = vadd.f32 %v6624_v4, %v8355_v41 }
0x16f1   :  { %v3919_v3 = vpop.permute.xlu1 %3918  ;;  %6576 = vmatprep.subr.bf16.mxu1 %v6726_v0  ;;  %6089 = vmatprep.mubr.msk.f32.mxu0 %vm6727_vm0, %v6728_v6  ;;  %v3923_v26 = vpop.permute.xlu0 %3922 }
0x16f2   :  { %v3950_v51 = vsel %vm954_vm14, %v3941_v23, %v3919_v3  ;;  %v6613_v59 = vadd.f32 %v6612_v16, %v4763_v54 }
0x16f3   :  { %6123 = vmatmul.mubr.msk.f32.gmra.mrb[142].mxu1 %vm970_vm15, %v3950_v51 }
0x16f4   :  { %6578 = vmatpush3.bf16.msra.mxu1 %v6577_v32  ;;  %6125 = vmatprep.mubr.msk.f32.mxu1 %vm6727_vm0, %v6728_v6  ;;  %v6614_v62 = vadd.f32 %v6613_v59, %v4767_v19 }
0x16f5   :  { %v3887_v63 = vpop.permute.xlu1 %3886  ;;  %6579 = vmatprep.subr.bf16.mxu1 %v6726_v0  ;;  %v3925_v29 = vpop.permute.xlu0 %3924 }
0x16f6   :  { %v3943_v12 = vsel %vm944_vm13, %v8344_v39, %v3887_v63  ;;  %v6619_v39 = vadd.f32 %v6618_v57, %v4759_v42  ;;  %v4258_v63 = vld [vmem:[%s8783_s16] sm:$0xff] }
0x16f7   :  { %6126 = vmatmul.mubr.msk.f32.gmra.mrb[144].mxu1 %vm970_vm15, %v3951_v56  ;;  %v3952_v43 = vsel %vm954_vm14, %v3943_v12, %v3923_v26  ;;  %v4360_v56 = vld [vmem:[%s8784_s17] sm:$0xff] }
0x16f8   :  { %6581 = vmatpush3.bf16.msra.mxu1 %v6580_v55  ;;  %6152 = vmatprep.mubr.msk.f32.mxu1 %vm6727_vm0, %v6728_v6  ;;  %v6620_v25 = vadd.f32 %v6619_v39, %v4763_v54  ;;  %v4774_v57 = vld [vmem:[%s8785_s18] ss:$0 sm:$0xff] }
0x16f9   :  { %v3877_v61 = vpop.permute.xlu1 %3876  ;;  %6582 = vmatprep.subr.bf16.mxu1 %v6726_v0  ;;  %v3915_v52 = vpop.permute.xlu0 %3914 }
0x16fa   :  { %v3938_v30 = vsel %vm944_vm13, %v8316_v17, %v3877_v61  ;;  %v6621_v22 = vadd.f32 %v6620_v25, %v4767_v19  ;;  %v4362_v61 = vld [vmem:[%s8784_s17 + $0x10] sm:$0xff] }
0x16fb   :  { %v3947_v5 = vsel %vm954_vm14, %v3938_v30, %v3913_v7  ;;  %v4363_v30 = vld [vmem:[%s8784_s17 + $0x18] sm:$0xff] }
0x16fc   :  { %6584 = vmatpush3.bf16.msra.mxu1 %v6583_v35  ;;  %6090 = vmatmul.mubr.msk.f32.gmra.mrb[138].mxu0 %vm970_vm15, %v3947_v5  ;;  %v4361_v35 = vld [vmem:[%s8784_s17 + $0x8] sm:$0xff]  ;;  %v6592_v12 = vpack.c.bf16 %v4363_v30, %v4362_v61 }
0x16fd   :  { %v3889_v11 = vpop.permute.xlu1 %3888  ;;  %6092 = vmatprep.mubr.msk.f32.mxu0 %vm6727_vm0, %v6728_v6  ;;  %v3927_v37 = vpop.permute.xlu0 %3926  ;;  %v4365_v5 = vld [vmem:[%s8784_s17 + $0x28] sm:$0xff] }
0x16fe   :  { %v3944_v9 = vsel %vm944_vm13, %v8347_v33, %v3889_v11  ;;  %v6626_v33 = vadd.f32 %v6625_v31, %v4759_v42 }
0x16ff   :  { %6153 = vmatmul.mubr.msk.f32.vlgmr.msra.gmra.mrb[140].mxu1 %vm970_vm15, %v3952_v43  ;;  %v3953_v45 = vsel %vm954_vm14, %v3944_v9, %v3925_v29  ;;  %v6589_v29 = vpack.c.bf16 %v4361_v35, %v4360_v56  ;;  %v4366_v43 = vld [vmem:[%s8784_s17 + $0x30] sm:$0xff]  ;;  %v4367_v9 = vld [vmem:[%s8784_s17 + $0x38] sm:$0xff] }
0x1700   :  { %6155 = vmatprep.mubr.msk.f32.mxu1 %vm6727_vm0, %v6728_v6  ;;  %v6627_v14 = vadd.f32 %v6626_v33, %v4763_v54 }
0x1701   :  { %v3879_v38 = vpop.permute.xlu1 %3878 }
0x1702   :  { %v3939_v49 = vsel %vm944_vm13, %v8326_v27, %v3879_v38  ;;  %v6628_v32 = vadd.f32 %v6627_v14, %v4767_v19  ;;  %v4368_v38 = vld [vmem:[%s8784_s17 + $0x40] sm:$0xff] }
0x1703   :  { %6156 = vmatmul.mubr.msk.f32.gmra.mrb[142].mxu1 %vm970_vm15, %v3953_v45  ;;  %v3948_v58 = vsel %vm954_vm14, %v3939_v49, %v3915_v52  ;;  %v6598_v52 = vpack.c.bf16 %v4367_v9, %v4366_v43  ;;  %v4369_v49 = vld [vmem:[%s8784_s17 + $0x48] sm:$0xff] }
0x1704   :  { %6093 = vmatmul.mubr.msk.f32.gmra.mrb[140].mxu0 %vm970_vm15, %v3948_v58  ;;  %6158 = vmatprep.mubr.msk.f32.mxu1 %vm6727_vm0, %v6728_v6  ;;  %v6601_v45 = vpack.c.bf16 %v4369_v49, %v4368_v38  ;;  %v4370_v58 = vld [vmem:[%s8784_s17 + $0x50] sm:$0xff] }
0x1705   :  { %v3891_v36 = vpop.permute.xlu1 %3890  ;;  %6167 = vmatprep.mubr.msk.f32.mxu0 %vm6727_vm0, %v6728_v6 }
0x1706   :  { %v3945_v40 = vsel %vm944_vm13, %v8355_v41, %v3891_v36  ;;  %v4371_v36 = vld [vmem:[%s8784_s17 + $0x58] sm:$0xff] }
0x1707   :  { %v3954_v53 = vsel %vm954_vm14, %v3945_v40, %v3927_v37  ;;  %v6604_v37 = vpack.c.bf16 %v4371_v36, %v4370_v58 }
0x1708   :  { %6159 = vmatmul.mubr.msk.f32.gmra.mrb[144].mxu1 %vm970_vm15, %v3954_v53 }
0x17c3   :  { %v4036_v2 = vpop.f32.mrb[136].mxu0 }
0x17c4   :  { %v6088_v18 = vpop.f32.mrb[137].mxu0  ;;  %v6615_v20 = vadd.f32 %v6614_v62, %v4036_v2 }
0x17cf   :  { %v4041_v17 = vpop.f32.mrb[138].mxu0 }
0x17d0   :  { %v6091_v47 = vpop.f32.mrb[139].mxu0  ;;  %v6622_v27 = vadd.f32 %v6621_v22, %v4041_v17 }
0x17d2   :  { %v4226_v7 = vpop.f32.mrb[140].mxu1 }
0x17d3   :  { %v6616_v10 = vadd.f32 %v6615_v20, %v4226_v7  ;;  %v6154_v13 = vpop.f32.mrb[141].mxu1 }
0x17d5   :  { %v4255_v3 = vmul.f32 0.5, %v6616_v10 }
0x17d6   :  { %v4231_v46 = vpop.f32.mrb[142].mxu1 }
0x17d7   :  { %v6623_v28 = vadd.f32 %v6622_v27, %v4231_v46  ;;  %v6157_v15 = vpop.f32.mrb[143].mxu1  ;;  %v4046_v34 = vpop.f32.mrb[140].mxu0 }
0x17d8   :  { %v6094_v23 = vpop.f32.mrb[141].mxu0  ;;  %v6629_v21 = vadd.f32 %v6628_v32, %v4046_v34 }
0x17d9   :  { %v4256_v41 = vmul.f32 0.5, %v6623_v28 }
0x17db   :  { %v6586_v60 = vpack.c.bf16 %v4256_v41, %v4255_v3  ;;  %v4236_v51 = vpop.f32.mrb[144].mxu1 }
0x17dc   :  { %v6630_v26 = vadd.f32 %v6629_v21, %v4236_v51  ;;  %v6160_v55 = vpop.f32.mrb[145].mxu1 }
0x17dd   :  { %6587 = vmatpush3.bf16.msra.mxu0 %v6586_v60 }
0x17de   :  { %v4257_v24 = vmul.f32 0.5, %v6630_v26  ;;  %6165 = vmatprep.subr.mxu0 %v6728_v6 }
0x17e1   :  { %6166 = vmatpush3.msra.mxu0 %v4257_v24 }
0x17e2   :  { %6168 = vmatmul.mubr.msk.f32.vlgmr.msra.gmra.mrb[142].mxu0 %vm75_vm1, %v4258_v63  ;;  %6588 = vmatprep.subr.bf16.mxu0 %v6726_v0 }
0x17e3   :  { %6170 = vmatprep.mubr.msk.f32.mxu0 %vm6727_vm0, %v6728_v6  ;;  %6590 = vmatpush3.bf16.msra.mxu0 %v6589_v29 }
0x17e4   :  { %6591 = vmatprep.subr.bf16.mxu0 %v6726_v0 }
0x17e6   :  { %6171 = vmatmul.mubr.msk.f32.gmra.mrb[144].mxu0 %vm75_vm1, %v4259_v50 }
0x17e7   :  { %6173 = vmatprep.mubr.msk.f32.mxu0 %vm6727_vm0, %v6728_v6  ;;  %6593 = vmatpush3.bf16.msra.mxu0 %v6592_v12 }
0x17e8   :  { %6594 = vmatprep.subr.bf16.mxu0 %v6726_v0 }
0x17ea   :  { %6174 = vmatmul.mubr.msk.f32.gmra.mrb[146].mxu0 %vm75_vm1, %v4260_v48 }
0x17eb   :  { %6200 = vmatprep.mubr.msk.f32.mxu0 %vm6727_vm0, %v6728_v6  ;;  %v4364_v6 = vld [vmem:[%s8784_s17 + $0x20] sm:$0xff]  ;;  %vm4452_vm0 = vcmask 392192  }
0x17ec   :  { %v6595_v11 = vpack.c.bf16 %v4365_v5, %v4364_v6 }
0x17ee   :  { %6596 = vmatpush3.bf16.msra.mxu0 %v6595_v11 }
0x17ef   :  { %6597 = vmatprep.subr.bf16.mxu0 %v6726_v0 }
0x17f2   :  { %6599 = vmatpush3.bf16.msra.mxu0 %v6598_v52 }
0x17f3   :  { %6600 = vmatprep.subr.bf16.mxu0 %v6726_v0 }
0x17f6   :  { %6602 = vmatpush3.bf16.msra.mxu0 %v6601_v45 }
0x17f7   :  { %6603 = vmatprep.subr.bf16.mxu0 %v6726_v0 }
0x17fa   :  { %6605 = vmatpush3.bf16.msra.mxu0 %v6604_v37 }
0x18b5   :  { %v4336_v40 = vpop.f32.mrb[142].mxu0 }
0x18b6   :  { %v6169_v53 = vpop.f32.mrb[143].mxu0 }
0x18b9   :  { %v4341_v44 = vpop.f32.mrb[144].mxu0 }
0x18ba   :  { %4351 = vrot.lane.b32.xlu1 %v4341_v44, %s6730_s23  ;;  %v6172_v2 = vpop.f32.mrb[145].mxu0 }
0x18bd   :  { %v4346_v1 = vpop.f32.mrb[146].mxu0 }
0x18be   :  { %4355 = vrot.lane.b32.xlu0 %v4346_v1, %s6731_s1  ;;  %v6175_v0 = vpop.f32.mrb[147].mxu0 }
0x192c   :  { %v4352_v42 = vpop.permute.xlu1 %4351 }
0x192d   :  { %v4358_v18 = vsel %vm944_vm13, %v4336_v40, %v4352_v42 }
0x1930   :  { %v4356_v8 = vpop.permute.xlu0 %4355 }
0x1931   :  { %v4359_v16 = vsel %vm954_vm14, %v4358_v18, %v4356_v8 }
0x1932   :  { %6201 = vmatmul.mubr.msk.f32.vlgmr.msra.gmra.mrb[148].mxu0 %vm970_vm15, %v4359_v16 }
0x1a05   :  { %v4448_v54 = vpop.f32.mrb[148].mxu0 }
0x1a06   :  { %v4449_v4 = vadd.f32 %v4774_v57, %v4448_v54  ;;  %v6202_v59 = vpop.f32.mrb[149].mxu0 }
0x1a08   :  { %4453 = vst.msk [vmem:[%s8786_s19] sm:$0xff] %vm4452_vm0, %v4449_v4 }

</bundles_post_ra>
